<compile_context>
chip_gen: v5e
topology: v5e:2x2
jax: 0.10.0
libtpu: 0.0.40
codegen_flags: <defaults>
</compile_context>

<pallas_src>
import jax
import jax.numpy as jnp
from jax.experimental import pallas as pl
from jax.experimental.pallas import tpu as pltpu


def _round_up(x: int, m: int) -> int:
    return ((x + m - 1) // m) * m


def _mxu_align() -> int:
    """Preferred feature-dim padding granularity (perf only; zero-padding is exact).

    v6e/v7x MXUs are 256x256 -> pad to 256; v2..v5 prefer 128.  Unknown device
    kinds default to 256 (still correct everywhere, just more padding).
    """
    try:
        kind = jax.devices()[0].device_kind.lower()
    except Exception:
        return 128
    for old in ("v2", "v3", "v4", "v5"):
        if old in kind:
            return 128
    return 256


# ---------------------------------------------------------------------------
# Pallas kernel 1: wrapped module forward (Linear -> ReLU -> Linear)
# ---------------------------------------------------------------------------
def _mlp_fwd_kernel(x_ref, w1_ref, b1_ref, w2_ref, b2_ref, o_ref):
    # One batch tile: y = relu(x @ W1 + b1) @ W2 + b2, f32 MXU accumulation.
    x = x_ref[...]
    h = jnp.dot(x, w1_ref[...], preferred_element_type=jnp.float32)       # MXU
    h = jnp.maximum(h + b1_ref[...].astype(jnp.float32), 0.0)             # VPU
    y = jnp.dot(h.astype(w2_ref.dtype), w2_ref[...],
                preferred_element_type=jnp.float32)                       # MXU
    o_ref[...] = (y + b2_ref[...].astype(jnp.float32)).astype(o_ref.dtype)


def mlp_forward(x, w1, b1, w2, b2, *, tile_b=128, out_dtype=jnp.float32):
    """x: [B, Dp]; weights/biases already lane-padded; B % tile_b == 0."""
    B, Dp = x.shape
    Hp = w1.shape[1]
    Op = w2.shape[1]
    assert B % tile_b == 0, "caller pads the batch to a multiple of tile_b"

    in_isz = jnp.dtype(x.dtype).itemsize
    w_isz = jnp.dtype(w1.dtype).itemsize
    out_isz = jnp.dtype(out_dtype).itemsize

    flops = 2 * B * Dp * Hp + 2 * B * Hp * Op
    bytes_accessed = (B * Dp * in_isz + (Dp * Hp + Hp + Hp * Op + Op) * w_isz
                      + B * Op * out_isz)

    # VMEM plan: weights/biases resident (single-buffered), activation tiles
    # double-buffered, plus the f32 intermediates h and y held as values.
    # TODO(synk): for very large Hp (>= ~4096) add an "arbitrary" grid axis over
    # Hp with an f32 VMEM accumulator instead of holding h=[tile_b, Hp] whole.
    vmem_needed = ((Dp * Hp + Hp + Hp * Op + Op) * w_isz
                   + 2 * tile_b * Dp * in_isz
                   + 2 * tile_b * Op * out_isz
                   + 2 * tile_b * Hp * 4 + tile_b * Op * 4)
    vmem_limit = max(32 * 1024 * 1024, vmem_needed * 3 // 2)

    def build(single_buffer_weights: bool):
        def resident(shape):
            # Constant index_map -> double-buffering only wastes VMEM.
            idx = lambda i: (0,) * len(shape)
            if single_buffer_weights:
                return pl.BlockSpec(shape, idx, pipeline_mode=pl.Buffered(1))
            return pl.BlockSpec(shape, idx)

        return pl.pallas_call(
            _mlp_fwd_kernel,
            out_shape=jax.ShapeDtypeStruct((B, Op), out_dtype),
            grid=(B // tile_b,),
            in_specs=[
                pl.BlockSpec((tile_b, Dp), lambda i: (i, 0)),   # pipelined batch tile
                resident((Dp, Hp)),
                resident((1, Hp)),
                resident((Hp, Op)),
                resident((1, Op)),
            ],
            out_specs=pl.BlockSpec((tile_b, Op), lambda i: (i, 0)),  # lane-dense store
            compiler_params=pltpu.CompilerParams(
                dimension_semantics=("parallel",),
                vmem_limit_bytes=vmem_limit),
            cost_estimate=pl.CostEstimate(
                flops=flops, transcendentals=0, bytes_accessed=bytes_accessed),
        )(x, w1, b1, w2, b2)

    try:
        return build(True)
    except Exception:
        # Graceful fallback if this jax version rejects pipeline_mode/Buffered(1)
        # on a grid-based pallas_call (semantics are identical).
        return build(False)


# ---------------------------------------------------------------------------
# Pallas kernel 2: gradient synchronization
#   dist.all_reduce(SUM) followed by grad /= world_size  ==  mean over replicas
# ---------------------------------------------------------------------------
def _grad_sync_kernel(g_ref, o_ref):
    # g_ref: [W, TR, 128] replica-stacked grads; o_ref: [TR, 128] mean.
    W = g_ref.shape[0]
    acc = g_ref[0].astype(jnp.float32)
    for w in range(1, W):                     # statically unrolled over replicas
        acc = acc + g_ref[w].astype(jnp.float32)
    o_ref[...] = (acc * (1.0 / W)).astype(o_ref.dtype)


def finish_gradient_synchronization(stacked_grads, *, tile_rows=1024):
    """stacked_grads: [world_size, N] flattened per-replica grads.  Returns [N].

    Zero-copy fast path requires N % 128 == 0 (allocate flattened grad buckets
    lane-aligned upstream); otherwise a one-off padded HBM copy is made.
    tile_rows: (8,128)-dense rows per grid step (1024 rows == 131072 elements;
    keep W*tile_rows*128*dtype*2 under the scoped VMEM limit).
    # TODO(synk): real multi-chip all-reduce = reduce-scatter + all-gather ring
    # with pltpu.make_async_remote_copy over ICI; not emulated on one device.
    """
    assert tile_rows % 8 == 0
    W, N = stacked_grads.shape
    g = stacked_grads
    N_pad = _round_up(N, 128)
    if N_pad != N:
        # Fallback only: this copies the whole buffer through HBM once.
        g = jnp.pad(g, ((0, 0), (0, N_pad - N)))

    R = N_pad // 128
    g3 = g.reshape(W, R, 128)            # row-major relabel, no data movement
    TR = R if R <= tile_rows else tile_rows

    itemsize = jnp.dtype(g3.dtype).itemsize
    vmem_needed = 2 * W * TR * 128 * itemsize + 2 * TR * 128 * 4
    out = pl.pallas_call(
        _grad_sync_kernel,
        out_shape=jax.ShapeDtypeStruct((R, 128), jnp.float32),
        grid=(pl.cdiv(R, TR),),                                  # partial last block OK
        in_specs=[pl.BlockSpec((W, TR, 128), lambda i: (0, i, 0))],
        out_specs=pl.BlockSpec((TR, 128), lambda i: (i, 0)),     # unmasked dense stores
        compiler_params=pltpu.CompilerParams(
            dimension_semantics=("parallel",),
            vmem_limit_bytes=max(32 * 1024 * 1024, vmem_needed * 3 // 2)),
        cost_estimate=pl.CostEstimate(
            flops=W * R * 128, transcendentals=0,
            bytes_accessed=W * N_pad * itemsize + N_pad * 4),
    )(g3)
    flat = out.reshape(-1)
    return flat if N_pad == N else flat[:N]


# ---------------------------------------------------------------------------
# DDP wrapper (parameter setup / glue in plain JAX)
# ---------------------------------------------------------------------------
class DDPPallas:
    def __init__(self, params, world_size=1, compute_dtype=jnp.bfloat16):
        # "broadcast from src=0": single-process here, so a no-op copy.
        # TODO(synk): multi-chip broadcast would be an ICI RDMA from device 0.
        w1, b1, w2, b2 = params
        D_in, H = w1.shape
        D_out = w2.shape[1]
        self.logical_dims = (D_in, H, D_out)
        self.mxu_align = _mxu_align()
        Dp = _round_up(D_in, self.mxu_align)
        Hp = _round_up(H, self.mxu_align)
        Op = _round_up(D_out, self.mxu_align)

        # Zero-pad once at init (exact: padded hidden cols get bias 0 -> ReLU 0,
        # and the matching padded rows of w2 are 0, so outputs are unchanged).
        # bf16 weights halve DMA bytes and unlock full MXU rate; accumulation
        # stays f32 via preferred_element_type in the kernel.
        cd = compute_dtype
        self.w1 = jnp.zeros((Dp, Hp), cd).at[:D_in, :H].set(w1.astype(cd))
        self.b1 = jnp.zeros((1, Hp), cd).at[:, :H].set(b1.reshape(1, H).astype(cd))
        self.w2 = jnp.zeros((Hp, Op), cd).at[:H, :D_out].set(w2.astype(cd))
        self.b2 = jnp.zeros((1, Op), cd).at[:, :D_out].set(b2.reshape(1, D_out).astype(cd))
        self.compute_dtype = cd
        self.world_size = world_size

    def _pick_tile_b(self, B: int) -> int:
        # Prefer MXU-sized batch tiles; keep >=2 grid steps when possible so the
        # "parallel" axis splits across v7x's 2 TensorCores.
        for tb in (self.mxu_align, 128):
            if B >= 2 * tb and B % tb == 0:
                return tb
        if B >= 128:
            return 128
        return _round_up(B, 8)

    def forward(self, x):
        B, D_in = x.shape
        assert D_in == self.logical_dims[0]
        D_out = self.logical_dims[2]
        Dp, Op = self.w1.shape[0], self.w2.shape[1]
        TB = self._pick_tile_b(B)

        xc = x.astype(self.compute_dtype)
        if B % TB == 0 and D_in == Dp:
            xp, Bp = xc, B                      # zero-copy: no per-call activation pad
        else:
            Bp = _round_up(B, TB)
            xp = jnp.zeros((Bp, Dp), self.compute_dtype).at[:B, :D_in].set(xc)

        y = mlp_forward(xp, self.w1, self.b1, self.w2, self.b2, tile_b=TB)
        if Bp == B and Op == D_out:
            return y
        return y[:B, :D_out]

    def sync_grads(self, stacked_grads, tile_rows=1024):
        if self.world_size == 1:
            return stacked_grads[0]
        return finish_gradient_synchronization(stacked_grads, tile_rows=tile_rows)


if __name__ == "__main__":
    key = jax.random.PRNGKey(0)
    k_x, k_w1, k_b1, k_w2, k_b2, k_g = jax.random.split(key, 6)

    # Logical module sizes.  D_in/D_out already 256-aligned -> no per-call
    # activation pad or output slice on any TPU generation; H=192 exercises the
    # (exact) zero-padding of the hidden dim.  B=512 gives >=2 batch tiles.
    B, D_in, H, D_out = 512, 256, 192, 256

    w1 = jax.random.normal(k_w1, (D_in, H), jnp.float32) * 0.02   # Linear1 weight^T
    b1 = jax.random.normal(k_b1, (1, H), jnp.float32) * 0.02      # Linear1 bias
    w2 = jax.random.normal(k_w2, (H, D_out), jnp.float32) * 0.02  # Linear2 weight^T
    b2 = jax.random.normal(k_b2, (1, D_out), jnp.float32) * 0.02  # Linear2 bias
    x = jax.random.normal(k_x, (B, D_in), jnp.float32)

    world_size = 4
    ddp = DDPPallas((w1, b1, w2, b2), world_size=world_size)

    # Forward pass (DDP.forward == wrapped module forward).
    y = jax.block_until_ready(ddp.forward(x))
    assert y.shape == (B, D_out)

    # Precision-matched reference: same bf16 operands, f32 accumulation.
    cd = ddp.compute_dtype
    h_ref = jnp.maximum(
        jnp.dot(x.astype(cd), w1.astype(cd), preferred_element_type=jnp.float32)
        + b1.astype(cd).astype(jnp.float32), 0.0)
    y_ref = (jnp.dot(h_ref.astype(cd), w2.astype(cd),
                     preferred_element_type=jnp.float32)
             + b2.astype(cd).astype(jnp.float32))
    assert jnp.allclose(y, y_ref, atol=2e-3, rtol=2e-3), "forward mismatch"

    # Gradient synchronization (all_reduce SUM + / world_size == mean).
    n_params = D_in * H + H + H * D_out + D_out           # 98752 flattened grads
    n_aligned = _round_up(n_params, 128)                  # lane-aligned grad bucket

    # Fast path: lane-aligned bucket, multi-tile grid with a partial last block.
    stacked_aligned = jax.random.normal(k_g, (world_size, n_aligned), jnp.float32)
    g_sync = jax.block_until_ready(ddp.sync_grads(stacked_aligned, tile_rows=256))
    g_ref = jnp.mean(stacked_aligned, axis=0)
    assert jnp.allclose(g_sync, g_ref, atol=1e-5, rtol=1e-5), "grad sync mismatch"

    # Fallback path: unaligned N (pads once, then same dense kernel).
    stacked_unaligned = stacked_aligned[:, :n_params]
    g_sync2 = jax.block_until_ready(ddp.sync_grads(stacked_unaligned))
    g_ref2 = jnp.mean(stacked_unaligned, axis=0)
    assert jnp.allclose(g_sync2, g_ref2, atol=1e-5, rtol=1e-5), "grad sync (tail) mismatch"

    print("KERNEL_OK")
</pallas_src>

<mosaic_0001>
module attributes {stable_mosaic.version = 11 : i64} {
  func.func @_mlp_fwd_kernel(%arg0: i32, %arg1: memref<256x256xbf16, #tpu.memory_space<vmem>>, %arg2: memref<256x256xbf16, #tpu.memory_space<vmem>>, %arg3: memref<1x256xbf16, #tpu.memory_space<vmem>>, %arg4: memref<256x256xbf16, #tpu.memory_space<vmem>>, %arg5: memref<1x256xbf16, #tpu.memory_space<vmem>>, %arg6: memref<256x256xf32, #tpu.memory_space<vmem>>) attributes {dimension_semantics = [#tpu.dimension_semantics<parallel>], iteration_bounds = array<i64: 2>, scalar_prefetch = 0 : i64, scratch_operands = 0 : i64, tpu.core_type = #tpu.core_type<tc>, window_params = [{transform_indices = @transform_0, window_bounds = array<i64: 256, 256>}, {pipeline_mode = #tpu.pipeline_mode<synchronous>, transform_indices = @transform_1, window_bounds = array<i64: 256, 256>}, {pipeline_mode = #tpu.pipeline_mode<synchronous>, transform_indices = @transform_2, window_bounds = array<i64: 1, 256>}, {pipeline_mode = #tpu.pipeline_mode<synchronous>, transform_indices = @transform_3, window_bounds = array<i64: 256, 256>}, {pipeline_mode = #tpu.pipeline_mode<synchronous>, transform_indices = @transform_4, window_bounds = array<i64: 1, 256>}, {transform_indices = @transform_5, window_bounds = array<i64: 256, 256>}]} {
    %c0 = arith.constant 0 : index
    %c0_0 = arith.constant 0 : index
    %0 = vector.load %arg1[%c0, %c0_0] : memref<256x256xbf16, #tpu.memory_space<vmem>>, vector<256x256xbf16>
    %c0_1 = arith.constant 0 : index
    %c0_2 = arith.constant 0 : index
    %1 = vector.load %arg2[%c0_1, %c0_2] : memref<256x256xbf16, #tpu.memory_space<vmem>>, vector<256x256xbf16>
    %cst = arith.constant dense<0.000000e+00> : vector<256x256xf32>
    %2 = tpu.matmul %0, %1, %cst {dimension_numbers = #tpu.dot_dimension_numbers<[1], [0], [0], [1], [0, 0, 1, 1], [], []>} : vector<256x256xbf16>, vector<256x256xbf16>, vector<256x256xf32> -> vector<256x256xf32>
    %c0_3 = arith.constant 0 : index
    %c0_4 = arith.constant 0 : index
    %3 = vector.load %arg3[%c0_3, %c0_4] : memref<1x256xbf16, #tpu.memory_space<vmem>>, vector<1x256xbf16>
    %4 = arith.extf %3 : vector<1x256xbf16> to vector<1x256xf32>
    %5 = vector.broadcast %4 : vector<1x256xf32> to vector<256x256xf32>
    %6 = arith.addf %2, %5 : vector<256x256xf32>
    %cst_5 = arith.constant 0.000000e+00 : f32
    %7 = vector.broadcast %cst_5 : f32 to vector<256x256xf32>
    %8 = arith.maximumf %6, %7 : vector<256x256xf32>
    %9 = arith.truncf %8 : vector<256x256xf32> to vector<256x256xbf16>
    %c0_6 = arith.constant 0 : index
    %c0_7 = arith.constant 0 : index
    %10 = vector.load %arg4[%c0_6, %c0_7] : memref<256x256xbf16, #tpu.memory_space<vmem>>, vector<256x256xbf16>
    %cst_8 = arith.constant dense<0.000000e+00> : vector<256x256xf32>
    %11 = tpu.matmul %9, %10, %cst_8 {dimension_numbers = #tpu.dot_dimension_numbers<[1], [0], [0], [1], [0, 0, 1, 1], [], []>} : vector<256x256xbf16>, vector<256x256xbf16>, vector<256x256xf32> -> vector<256x256xf32>
    %c0_9 = arith.constant 0 : index
    %c0_10 = arith.constant 0 : index
    %12 = vector.load %arg5[%c0_9, %c0_10] : memref<1x256xbf16, #tpu.memory_space<vmem>>, vector<1x256xbf16>
    %13 = arith.extf %12 : vector<1x256xbf16> to vector<1x256xf32>
    %14 = vector.broadcast %13 : vector<1x256xf32> to vector<256x256xf32>
    %15 = arith.addf %11, %14 : vector<256x256xf32>
    %c0_11 = arith.constant 0 : index
    %c0_12 = arith.constant 0 : index
    %16 = vector.load %arg6[%c0_11, %c0_12] : memref<256x256xf32, #tpu.memory_space<vmem>>, vector<256x256xf32>
    tpu.vector_store %arg6[%c0_11, %c0_12], %15 {strides = array<i32>} : memref<256x256xf32, #tpu.memory_space<vmem>>, vector<256x256xf32>,
    return
  }
  func.func @transform_0(%arg0: i32) -> (i32, i32) {
    %c0_i32 = arith.constant 0 : i32
    %c0_i32_0 = arith.constant 0 : i32
    return %arg0, %c0_i32 : i32, i32
  }
  func.func @transform_1(%arg0: i32) -> (i32, i32) {
    %c0_i32 = arith.constant 0 : i32
    %c0_i32_0 = arith.constant 0 : i32
    %c0_i32_1 = arith.constant 0 : i32
    return %c0_i32, %c0_i32_0 : i32, i32
  }
  func.func @transform_2(%arg0: i32) -> (i32, i32) {
    %c0_i32 = arith.constant 0 : i32
    %c0_i32_0 = arith.constant 0 : i32
    %c0_i32_1 = arith.constant 0 : i32
    return %c0_i32, %c0_i32_0 : i32, i32
  }
  func.func @transform_3(%arg0: i32) -> (i32, i32) {
    %c0_i32 = arith.constant 0 : i32
    %c0_i32_0 = arith.constant 0 : i32
    %c0_i32_1 = arith.constant 0 : i32
    return %c0_i32, %c0_i32_0 : i32, i32
  }
  func.func @transform_4(%arg0: i32) -> (i32, i32) {
    %c0_i32 = arith.constant 0 : i32
    %c0_i32_0 = arith.constant 0 : i32
    %c0_i32_1 = arith.constant 0 : i32
    return %c0_i32, %c0_i32_0 : i32, i32
  }
  func.func @transform_5(%arg0: i32) -> (i32, i32) {
    %c0_i32 = arith.constant 0 : i32
    %c0_i32_0 = arith.constant 0 : i32
    return %arg0, %c0_i32 : i32, i32
  }
}

module attributes {stable_mosaic.version = 11 : i64} {
  func.func @_mlp_fwd_kernel(%arg0: i32, %arg1: memref<256x256xbf16, #tpu.memory_space<vmem>>, %arg2: memref<256x256xbf16, #tpu.memory_space<vmem>>, %arg3: memref<1x256xbf16, #tpu.memory_space<vmem>>, %arg4: memref<256x256xbf16, #tpu.memory_space<vmem>>, %arg5: memref<1x256xbf16, #tpu.memory_space<vmem>>, %arg6: memref<256x256xf32, #tpu.memory_space<vmem>>) attributes {dimension_semantics = [#tpu.dimension_semantics<parallel>], iteration_bounds = array<i64: 2>, scalar_prefetch = 0 : i64, scratch_operands = 0 : i64, tpu.core_type = #tpu.core_type<tc>, window_params = [{transform_indices = @transform_0, window_bounds = array<i64: 256, 256>}, {pipeline_mode = #tpu.pipeline_mode<synchronous>, transform_indices = @transform_1, window_bounds = array<i64: 256, 256>}, {pipeline_mode = #tpu.pipeline_mode<synchronous>, transform_indices = @transform_2, window_bounds = array<i64: 1, 256>}, {pipeline_mode = #tpu.pipeline_mode<synchronous>, transform_indices = @transform_3, window_bounds = array<i64: 256, 256>}, {pipeline_mode = #tpu.pipeline_mode<synchronous>, transform_indices = @transform_4, window_bounds = array<i64: 1, 256>}, {transform_indices = @transform_5, window_bounds = array<i64: 256, 256>}]} {
    %c0 = arith.constant 0 : index
    %c0_0 = arith.constant 0 : index
    %0 = vector.load %arg1[%c0, %c0_0] : memref<256x256xbf16, #tpu.memory_space<vmem>>, vector<256x256xbf16>
    %c0_1 = arith.constant 0 : index
    %c0_2 = arith.constant 0 : index
    %1 = vector.load %arg2[%c0_1, %c0_2] : memref<256x256xbf16, #tpu.memory_space<vmem>>, vector<256x256xbf16>
    %cst = arith.constant dense<0.000000e+00> : vector<256x256xf32>
    %2 = tpu.matmul %0, %1, %cst {dimension_numbers = #tpu.dot_dimension_numbers<[1], [0], [0], [1], [0, 0, 1, 1], [], []>} : vector<256x256xbf16>, vector<256x256xbf16>, vector<256x256xf32> -> vector<256x256xf32>
    %c0_3 = arith.constant 0 : index
    %c0_4 = arith.constant 0 : index
    %3 = vector.load %arg3[%c0_3, %c0_4] : memref<1x256xbf16, #tpu.memory_space<vmem>>, vector<1x256xbf16>
    %4 = arith.extf %3 : vector<1x256xbf16> to vector<1x256xf32>
    %5 = vector.broadcast %4 : vector<1x256xf32> to vector<256x256xf32>
    %6 = arith.addf %2, %5 : vector<256x256xf32>
    %cst_5 = arith.constant 0.000000e+00 : f32
    %7 = vector.broadcast %cst_5 : f32 to vector<256x256xf32>
    %8 = arith.maximumf %6, %7 : vector<256x256xf32>
    %9 = arith.truncf %8 : vector<256x256xf32> to vector<256x256xbf16>
    %c0_6 = arith.constant 0 : index
    %c0_7 = arith.constant 0 : index
    %10 = vector.load %arg4[%c0_6, %c0_7] : memref<256x256xbf16, #tpu.memory_space<vmem>>, vector<256x256xbf16>
    %cst_8 = arith.constant dense<0.000000e+00> : vector<256x256xf32>
    %11 = tpu.matmul %9, %10, %cst_8 {dimension_numbers = #tpu.dot_dimension_numbers<[1], [0], [0], [1], [0, 0, 1, 1], [], []>} : vector<256x256xbf16>, vector<256x256xbf16>, vector<256x256xf32> -> vector<256x256xf32>
    %c0_9 = arith.constant 0 : index
    %c0_10 = arith.constant 0 : index
    %12 = vector.load %arg5[%c0_9, %c0_10] : memref<1x256xbf16, #tpu.memory_space<vmem>>, vector<1x256xbf16>
    %13 = arith.extf %12 : vector<1x256xbf16> to vector<1x256xf32>
    %14 = vector.broadcast %13 : vector<1x256xf32> to vector<256x256xf32>
    %15 = arith.addf %11, %14 : vector<256x256xf32>
    %c0_11 = arith.constant 0 : index
    %c0_12 = arith.constant 0 : index
    %16 = vector.load %arg6[%c0_11, %c0_12] : memref<256x256xf32, #tpu.memory_space<vmem>>, vector<256x256xf32>
    tpu.vector_store %arg6[%c0_11, %c0_12], %15 {strides = array<i32>} : memref<256x256xf32, #tpu.memory_space<vmem>>, vector<256x256xf32>,
    return
  }
  func.func @transform_0(%arg0: i32) -> (i32, i32) {
    %c0_i32 = arith.constant 0 : i32
    %c0_i32_0 = arith.constant 0 : i32
    return %arg0, %c0_i32 : i32, i32
  }
  func.func @transform_1(%arg0: i32) -> (i32, i32) {
    %c0_i32 = arith.constant 0 : i32
    %c0_i32_0 = arith.constant 0 : i32
    %c0_i32_1 = arith.constant 0 : i32
    return %c0_i32, %c0_i32_0 : i32, i32
  }
  func.func @transform_2(%arg0: i32) -> (i32, i32) {
    %c0_i32 = arith.constant 0 : i32
    %c0_i32_0 = arith.constant 0 : i32
    %c0_i32_1 = arith.constant 0 : i32
    return %c0_i32, %c0_i32_0 : i32, i32
  }
  func.func @transform_3(%arg0: i32) -> (i32, i32) {
    %c0_i32 = arith.constant 0 : i32
    %c0_i32_0 = arith.constant 0 : i32
    %c0_i32_1 = arith.constant 0 : i32
    return %c0_i32, %c0_i32_0 : i32, i32
  }
  func.func @transform_4(%arg0: i32) -> (i32, i32) {
    %c0_i32 = arith.constant 0 : i32
    %c0_i32_0 = arith.constant 0 : i32
    %c0_i32_1 = arith.constant 0 : i32
    return %c0_i32, %c0_i32_0 : i32, i32
  }
  func.func @transform_5(%arg0: i32) -> (i32, i32) {
    %c0_i32 = arith.constant 0 : i32
    %c0_i32_0 = arith.constant 0 : i32
    return %arg0, %c0_i32 : i32, i32
  }
}

</mosaic_0001>

<bundles_post_ra>
// kernel: tpu_custom_call.1
= control target key start
LH: loop header
LB: loop body
LE: loop exit
PB: predicated region body
PF: predicated region fallthrough
CT: control target
= control target key end

     0   :  { %10 = vsyncpa [#allocation3], 0  ;;  %s3269_s0 = inlined_call_operand.hbm [shape: bf16[512,256], index: 0, kind: input, shape index: {}]   ;;  %s3270_s1 = inlined_call_operand.hbm [shape: bf16[256,256], index: 1, kind: input, shape index: {}]   ;;  %s3271_s2 = inlined_call_operand.hbm [shape: bf16[1,256], index: 2, kind: input, shape index: {}]   ;;  %s3272_s3 = inlined_call_operand.hbm [shape: bf16[256,256], index: 3, kind: input, shape index: {}]   ;;  %s3273_s4 = inlined_call_operand.vmem [shape: bf16[1,256], index: 4, kind: input, shape index: {}]   ;;  %s3274_s5 = inlined_call_operand.hbm [shape: f32[512,256], index: 5, kind: output, shape index: {}]  }
   0x1   :  { %12 = vsyncpa [#allocation3 + $0x1], 0 }
   0x2   :  { %13 = vsyncpa [#allocation6], 0 }
   0x3   :  { %14 = vsyncpa [#allocation9], 0 }
   0x4   :  { %15 = vsyncpa [#allocation4], 0 }
   0x5   :  { %17 = vsyncpa [#allocation4 + $0x1], 0  ;;  %s2701_s18 = smov 0   ;;  %s2703_s19 = smov 0  }
   0x6   :  { %s2705_s20 = smov 0   ;;  %s2707_s21 = smov 0  }
   0x7 LB: > { %s2722_s22 = sadd.s32 4294967295, %s2662_s21   ;;  %s1881_s23 = sadd.s32 4294967294, %s2662_s21   ;;  %s2662_s21 = sphi %s2707_s21, %s3287_s21   ;;  %s2658_s20 = sphi %s2705_s20, %s3286_s20   ;;  %s2654_s19 = sphi %s2703_s19, %s3285_s19   ;;  %s2650_s18 = sphi %s2701_s18, %s3284_s18  }
   0x8   : > { %p43_p0 = scmp.ne.s32.totalorder %s2654_s19, %s2650_s18  ;;  %p44_p1 = scmp.eq.s32.totalorder %s2722_s22, 0 }
   0x9   : > { %p151_p2 = scmp.eq.s32.totalorder %s2722_s22, 1  ;;  %p157_p3 = scmp.eq.s32.totalorder %s1881_s23, 1 }
   0xa   : > { %p2731_p4 = por %p44_p1, %p43_p0  ;;  %p1882_p5 = scmp.ge.s32.totalorder %s2662_s21, 1 }
   0xb   : > { %p2736_p6 = por %p157_p3, %p43_p0  ;;  %p164_p7 = scmp.lt.s32.totalorder %s2662_s21, 3 }
   0xc   : > { %s175_s28 = sshll.u32 %s3270_s1, 4  ;;  %s2664_s30 = smov [#allocation5]   ;;  %s176_s28 = int_to_ptr.hbm [resolvable:$true] %s175_s28 }
   0xd   : > { %p2744_p8 = pnand %p1882_p5, %p164_p7  ;;  %s177_s6 = sshll.u32 %s2664_s30, 4  ;;  %s178_s6 = int_to_ptr.vmem [resolvable:$true] %s177_s6 }
   0xe   : > { %s190_s10 = sshll.u32 %s3271_s2, 4  ;;  %s3275_s11 = smov 128   ;;  %s191_s10 = int_to_ptr.hbm [resolvable:$true] %s190_s10 }
   0xf   : > { %p2403_p9 = pneg %p2744_p8  ;;  %s2666_s12 = smov 8  }
  0x10   : > { %s2667_s13 = smov [#allocation7]   ;;  %s201_s17 = sshll.u32 %s3272_s3, 4  ;;  %s202_s17 = int_to_ptr.hbm [resolvable:$true] %s201_s17 }
  0x11   : > { %p2752_p10 = pnand %p2403_p9, %p44_p1  ;;  %s192_s14 = sshll.u32 %s2667_s13, 4  ;;  %s193_s14 = int_to_ptr.vmem [resolvable:$true] %s192_s14 }
  0x12   : > { %s2668_s23 = smov [#allocation8]   ;;  %s2771_s27 = sadd.s32 1, %s2662_s21  }
  0x13   : > { %2406 = dma.hbm_to_vmem [thread:$0]  (!%p2752_p10), %s176_s28, 4096, %s178_s6, [#allocation6], %s3275_s11, %s3275_s11, %s2666_s12  }
  0x14   : > { %2409 = dma.hbm_to_vmem [thread:$0]  (!%p2752_p10), %s191_s10, 32, %s193_s14, [#allocation6]  }
  0x15   : > { %s203_s26 = sshll.u32 %s2668_s23, 4  ;;  %s27_s28 = ssub.s32 %s2662_s21, %s2771_s27  ;;  %s204_s26 = int_to_ptr.vmem [resolvable:$true] %s203_s26 }
  0x16   : > { %2412 = dma.hbm_to_vmem [thread:$0]  (!%p2752_p10), %s202_s17, 4096, %s204_s26, [#allocation9], %s3275_s11, %s3275_s11, %s2666_s12  }
  0x17   : > { %s30_s30 = sadd.s32 1, %s2658_s20  ;;  %p28_p12 = scmp.eq.s32.totalorder %s27_s28, 0 }
  0x18   : > { %p37_p13 = scmp.ne.s32.totalorder %s2658_s20, %s2654_s19  ;;  %p38_p0 = scmp.eq.s32.totalorder %s2662_s21, 0 }
  0x19   : > { %s2785_s6 = scalar_select %p28_p12, %s2658_s20, %s30_s30  }
  0x1a   : > { %p2789_p3 = por %p151_p2, %p37_p13  ;;  %p2424_p5 = scmp.lt.s32.totalorder %s2662_s21, 2 }
  0x1b   : > { %s220_s9 = sand.u32 1, %s2658_s20   ;;  %s2288_s7 = sshll.u32 %s2662_s21, 8 }
  0x1c   : > { %p39_p7 = por %p38_p0, %p37_p13  ;;  %s1887_s10 = sshll.u32 %s220_s9, 8 }
  0x1d   : > { %s230_s15 = scalar_lea.hbm %s3269_s0, %s2288_s7  ;;  %s224_s17 = scalar_lea.vmem [#allocation2], %s1887_s10 }
  0x1e   : > { %s231_s16 = sshll.u32 %s230_s15, 4  ;;  %s233_s23 = sshll.u32 %s224_s17, 4  ;;  %s232_s16 = int_to_ptr.hbm [resolvable:$true] %s231_s16  ;;  %s234_s23 = int_to_ptr.vmem [resolvable:$true] %s233_s23 }
  0x1f   : > { %p2799_p9 = pnand %p2424_p5, %p39_p7  ;;  %s221_s28 = scalar_lea.sflag [#allocation3], %s220_s9 }
  0x20   : > { %s2558_s30 = sshra.s32 %s232_s16, 4  ;;  %s2565_s10 = scalar_lea.hbm %s3269_s0, 512  ;;  %s2559_s30 = int_to_ptr.hbm [resolvable:$true] %s2558_s30 }
  0x21   : > { %s2560_s11 = scalar_lea.hbm %s2559_s30, 256  ;;  %p2562_p10 = pneg %p2799_p9 }
  0x22   : > { %p2561_p2 = scmp.ne.s32.totalorder %s2559_s30, %s2560_s11  ;;  %p2566_p0 = scmp.lt.s32.totalorder %s2559_s30, %s3269_s0 }
  0x23   : > { %p2567_p5 = scmp.lt.s32.totalorder %s2565_s10, %s2560_s11 }
  0x24   : > { %p2563_p12 = pnand %p2562_p10, %p2561_p2 }
  0x25   : > { %p2568_p7 = por %p2567_p5, %p2566_p0 }
  0x26   : > { %p2564_p13 = pneg %p2563_p12 }
  0x28   : > { %p2569_p11 = pnand %p2568_p7, %p2564_p13 }
  0x2a   : > { %2572 = shalt.err (!%p2569_p11)
}
  0x2b   : > { %s3282_s9 = smov 128   ;;  %245 = sbr.rel (%p2744_p8) target bundleno = 733 (0x2dd), region = 40 }
  0x2c   : > { %2416 = dma.hbm_to_vmem [thread:$0]  (!%p2799_p9), %s232_s16, 4096, %s234_s23, %s221_s28, %s3282_s9, %s3282_s9, %s2666_s12  }
  0x2d   : > { %s2819_s17 = sand.u32 (!%p2744_p8), 1, %s2654_s19  }
  0x2e   : > { %s1892_s30 = sshll.u32 (!%p2744_p8), %s2819_s17, 8  ;;  %s248_s11 = scalar_lea.sflag (!%p2744_p8), [#allocation3], %s2819_s17 }
  0x2f   : > { %s2823_s7 = scalar_lea.vmem (!%p2744_p8), [#allocation2], %s1892_s30 }
  0x30   : > { %2633 = dma.done.wait (%p2731_p4), %s248_s11, 4096  }
  0x31   : > { %2635 = vsyncadd (%p2731_p4), %s248_s11, 4294963200 }
  0x32   : > { %2637 = dma.done.wait (%p44_p1), [#allocation6], 4128  }
  0x33   : > { %2639 = vsyncadd (%p44_p1), [#allocation6], 4294963168 }
  0x34   : > { %2641 = dma.done.wait (%p44_p1), [#allocation9], 4096  }
  0x35   : > { %2643 = vsyncadd (%p44_p1), [#allocation9], 4294963200  ;;  %v2083_v0 = vld [vmem:[#allocation5 + $0x70] sm:$0xf]  ;;  %v2336_v1 = vld [vmem:[#allocation5 + $0x74] sm:$0xf0] }
  0x36   : > { %v2147_v2 = vld [vmem:[#allocation5 + $0xf0] sm:$0xf]  ;;  %v2084_v3 = vor.u32 %v2336_v1, %v2083_v0  ;;  %v2352_v4 = vld [vmem:[#allocation5 + $0xf4] sm:$0xf0]  ;;  %v2335_v5 = vld [vmem:[#allocation5 + $0x74] sm:$0xf] }
  0x37   : > { %v2085_v6 = vld [vmem:[#allocation5 + $0x78] sm:$0xf0]  ;;  %v2148_v7 = vor.u32 %v2352_v4, %v2147_v2  ;;  %v2351_v9 = vld [vmem:[#allocation5 + $0xf4] sm:$0xf]  ;;  %v2075_v11 = vld [vmem:[#allocation5 + $0x60] sm:$0xf] }
  0x38   : > { %v2088_v8 = vor.u32 %v2335_v5, %v2085_v6  ;;  %v2149_v10 = vld [vmem:[#allocation5 + $0xf8] sm:$0xf0]  ;;  %689 = vmatpush.bf16.msra.mxu0 %v2084_v3  ;;  %v2334_v13 = vld [vmem:[#allocation5 + $0x64] sm:$0xf0]  ;;  %v2139_v14 = vld [vmem:[#allocation5 + $0xe0] sm:$0xf] }
  0x39   : > { %v2152_v12 = vor.u32 %v2351_v9, %v2149_v10  ;;  %v2350_v15 = vld [vmem:[#allocation5 + $0xe4] sm:$0xf0]  ;;  %778 = vmatpush.bf16.msra.mxu1 %v2148_v7  ;;  %v2076_v16 = vor.u32 %v2334_v13, %v2075_v11  ;;  %v2333_v18 = vld [vmem:[#allocation5 + $0x64] sm:$0xf]  ;;  %v2077_v19 = vld [vmem:[#allocation5 + $0x68] sm:$0xf0] }
  0x3a   : > { %867 = vmatpush.bf16.msra.mxu2 %v2088_v8  ;;  %v2140_v17 = vor.u32 %v2350_v15, %v2139_v14  ;;  %v2349_v20 = vld [vmem:[#allocation5 + $0xe4] sm:$0xf]  ;;  %v2080_v21 = vor.u32 %v2333_v18, %v2077_v19  ;;  %v2141_v22 = vld [vmem:[#allocation5 + $0xe8] sm:$0xf0]  ;;  %v2067_v23 = vld [vmem:[#allocation5 + $0x50] sm:$0xf] }
  0x3b   : > { %956 = vmatpush.bf16.msra.mxu3 %v2152_v12  ;;  %v2332_v24 = vld [vmem:[#allocation5 + $0x54] sm:$0xf0]  ;;  %v2144_v25 = vor.u32 %v2349_v20, %v2141_v22  ;;  %v2131_v26 = vld [vmem:[#allocation5 + $0xd0] sm:$0xf]  ;;  %v2331_v28 = vld [vmem:[#allocation5 + $0x54] sm:$0xf] }
  0x3c   : > { %v2348_v27 = vld [vmem:[#allocation5 + $0xd4] sm:$0xf0]  ;;  %690 = vmatpush.bf16.msra.mxu0 %v2076_v16  ;;  %v2068_v29 = vor.u32 %v2332_v24, %v2067_v23  ;;  %v2069_v30 = vld [vmem:[#allocation5 + $0x58] sm:$0xf0]  ;;  %v2347_v31 = vld [vmem:[#allocation5 + $0xd4] sm:$0xf] }
  0x3d   : > { %v2133_v32 = vld [vmem:[#allocation5 + $0xd8] sm:$0xf0]  ;;  %779 = vmatpush.bf16.msra.mxu1 %v2140_v17  ;;  %v2132_v33 = vor.u32 %v2348_v27, %v2131_v26  ;;  %v2072_v34 = vor.u32 %v2331_v28, %v2069_v30  ;;  %v2059_v35 = vld [vmem:[#allocation5 + $0x40] sm:$0xf]  ;;  %v2330_v36 = vld [vmem:[#allocation5 + $0x44] sm:$0xf0] }
  0x3e   : > { %868 = vmatpush.bf16.msra.mxu2 %v2080_v21  ;;  %v2123_v37 = vld [vmem:[#allocation5 + $0xc0] sm:$0xf]  ;;  %v2136_v38 = vor.u32 %v2347_v31, %v2133_v32  ;;  %v2346_v39 = vld [vmem:[#allocation5 + $0xc4] sm:$0xf0]  ;;  %v2329_v40 = vld [vmem:[#allocation5 + $0x44] sm:$0xf]  ;;  %v2060_v44 = vor.u32 %v2330_v36, %v2059_v35 }
  0x3f   : > { %957 = vmatpush.bf16.msra.mxu3 %v2144_v25  ;;  %v2061_v41 = vld [vmem:[#allocation5 + $0x48] sm:$0xf0]  ;;  %v2345_v42 = vld [vmem:[#allocation5 + $0xc4] sm:$0xf]  ;;  %v2124_v45 = vor.u32 %v2346_v39, %v2123_v37  ;;  %v2051_v47 = vld [vmem:[#allocation5 + $0x30] sm:$0xf] }
  0x40   : > { %v2125_v43 = vld [vmem:[#allocation5 + $0xc8] sm:$0xf0]  ;;  %691 = vmatpush.bf16.msra.mxu0 %v2068_v29  ;;  %v2064_v46 = vor.u32 %v2329_v40, %v2061_v41  ;;  %v2328_v48 = vld [vmem:[#allocation5 + $0x34] sm:$0xf0]  ;;  %v2115_v49 = vld [vmem:[#allocation5 + $0xb0] sm:$0xf] }
  0x41   : > { %780 = vmatpush.bf16.msra.mxu1 %v2132_v33  ;;  %v2128_v50 = vor.u32 %v2345_v42, %v2125_v43  ;;  %v2344_v51 = vld [vmem:[#allocation5 + $0xb4] sm:$0xf0]  ;;  %v2327_v52 = vld [vmem:[#allocation5 + $0x34] sm:$0xf]  ;;  %v2053_v53 = vld [vmem:[#allocation5 + $0x38] sm:$0xf0]  ;;  %v2052_v56 = vor.u32 %v2328_v48, %v2051_v47 }
  0x42   : > { %869 = vmatpush.bf16.msra.mxu2 %v2072_v34  ;;  %v2343_v54 = vld [vmem:[#allocation5 + $0xb4] sm:$0xf]  ;;  %v2117_v55 = vld [vmem:[#allocation5 + $0xb8] sm:$0xf0]  ;;  %v2116_v57 = vor.u32 %v2344_v51, %v2115_v49  ;;  %v2056_v58 = vor.u32 %v2327_v52, %v2053_v53  ;;  %v2043_v59 = vld [vmem:[#allocation5 + $0x20] sm:$0xf] }
  0x43   : > { %958 = vmatpush.bf16.msra.mxu3 %v2136_v38  ;;  %v2326_v60 = vld [vmem:[#allocation5 + $0x24] sm:$0xf0]  ;;  %v2107_v61 = vld [vmem:[#allocation5 + $0xa0] sm:$0xf]  ;;  %v2120_v62 = vor.u32 %v2343_v54, %v2117_v55  ;;  %v2325_v0 = vld [vmem:[#allocation5 + $0x24] sm:$0xf] }
  0x44   : > { %692 = vmatpush.bf16.msra.mxu0 %v2060_v44  ;;  %v2342_v63 = vld [vmem:[#allocation5 + $0xa4] sm:$0xf0]  ;;  %v2045_v1 = vld [vmem:[#allocation5 + $0x28] sm:$0xf0]  ;;  %v2341_v2 = vld [vmem:[#allocation5 + $0xa4] sm:$0xf]  ;;  %v2044_v4 = vor.u32 %v2326_v60, %v2043_v59 }
  0x45   : > { %781 = vmatpush.bf16.msra.mxu1 %v2124_v45  ;;  %v2109_v3 = vld [vmem:[#allocation5 + $0xa8] sm:$0xf0]  ;;  %v2108_v5 = vor.u32 %v2342_v63, %v2107_v61  ;;  %v2048_v6 = vor.u32 %v2325_v0, %v2045_v1  ;;  %v2035_v7 = vld [vmem:[#allocation5 + $0x10] sm:$0xf]  ;;  %v2324_v8 = vld [vmem:[#allocation5 + $0x14] sm:$0xf0] }
  0x46   : > { %870 = vmatpush.bf16.msra.mxu2 %v2064_v46  ;;  %v2099_v9 = vld [vmem:[#allocation5 + $0x90] sm:$0xf]  ;;  %v2112_v10 = vor.u32 %v2341_v2, %v2109_v3  ;;  %v2340_v11 = vld [vmem:[#allocation5 + $0x94] sm:$0xf0]  ;;  %v2323_v12 = vld [vmem:[#allocation5 + $0x14] sm:$0xf]  ;;  %v2036_v16 = vor.u32 %v2324_v8, %v2035_v7 }
  0x47   : > { %959 = vmatpush.bf16.msra.mxu3 %v2128_v50  ;;  %v2037_v13 = vld [vmem:[#allocation5 + $0x18] sm:$0xf0]  ;;  %v2339_v14 = vld [vmem:[#allocation5 + $0x94] sm:$0xf]  ;;  %v2027_v17 = vld [vmem:[#allocation5] sm:$0xf]  ;;  %v2100_v19 = vor.u32 %v2340_v11, %v2099_v9 }
  0x48   : > { %693 = vmatpush.bf16.msra.mxu0 %v2052_v56  ;;  %v2101_v15 = vld [vmem:[#allocation5 + $0x98] sm:$0xf0]  ;;  %v2322_v18 = vld [vmem:[#allocation5 + $0x4] sm:$0xf0]  ;;  %v2040_v20 = vor.u32 %v2323_v12, %v2037_v13  ;;  %v2091_v21 = vld [vmem:[#allocation5 + $0x80] sm:$0xf] }
  0x49   : > { %782 = vmatpush.bf16.msra.mxu1 %v2116_v57  ;;  %v2338_v22 = vld [vmem:[#allocation5 + $0x84] sm:$0xf0]  ;;  %v2321_v23 = vld [vmem:[#allocation5 + $0x4] sm:$0xf]  ;;  %v2104_v24 = vor.u32 %v2339_v14, %v2101_v15  ;;  %v2029_v25 = vld [vmem:[#allocation5 + $0x8] sm:$0xf0]  ;;  %v2028_v31 = vor.u32 %v2322_v18, %v2027_v17 }
  0x4a   : > { %871 = vmatpush.bf16.msra.mxu2 %v2056_v58  ;;  %v2337_v26 = vld [vmem:[#allocation5 + $0x84] sm:$0xf]  ;;  %v2093_v27 = vld [vmem:[#allocation5 + $0x88] sm:$0xf0]  ;;  %v1899_v28 = vld [vmem:[%s2823_s7] sm:$0xf]  ;;  %v2092_v35 = vor.u32 %v2338_v22, %v2091_v21  ;;  %v2032_v36 = vor.u32 %v2321_v23, %v2029_v25 }
  0x4b   : > { %960 = vmatpush.bf16.msra.mxu3 %v2120_v62  ;;  %v2367_v29 = vld [vmem:[#allocation8 + $0x74] sm:$0xf]  ;;  %v2213_v30 = vld [vmem:[#allocation8 + $0x78] sm:$0xf0]  ;;  %v2290_v32 = vld [vmem:[%s2823_s7 + $0x4] sm:$0xf0]  ;;  %v2096_v39 = vor.u32 %v2337_v26, %v2093_v27 }
  0x4c   : > { %694 = vmatpush.bf16.msra.mxu0 %v2044_v4  ;;  %v2383_v33 = vld [vmem:[#allocation8 + $0xf4] sm:$0xf]  ;;  %v2277_v34 = vld [vmem:[#allocation8 + $0xf8] sm:$0xf0]  ;;  %v2289_v37 = vld [vmem:[%s2823_s7 + $0x4] sm:$0xf]  ;;  %v2216_v40 = vor.u32 %v2367_v29, %v2213_v30  ;;  %v1900_v43 = vor.u32 %v2290_v32, %v1899_v28 }
  0x4d   : > { %783 = vmatpush.bf16.msra.mxu1 %v2108_v5  ;;  %v1901_v38 = vld [vmem:[%s2823_s7 + $0x8] sm:$0xf0]  ;;  %v2211_v41 = vld [vmem:[#allocation8 + $0x70] sm:$0xf]  ;;  %v2368_v42 = vld [vmem:[#allocation8 + $0x74] sm:$0xf0]  ;;  %v2280_v44 = vor.u32 %v2383_v33, %v2277_v34 }
  0x4e   : > { %872 = vmatpush.bf16.msra.mxu2 %v2048_v6  ;;  %v2275_v45 = vld [vmem:[#allocation8 + $0xf0] sm:$0xf]  ;;  %v2384_v46 = vld [vmem:[#allocation8 + $0xf4] sm:$0xf0]  ;;  %v1904_v47 = vor.u32 %v2289_v37, %v1901_v38  ;;  %v2212_v48 = vor.u32 %v2368_v42, %v2211_v41  ;;  %v2365_v50 = vld [vmem:[#allocation8 + $0x64] sm:$0xf] }
  0x4f   : > { %961 = vmatpush.bf16.msra.mxu3 %v2112_v10  ;;  %v2276_v49 = vor.u32 %v2384_v46, %v2275_v45  ;;  %v2205_v51 = vld [vmem:[#allocation8 + $0x68] sm:$0xf0]  ;;  %v2381_v52 = vld [vmem:[#allocation8 + $0xe4] sm:$0xf]  ;;  %v2203_v55 = vld [vmem:[#allocation8 + $0x60] sm:$0xf] }
  0x50   : > { %695 = vmatpush.bf16.msra.mxu0 %v2036_v16  ;;  %v2208_v53 = vor.u32 %v2365_v50, %v2205_v51  ;;  %v2269_v54 = vld [vmem:[#allocation8 + $0xe8] sm:$0xf0]  ;;  %v2366_v56 = vld [vmem:[#allocation8 + $0x64] sm:$0xf0]  ;;  %v2267_v59 = vld [vmem:[#allocation8 + $0xe0] sm:$0xf] }
  0x51   : > { %784 = vmatpush.bf16.msra.mxu1 %v2100_v19  ;;  %v2272_v57 = vor.u32 %v2381_v52, %v2269_v54  ;;  %v2204_v58 = vor.u32 %v2366_v56, %v2203_v55  ;;  %v2382_v60 = vld [vmem:[#allocation8 + $0xe4] sm:$0xf0]  ;;  %v1907_v62 = vld [vmem:[%s2823_s7 + $0x10] sm:$0xf]  ;;  %v2292_v63 = vld [vmem:[%s2823_s7 + $0x14] sm:$0xf0] }
  0x52   : > { %873 = vmatpush.bf16.msra.mxu2 %v2040_v20  ;;  %v2268_v61 = vor.u32 %v2382_v60, %v2267_v59  ;;  %v2291_v0 = vld [vmem:[%s2823_s7 + $0x14] sm:$0xf]  ;;  %v1909_v1 = vld [vmem:[%s2823_s7 + $0x18] sm:$0xf0]  ;;  %v1908_v2 = vor.u32 %v2292_v63, %v1907_v62  ;;  %v1915_v4 = vld [vmem:[%s2823_s7 + $0x20] sm:$0xf] }
  0x53   : > { %962 = vmatpush.bf16.msra.mxu3 %v2104_v24  ;;  %v1912_v3 = vor.u32 %v2291_v0, %v1909_v1  ;;  %v2294_v5 = vld [vmem:[%s2823_s7 + $0x24] sm:$0xf0]  ;;  %v2293_v6 = vld [vmem:[%s2823_s7 + $0x24] sm:$0xf]  ;;  %v1917_v7 = vld [vmem:[%s2823_s7 + $0x28] sm:$0xf0] }
  0x54   : > { %696 = vmatpush.bf16.msra.mxu0 %v2028_v31  ;;  %v1916_v8 = vor.u32 %v2294_v5, %v1915_v4  ;;  %v1920_v9 = vor.u32 %v2293_v6, %v1917_v7  ;;  %v2363_v10 = vld [vmem:[#allocation8 + $0x54] sm:$0xf]  ;;  %v2197_v11 = vld [vmem:[#allocation8 + $0x58] sm:$0xf0]  ;;  %v2195_v15 = vld [vmem:[#allocation8 + $0x50] sm:$0xf] }
  0x55   : > { %785 = vmatpush.bf16.msra.mxu1 %v2092_v35  ;;  %v2379_v12 = vld [vmem:[#allocation8 + $0xd4] sm:$0xf]  ;;  %v2200_v13 = vor.u32 %v2363_v10, %v2197_v11  ;;  %v2261_v14 = vld [vmem:[#allocation8 + $0xd8] sm:$0xf0]  ;;  %v2364_v16 = vld [vmem:[#allocation8 + $0x54] sm:$0xf0] }
  0x56   : > { %874 = vmatpush.bf16.msra.mxu2 %v2032_v36  ;;  %v2264_v17 = vor.u32 %v2379_v12, %v2261_v14  ;;  %v2196_v18 = vor.u32 %v2364_v16, %v2195_v15  ;;  %v2259_v19 = vld [vmem:[#allocation8 + $0xd0] sm:$0xf]  ;;  %v2380_v20 = vld [vmem:[#allocation8 + $0xd4] sm:$0xf0]  ;;  %v1931_v28 = vld [vmem:[%s2823_s7 + $0x40] sm:$0xf] }
  0x57   : > { %963 = vmatpush.bf16.msra.mxu3 %v2096_v39  ;;  %697 = vmatmul.bf16.vlgmr.msra.gmra.mxu0 %v1900_v43  ;;  %v2260_v21 = vor.u32 %v2380_v20, %v2259_v19  ;;  %v1923_v22 = vld [vmem:[%s2823_s7 + $0x30] sm:$0xf]  ;;  %v2296_v23 = vld [vmem:[%s2823_s7 + $0x34] sm:$0xf0]  ;;  %v2295_v24 = vld [vmem:[%s2823_s7 + $0x34] sm:$0xf] }
  0x58   : > { %786 = vmatmul.bf16.vlgmr.msra.gmra.mxu1 %v1904_v47  ;;  %1342 = vmatpush.bf16.msrb.mxu0 %v2212_v48  ;;  %v1925_v25 = vld [vmem:[%s2823_s7 + $0x38] sm:$0xf0]  ;;  %v1924_v26 = vor.u32 %v2296_v23, %v1923_v22  ;;  %v2298_v29 = vld [vmem:[%s2823_s7 + $0x44] sm:$0xf0]  ;;  %v2297_v30 = vld [vmem:[%s2823_s7 + $0x44] sm:$0xf] }
  0x59   : > { %875 = vmatmul.bf16.vlgmr.msra.gmra.mxu2 %v1900_v43  ;;  %1431 = vmatpush.bf16.msrb.mxu1 %v2276_v49  ;;  %v1928_v27 = vor.u32 %v2295_v24, %v1925_v25  ;;  %v1933_v31 = vld [vmem:[%s2823_s7 + $0x48] sm:$0xf0]  ;;  %v1932_v32 = vor.u32 %v2298_v29, %v1931_v28  ;;  %v2361_v34 = vld [vmem:[#allocation8 + $0x44] sm:$0xf]  ;;  %v2187_v39 = vld [vmem:[#allocation8 + $0x40] sm:$0xf] }
  0x5a   : > { %1520 = vmatpush.bf16.msrb.mxu2 %v2216_v40  ;;  %964 = vmatmul.bf16.vlgmr.msra.gmra.mxu3 %v1904_v47  ;;  %v1936_v33 = vor.u32 %v2297_v30, %v1933_v31  ;;  %v2189_v35 = vld [vmem:[#allocation8 + $0x48] sm:$0xf0]  ;;  %v2377_v36 = vld [vmem:[#allocation8 + $0xc4] sm:$0xf]  ;;  %v2362_v40 = vld [vmem:[#allocation8 + $0x44] sm:$0xf0] }
  0x5b   : > { %1609 = vmatpush.bf16.msrb.mxu3 %v2280_v44  ;;  %v2192_v37 = vor.u32 %v2361_v34, %v2189_v35  ;;  %v2253_v38 = vld [vmem:[#allocation8 + $0xc8] sm:$0xf0]  ;;  %v2188_v42 = vor.u32 %v2362_v40, %v2187_v39  ;;  %v2251_v43 = vld [vmem:[#allocation8 + $0xc0] sm:$0xf]  ;;  %v2378_v44 = vld [vmem:[#allocation8 + $0xc4] sm:$0xf0] }
  0x5c   : > { %1343 = vmatpush.bf16.msrb.mxu0 %v2204_v58  ;;  %v2256_v41 = vor.u32 %v2377_v36, %v2253_v38  ;;  %v2252_v45 = vor.u32 %v2378_v44, %v2251_v43  ;;  %v1939_v46 = vld [vmem:[%s2823_s7 + $0x50] sm:$0xf]  ;;  %v2300_v47 = vld [vmem:[%s2823_s7 + $0x54] sm:$0xf0]  ;;  %v2299_v48 = vld [vmem:[%s2823_s7 + $0x54] sm:$0xf] }
  0x5d   : > { %1432 = vmatpush.bf16.msrb.mxu1 %v2268_v61  ;;  %v1941_v49 = vld [vmem:[%s2823_s7 + $0x58] sm:$0xf0]  ;;  %v1940_v50 = vor.u32 %v2300_v47, %v1939_v46  ;;  %v1947_v52 = vld [vmem:[%s2823_s7 + $0x60] sm:$0xf]  ;;  %v2301_v54 = vld [vmem:[%s2823_s7 + $0x64] sm:$0xf] }
  0x5e   : > { %1521 = vmatpush.bf16.msrb.mxu2 %v2208_v53  ;;  %v1944_v51 = vor.u32 %v2299_v48, %v1941_v49  ;;  %v2302_v53 = vld [vmem:[%s2823_s7 + $0x64] sm:$0xf0]  ;;  %v1949_v55 = vld [vmem:[%s2823_s7 + $0x68] sm:$0xf0]  ;;  %v2359_v58 = vld [vmem:[#allocation8 + $0x34] sm:$0xf] }
  0x5f   : > { %1610 = vmatpush.bf16.msrb.mxu3 %v2272_v57  ;;  %v1948_v56 = vor.u32 %v2302_v53, %v1947_v52  ;;  %v1952_v57 = vor.u32 %v2301_v54, %v1949_v55  ;;  %v2181_v59 = vld [vmem:[#allocation8 + $0x38] sm:$0xf0]  ;;  %v2375_v60 = vld [vmem:[#allocation8 + $0xb4] sm:$0xf]  ;;  %v1955_v0 = vld [vmem:[%s2823_s7 + $0x70] sm:$0xf] }
  0x60   : > { %1344 = vmatpush.bf16.msrb.mxu0 %v2196_v18  ;;  %v2184_v61 = vor.u32 %v2359_v58, %v2181_v59  ;;  %v2245_v62 = vld [vmem:[#allocation8 + $0xb8] sm:$0xf0]  ;;  %v2304_v1 = vld [vmem:[%s2823_s7 + $0x74] sm:$0xf0]  ;;  %v2179_v5 = vld [vmem:[#allocation8 + $0x30] sm:$0xf] }
  0x61   : > { %1433 = vmatpush.bf16.msrb.mxu1 %v2260_v21  ;;  %v2248_v63 = vor.u32 %v2375_v60, %v2245_v62  ;;  %v1956_v4 = vor.u32 %v2304_v1, %v1955_v0  ;;  %v2360_v6 = vld [vmem:[#allocation8 + $0x34] sm:$0xf0]  ;;  %v2243_v7 = vld [vmem:[#allocation8 + $0xb0] sm:$0xf]  ;;  %v360_v12 = vld [vmem:[#allocation7] sm:$0x3] }
  0x62   : > { %1522 = vmatpush.bf16.msrb.mxu2 %v2200_v13  ;;  %v2376_v10 = vld [vmem:[#allocation8 + $0xb4] sm:$0xf0]  ;;  %v361_v13 = vunpack.c.l.bf16 %v360_v12  ;;  %v1963_v15 = vld [vmem:[%s2823_s7 + $0x80] sm:$0xf]  ;;  %v2306_v16 = vld [vmem:[%s2823_s7 + $0x84] sm:$0xf0] }
  0x63   : > { %1611 = vmatpush.bf16.msrb.mxu3 %v2264_v17  ;;  %v2244_v11 = vor.u32 %v2376_v10, %v2243_v7  ;;  %v2305_v18 = vld [vmem:[%s2823_s7 + $0x84] sm:$0xf]  ;;  %v1965_v19 = vld [vmem:[%s2823_s7 + $0x88] sm:$0xf0]  ;;  %v1964_v20 = vor.u32 %v2306_v16, %v1963_v15  ;;  %v2308_v43 = vld [vmem:[%s2823_s7 + $0x94] sm:$0xf0] }
  0x64   : > { %1345 = vmatpush.bf16.msrb.mxu0 %v2188_v42  ;;  %v363_v14 = vperm.slane %v361_v13, 0  ;;  %v1968_v22 = vor.u32 %v2305_v18, %v1965_v19  ;;  %v364_v23 = vperm.slane %v361_v13, 2  ;;  %v2357_v28 = vld [vmem:[#allocation8 + $0x24] sm:$0xf]  ;;  %v2173_v29 = vld [vmem:[#allocation8 + $0x28] sm:$0xf0] }
  0x65   : > { %1434 = vmatpush.bf16.msrb.mxu1 %v2252_v45  ;;  %v2176_v30 = vor.u32 %v2357_v28, %v2173_v29  ;;  %v2373_v31 = vld [vmem:[#allocation8 + $0xa4] sm:$0xf]  ;;  %v1971_v42 = vld [vmem:[%s2823_s7 + $0x90] sm:$0xf]  ;;  %v2307_v44 = vld [vmem:[%s2823_s7 + $0x94] sm:$0xf] }
  0x66   : > { %1523 = vmatpush.bf16.msrb.mxu2 %v2192_v37  ;;  %v2871_v17 = vperm.slane %v363_v14, 0  ;;  %v1973_v45 = vld [vmem:[%s2823_s7 + $0x98] sm:$0xf0]  ;;  %v2171_v48 = vld [vmem:[#allocation8 + $0x20] sm:$0xf]  ;;  %v1972_v55 = vor.u32 %v2308_v43, %v1971_v42  ;;  %s1896_s12 = sshll.u32 %s2819_s17, 9 }
  0x67   : > { %702 = vmatmul.bf16.gmra.mxu0 %v1908_v2  ;;  %1612 = vmatpush.bf16.msrb.mxu3 %v2256_v41  ;;  %v2358_v49 = vld [vmem:[#allocation8 + $0x24] sm:$0xf0]  ;;  %v1976_v60 = vor.u32 %v2307_v44, %v1973_v45  ;;  %v1979_v12 = vld [vmem:[%s2823_s7 + $0xa0] sm:$0xf]  ;;  %v2309_v16 = vld [vmem:[%s2823_s7 + $0xa4] sm:$0xf] }
  0x68   : > { %791 = vmatmul.bf16.gmra.mxu1 %v1912_v3  ;;  %v2374_v52 = vld [vmem:[#allocation8 + $0xa4] sm:$0xf0]  ;;  %s3075_s16 = scalar_lea.vmem [#allocation10], %s1896_s12  ;;  %s2386_s23 = sshll.u32 %s2722_s22, 9 }
  0x69   : > { %880 = vmatmul.bf16.gmra.mxu2 %v1908_v2  ;;  %v2303_v2 = vld [vmem:[%s2823_s7 + $0x74] sm:$0xf]  ;;  %1435 = vmatpush.bf16.msrb.mxu1 %v2244_v11  ;;  %v2310_v13 = vld [vmem:[%s2823_s7 + $0xa4] sm:$0xf0]  ;;  %v1981_v18 = vld [vmem:[%s2823_s7 + $0xa8] sm:$0xf0]  ;;  %s1775_s13 = scalar_lea.hbm %s3274_s5, %s2386_s23 }
  0x6a   : > { %969 = vmatmul.bf16.gmra.mxu3 %v1912_v3  ;;  %1524 = vmatpush.bf16.msrb.mxu2 %v2184_v61  ;;  %v1957_v3 = vld [vmem:[%s2823_s7 + $0x78] sm:$0xf0]  ;;  %s1776_s10 = sshll.u32 %s3075_s16, 4  ;;  %s1778_s14 = sshll.u32 %s1775_s13, 4  ;;  %s1777_s10 = int_to_ptr.vmem [resolvable:$true] %s1776_s10  ;;  %s1779_s14 = int_to_ptr.hbm [resolvable:$true] %s1778_s14 }
  0x6b   : > { %1613 = vmatpush.bf16.msrb.mxu3 %v2248_v63  ;;  %s1763_s22 = scalar_lea.sflag [#allocation4], %s2819_s17  ;;  %s2602_s15 = sshra.s32 %s1779_s14, 4  ;;  %s2603_s15 = int_to_ptr.hbm [resolvable:$true] %s2602_s15 }
  0x6c   : > { %s2604_s9 = scalar_lea.hbm %s2603_s15, 512  ;;  %p2609_p11 = scmp.lt.s32.totalorder %s2603_s15, %s3274_s5 }
  0x6d   : > { %p2605_p1 = scmp.ne.s32.totalorder %s2603_s15, %s2604_s9 }
  0x6e   : > { %1525 = vmatpush.bf16.msrb.mxu2 %v2176_v30 }
  0x6f   : > { %p2606_p4 = pnand %p2605_p1, %p2789_p3 }
  0x71   : > { %p2607_p8 = pneg %p2606_p4 }
  0x77   : > { %707 = vmatmul.bf16.gmra.mxu0 %v1916_v8 }
  0x78   : > { %796 = vmatmul.bf16.gmra.mxu1 %v1920_v9 }
  0x79   : > { %885 = vmatmul.bf16.gmra.mxu2 %v1916_v8  ;;  %v1960_v8 = vor.u32 %v2303_v2, %v1957_v3 }
  0x7a   : > { %974 = vmatmul.bf16.gmra.mxu3 %v1920_v9  ;;  %v2180_v9 = vor.u32 %v2360_v6, %v2179_v5 }
  0x7c   : > { %1346 = vmatpush.bf16.msrb.mxu0 %v2180_v9 }
  0x87   : > { %712 = vmatmul.bf16.gmra.mxu0 %v1924_v26 }
  0x88   : > { %801 = vmatmul.bf16.gmra.mxu1 %v1928_v27 }
  0x89   : > { %890 = vmatmul.bf16.gmra.mxu2 %v1924_v26 }
  0x8a   : > { %979 = vmatmul.bf16.gmra.mxu3 %v1928_v27  ;;  %v2876_v27 = vperm.slane %v364_v23, 0 }
  0x97   : > { %717 = vmatmul.bf16.gmra.mxu0 %v1932_v32 }
  0x98   : > { %806 = vmatmul.bf16.gmra.mxu1 %v1936_v33 }
  0x99   : > { %895 = vmatmul.bf16.gmra.mxu2 %v1932_v32  ;;  %v2237_v32 = vld [vmem:[#allocation8 + $0xa8] sm:$0xf0] }
  0x9a   : > { %984 = vmatmul.bf16.gmra.mxu3 %v1936_v33  ;;  %v2240_v34 = vor.u32 %v2373_v31, %v2237_v32 }
  0x9c   : > { %1614 = vmatpush.bf16.msrb.mxu3 %v2240_v34  ;;  %v2165_v34 = vld [vmem:[#allocation8 + $0x18] sm:$0xf0] }
  0xa7   : > { %722 = vmatmul.bf16.gmra.mxu0 %v1940_v50 }
  0xa8   : > { %811 = vmatmul.bf16.gmra.mxu1 %v1944_v51 }
  0xa9   : > { %900 = vmatmul.bf16.gmra.mxu2 %v1940_v50  ;;  %v2172_v50 = vor.u32 %v2358_v49, %v2171_v48  ;;  %v1987_v48 = vld [vmem:[%s2823_s7 + $0xb0] sm:$0xf]  ;;  %v2312_v49 = vld [vmem:[%s2823_s7 + $0xb4] sm:$0xf0] }
  0xaa   : > { %989 = vmatmul.bf16.gmra.mxu3 %v1944_v51  ;;  %v2235_v51 = vld [vmem:[#allocation8 + $0xa0] sm:$0xf] }
  0xab   : > { %1347 = vmatpush.bf16.msrb.mxu0 %v2172_v50  ;;  %v2311_v50 = vld [vmem:[%s2823_s7 + $0xb4] sm:$0xf] }
  0xb7   : > { %727 = vmatmul.bf16.gmra.mxu0 %v1948_v56 }
  0xb8   : > { %816 = vmatmul.bf16.gmra.mxu1 %v1952_v57 }
  0xb9   : > { %905 = vmatmul.bf16.gmra.mxu2 %v1948_v56  ;;  %v2236_v56 = vor.u32 %v2374_v52, %v2235_v51  ;;  %v1989_v51 = vld [vmem:[%s2823_s7 + $0xb8] sm:$0xf0] }
  0xba   : > { %994 = vmatmul.bf16.gmra.mxu3 %v1952_v57 }
  0xbb   : > { %1436 = vmatpush.bf16.msrb.mxu1 %v2236_v56  ;;  %v2356_v56 = vld [vmem:[#allocation8 + $0x14] sm:$0xf0] }
  0xc7   : > { %732 = vmatmul.bf16.gmra.mxu0 %v1956_v4 }
  0xc8   : > { %821 = vmatmul.bf16.gmra.mxu1 %v1960_v8 }
  0xc9   : > { %910 = vmatmul.bf16.gmra.mxu2 %v1956_v4 }
  0xca   : > { %999 = vmatmul.bf16.gmra.mxu3 %v1960_v8 }
  0xd4   : > { %v698_v21 = vpop.f32.mrf.mxu0 }
  0xd5   : > { %v699_v24 = vadd.f32 %v698_v21, %v2871_v17  ;;  %v787_v25 = vpop.f32.mrf.mxu1 }
  0xd7   : > { %v788_v26 = vadd.f32 %v787_v25, %v699_v24  ;;  %737 = vmatmul.bf16.gmra.mxu0 %v1964_v20  ;;  %v1984_v25 = vor.u32 %v2309_v16, %v1981_v18 }
  0xd8   : > { %826 = vmatmul.bf16.gmra.mxu1 %v1968_v22 }
  0xd9   : > { %915 = vmatmul.bf16.gmra.mxu2 %v1964_v20  ;;  %v1045_v46 = vmax.f32 %v788_v26, 0.0  ;;  %v1980_v20 = vor.u32 %v2310_v13, %v1979_v12 }
  0xda   : > { %1004 = vmatmul.bf16.gmra.mxu3 %v1968_v22 }
  0xdc   : > { %v876_v33 = vpop.f32.mrf.mxu2  ;;  %v700_v37 = vpop.f32.mrf.mxu0 }
  0xdd   : > { %v877_v35 = vadd.f32 %v876_v33, %v2876_v27  ;;  %v965_v36 = vpop.f32.mrf.mxu3  ;;  %v701_v38 = vadd.f32 %v700_v37, %v2871_v17  ;;  %v789_v39 = vpop.f32.mrf.mxu1  ;;  %v2355_v33 = vld [vmem:[#allocation8 + $0x14] sm:$0xf]  ;;  %v2229_v37 = vld [vmem:[#allocation8 + $0x98] sm:$0xf0] }
  0xdf   : > { %v966_v40 = vadd.f32 %v965_v36, %v877_v35  ;;  %v790_v41 = vadd.f32 %v789_v39, %v701_v38  ;;  %v2168_v35 = vor.u32 %v2355_v33, %v2165_v34  ;;  %v2371_v36 = vld [vmem:[#allocation8 + $0x94] sm:$0xf] }
  0xe1   : > { %v1047_v47 = vmax.f32 %v790_v41, 0.0  ;;  %v1046_v1 = vmax.f32 %v966_v40, 0.0  ;;  %v2232_v40 = vor.u32 %v2371_v36, %v2229_v37  ;;  %1526 = vmatpush.bf16.msrb.mxu2 %v2168_v35 }
  0xe3   : > { %v2884_v53 = vpack.c.bf16 %v1047_v47, %v1045_v46  ;;  %1615 = vmatpush.bf16.msrb.mxu3 %v2232_v40 }
  0xe4   : > { %v878_v54 = vpop.f32.mrf.mxu2  ;;  %v703_v59 = vpop.f32.mrf.mxu0 }
  0xe5   : > { %v879_v57 = vadd.f32 %v878_v54, %v2876_v27  ;;  %v967_v58 = vpop.f32.mrf.mxu3  ;;  %v704_v61 = vadd.f32 %v703_v59, %v2871_v17  ;;  %v792_v62 = vpop.f32.mrf.mxu1  ;;  %v2372_v59 = vld [vmem:[#allocation8 + $0x94] sm:$0xf0] }
  0xe7   : > { %v968_v63 = vadd.f32 %v967_v58, %v879_v57  ;;  %v793_v0 = vadd.f32 %v792_v62, %v704_v61  ;;  %742 = vmatmul.bf16.gmra.mxu0 %v1972_v55  ;;  %v2227_v58 = vld [vmem:[#allocation8 + $0x90] sm:$0xf]  ;;  %v1988_v61 = vor.u32 %v2312_v49, %v1987_v48 }
  0xe8   : > { %831 = vmatmul.bf16.gmra.mxu1 %v1976_v60  ;;  %v2228_v62 = vor.u32 %v2372_v59, %v2227_v58  ;;  %v2003_v59 = vld [vmem:[%s2823_s7 + $0xd0] sm:$0xf] }
  0xe9   : > { %v1048_v2 = vmax.f32 %v968_v63, 0.0  ;;  %920 = vmatmul.bf16.gmra.mxu2 %v1972_v55  ;;  %v1049_v14 = vmax.f32 %v793_v0, 0.0  ;;  %v2163_v55 = vld [vmem:[#allocation8 + $0x10] sm:$0xf] }
  0xea   : > { %1009 = vmatmul.bf16.gmra.mxu3 %v1976_v60  ;;  %v2164_v57 = vor.u32 %v2356_v56, %v2163_v55  ;;  %1437 = vmatpush.bf16.msrb.mxu1 %v2228_v62  ;;  %v2005_v62 = vld [vmem:[%s2823_s7 + $0xd8] sm:$0xf0] }
  0xeb   : > { %v2888_v3 = vpack.c.bf16 %v1048_v2, %v1046_v1 }
  0xec   : > { %v881_v4 = vpop.f32.mrf.mxu2  ;;  %v705_v7 = vpop.f32.mrf.mxu0  ;;  %1348 = vmatpush.bf16.msrb.mxu0 %v2164_v57 }
  0xed   : > { %v882_v5 = vadd.f32 %v881_v4, %v2876_v27  ;;  %v970_v6 = vpop.f32.mrf.mxu3  ;;  %v706_v8 = vadd.f32 %v705_v7, %v2871_v17  ;;  %v794_v9 = vpop.f32.mrf.mxu1  ;;  %v1992_v4 = vor.u32 %v2311_v50, %v1989_v51 }
  0xef   : > { %v971_v10 = vadd.f32 %v970_v6, %v882_v5  ;;  %v795_v11 = vadd.f32 %v794_v9, %v706_v8 }
  0xf1   : > { %v1051_v15 = vmax.f32 %v795_v11, 0.0  ;;  %v1050_v31 = vmax.f32 %v971_v10, 0.0 }
  0xf3   : > { %v2896_v21 = vpack.c.bf16 %v1051_v15, %v1049_v14 }
  0xf4   : > { %v883_v19 = vpop.f32.mrf.mxu2  ;;  %v708_v24 = vpop.f32.mrf.mxu0 }
  0xf5   : > { %v884_v22 = vadd.f32 %v883_v19, %v2876_v27  ;;  %v972_v23 = vpop.f32.mrf.mxu3  ;;  %v709_v26 = vadd.f32 %v708_v24, %v2871_v17  ;;  %v797_v28 = vpop.f32.mrf.mxu1 }
  0xf7   : > { %v973_v29 = vadd.f32 %v972_v23, %v884_v22  ;;  %v798_v30 = vadd.f32 %v797_v28, %v709_v26  ;;  %747 = vmatmul.bf16.gmra.mxu0 %v1980_v20  ;;  %v1995_v22 = vld [vmem:[%s2823_s7 + $0xc0] sm:$0xf]  ;;  %v2314_v23 = vld [vmem:[%s2823_s7 + $0xc4] sm:$0xf0]  ;;  %v2313_v26 = vld [vmem:[%s2823_s7 + $0xc4] sm:$0xf] }
  0xf8   : > { %836 = vmatmul.bf16.gmra.mxu1 %v1984_v25  ;;  %v1997_v28 = vld [vmem:[%s2823_s7 + $0xc8] sm:$0xf0] }
  0xf9   : > { %v1052_v32 = vmax.f32 %v973_v29, 0.0  ;;  %925 = vmatmul.bf16.gmra.mxu2 %v1980_v20  ;;  %v1053_v52 = vmax.f32 %v798_v30, 0.0  ;;  %v1996_v30 = vor.u32 %v2314_v23, %v1995_v22  ;;  %v2000_v35 = vor.u32 %v2313_v26, %v1997_v28 }
  0xfa   : > { %1014 = vmatmul.bf16.gmra.mxu3 %v1984_v25 }
  0xfb   : > { %v2900_v38 = vpack.c.bf16 %v1052_v32, %v1050_v31 }
  0xfc   : > { %v886_v39 = vpop.f32.mrf.mxu2  ;;  %v710_v43 = vpop.f32.mrf.mxu0 }
  0xfd   : > { %v887_v41 = vadd.f32 %v886_v39, %v2876_v27  ;;  %v975_v42 = vpop.f32.mrf.mxu3  ;;  %v711_v44 = vadd.f32 %v710_v43, %v2871_v17  ;;  %v799_v45 = vpop.f32.mrf.mxu1  ;;  %v2353_v43 = vld [vmem:[#allocation8 + $0x4] sm:$0xf] }
  0xff   : > { %v976_v46 = vadd.f32 %v975_v42, %v887_v41  ;;  %v800_v47 = vadd.f32 %v799_v45, %v711_v44  ;;  %v2157_v44 = vld [vmem:[#allocation8 + $0x8] sm:$0xf0] }
 0x100   : > { %v2160_v45 = vor.u32 %v2353_v43, %v2157_v44 }
 0x101   : > { %v1055_v54 = vmax.f32 %v800_v47, 0.0  ;;  %v1054_v9 = vmax.f32 %v976_v46, 0.0  ;;  %v2369_v46 = vld [vmem:[#allocation8 + $0x84] sm:$0xf]  ;;  %v2221_v47 = vld [vmem:[#allocation8 + $0x88] sm:$0xf0] }
 0x102   : > { %v2224_v50 = vor.u32 %v2369_v46, %v2221_v47  ;;  %1527 = vmatpush.bf16.msrb.mxu2 %v2160_v45 }
 0x103   : > { %v2908_v63 = vpack.c.bf16 %v1055_v54, %v1053_v52 }
 0x104   : > { %v888_v60 = vpop.f32.mrf.mxu2  ;;  %v713_v2 = vpop.f32.mrf.mxu0  ;;  %1616 = vmatpush.bf16.msrb.mxu3 %v2224_v50 }
 0x105   : > { %v889_v0 = vadd.f32 %v888_v60, %v2876_v27  ;;  %v977_v1 = vpop.f32.mrf.mxu3  ;;  %v714_v5 = vadd.f32 %v713_v2, %v2871_v17  ;;  %v802_v6 = vpop.f32.mrf.mxu1  ;;  %v2316_v60 = vld [vmem:[%s2823_s7 + $0xd4] sm:$0xf0]  ;;  %v2155_v2 = vld [vmem:[#allocation8] sm:$0xf] }
 0x107   : > { %v978_v7 = vadd.f32 %v977_v1, %v889_v0  ;;  %v803_v8 = vadd.f32 %v802_v6, %v714_v5  ;;  %752 = vmatmul.bf16.gmra.mxu0 %v1988_v61  ;;  %v2219_v6 = vld [vmem:[#allocation8 + $0x80] sm:$0xf] }
 0x108   : > { %841 = vmatmul.bf16.gmra.mxu1 %v1992_v4 }
 0x109   : > { %v1056_v10 = vmax.f32 %v978_v7, 0.0  ;;  %930 = vmatmul.bf16.gmra.mxu2 %v1988_v61  ;;  %v1057_v24 = vmax.f32 %v803_v8, 0.0  ;;  %v2315_v61 = vld [vmem:[%s2823_s7 + $0xd4] sm:$0xf]  ;;  %v2370_v7 = vld [vmem:[#allocation8 + $0x84] sm:$0xf0] }
 0x10a   : > { %1019 = vmatmul.bf16.gmra.mxu3 %v1992_v4  ;;  %v2354_v4 = vld [vmem:[#allocation8 + $0x4] sm:$0xf0] }
 0x10b   : > { %v2912_v11 = vpack.c.bf16 %v1056_v10, %v1054_v9  ;;  %v2156_v5 = vor.u32 %v2354_v4, %v2155_v2  ;;  %v2004_v9 = vor.u32 %v2316_v60, %v2003_v59  ;;  %v2220_v10 = vor.u32 %v2370_v7, %v2219_v6  ;;  %v2320_v6 = vld [vmem:[%s2823_s7 + $0xf4] sm:$0xf0] }
 0x10c   : > { %v891_v12 = vpop.f32.mrf.mxu2  ;;  %v715_v15 = vpop.f32.mrf.mxu0 }
 0x10d   : > { %v892_v13 = vadd.f32 %v891_v12, %v2876_v27  ;;  %v980_v14 = vpop.f32.mrf.mxu3  ;;  %v716_v16 = vadd.f32 %v715_v15, %v2871_v17  ;;  %v804_v18 = vpop.f32.mrf.mxu1  ;;  %1349 = vmatpush.bf16.msrb.mxu0 %v2156_v5  ;;  %1438 = vmatpush.bf16.msrb.mxu1 %v2220_v10  ;;  %v2019_v5 = vld [vmem:[%s2823_s7 + $0xf0] sm:$0xf]  ;;  %v2021_v10 = vld [vmem:[%s2823_s7 + $0xf8] sm:$0xf0] }
 0x10f   : > { %v981_v19 = vadd.f32 %v980_v14, %v892_v13  ;;  %v805_v20 = vadd.f32 %v804_v18, %v716_v16  ;;  %v2008_v16 = vor.u32 %v2315_v61, %v2005_v62 }
 0x111   : > { %v1059_v25 = vmax.f32 %v805_v20, 0.0  ;;  %v1058_v41 = vmax.f32 %v981_v19, 0.0 }
 0x113   : > { %v2920_v31 = vpack.c.bf16 %v1059_v25, %v1057_v24 }
 0x114   : > { %v893_v29 = vpop.f32.mrf.mxu2  ;;  %v718_v34 = vpop.f32.mrf.mxu0 }
 0x115   : > { %v894_v32 = vadd.f32 %v893_v29, %v2876_v27  ;;  %v982_v33 = vpop.f32.mrf.mxu3  ;;  %v719_v36 = vadd.f32 %v718_v34, %v2871_v17  ;;  %v807_v37 = vpop.f32.mrf.mxu1 }
 0x117   : > { %v983_v39 = vadd.f32 %v982_v33, %v894_v32  ;;  %v808_v40 = vadd.f32 %v807_v37, %v719_v36  ;;  %757 = vmatmul.bf16.gmra.mxu0 %v1996_v30  ;;  %v2011_v36 = vld [vmem:[%s2823_s7 + $0xe0] sm:$0xf]  ;;  %v2318_v37 = vld [vmem:[%s2823_s7 + $0xe4] sm:$0xf0] }
 0x118   : > { %846 = vmatmul.bf16.gmra.mxu1 %v2000_v35  ;;  %v2012_v44 = vor.u32 %v2318_v37, %v2011_v36 }
 0x119   : > { %v1060_v42 = vmax.f32 %v983_v39, 0.0  ;;  %935 = vmatmul.bf16.gmra.mxu2 %v1996_v30  ;;  %v1061_v0 = vmax.f32 %v808_v40, 0.0 }
 0x11a   : > { %1024 = vmatmul.bf16.gmra.mxu3 %v2000_v35 }
 0x11b   : > { %v2924_v48 = vpack.c.bf16 %v1060_v42, %v1058_v41  ;;  %v2317_v41 = vld [vmem:[%s2823_s7 + $0xe4] sm:$0xf]  ;;  %v2013_v42 = vld [vmem:[%s2823_s7 + $0xe8] sm:$0xf0] }
 0x11c   : > { %v896_v49 = vpop.f32.mrf.mxu2  ;;  %v720_v54 = vpop.f32.mrf.mxu0  ;;  %v2016_v50 = vor.u32 %v2317_v41, %v2013_v42 }
 0x11d   : > { %v897_v51 = vadd.f32 %v896_v49, %v2876_v27  ;;  %v985_v52 = vpop.f32.mrf.mxu3  ;;  %v721_v55 = vadd.f32 %v720_v54, %v2871_v17  ;;  %v809_v56 = vpop.f32.mrf.mxu1 }
 0x11f   : > { %v986_v57 = vadd.f32 %v985_v52, %v897_v51  ;;  %v810_v58 = vadd.f32 %v809_v56, %v721_v55 }
 0x121   : > { %v1063_v1 = vmax.f32 %v810_v58, 0.0  ;;  %v1062_v23 = vmax.f32 %v986_v57, 0.0 }
 0x123   : > { %v2932_v12 = vpack.c.bf16 %v1063_v1, %v1061_v0 }
 0x124   : > { %v898_v8 = vpop.f32.mrf.mxu2  ;;  %v723_v15 = vpop.f32.mrf.mxu0 }
 0x125   : > { %v899_v13 = vadd.f32 %v898_v8, %v2876_v27  ;;  %v987_v14 = vpop.f32.mrf.mxu3  ;;  %v724_v18 = vadd.f32 %v723_v15, %v2871_v17  ;;  %v812_v19 = vpop.f32.mrf.mxu1 }
 0x127   : > { %v988_v20 = vadd.f32 %v987_v14, %v899_v13  ;;  %v813_v22 = vadd.f32 %v812_v19, %v724_v18  ;;  %762 = vmatmul.bf16.gmra.mxu0 %v2004_v9  ;;  %v2020_v14 = vor.u32 %v2320_v6, %v2019_v5 }
 0x128   : > { %851 = vmatmul.bf16.gmra.mxu1 %v2008_v16 }
 0x129   : > { %v1064_v24 = vmax.f32 %v988_v20, 0.0  ;;  %940 = vmatmul.bf16.gmra.mxu2 %v2004_v9  ;;  %v1065_v39 = vmax.f32 %v813_v22, 0.0  ;;  %v2319_v9 = vld [vmem:[%s2823_s7 + $0xf4] sm:$0xf]  ;;  %s2608_s7 = scalar_lea.hbm %s3274_s5, 1024 }
 0x12a   : > { %1029 = vmatmul.bf16.gmra.mxu3 %v2008_v16  ;;  %v2024_v20 = vor.u32 %v2319_v9, %v2021_v10  ;;  %p2610_p9 = scmp.lt.s32.totalorder %s2608_s7, %s2604_s9 }
 0x12b   : > { %v2936_v25 = vpack.c.bf16 %v1064_v24, %v1062_v23 }
 0x12c   : > { %v901_v26 = vpop.f32.mrf.mxu2  ;;  %v725_v30 = vpop.f32.mrf.mxu0  ;;  %p2611_p2 = por %p2610_p9, %p2609_p11 }
 0x12d   : > { %v902_v28 = vadd.f32 %v901_v26, %v2876_v27  ;;  %v990_v29 = vpop.f32.mrf.mxu3  ;;  %v726_v32 = vadd.f32 %v725_v30, %v2871_v17  ;;  %v814_v33 = vpop.f32.mrf.mxu1 }
 0x12e   : > { %p2612_p10 = pnand %p2611_p2, %p2607_p8 }
 0x12f   : > { %v991_v34 = vadd.f32 %v990_v29, %v902_v28  ;;  %v815_v35 = vadd.f32 %v814_v33, %v726_v32 }
 0x131   : > { %v1067_v40 = vmax.f32 %v815_v35, 0.0  ;;  %v1066_v56 = vmax.f32 %v991_v34, 0.0 }
 0x133   : > { %v2944_v45 = vpack.c.bf16 %v1067_v40, %v1065_v39 }
 0x134   : > { %v903_v43 = vpop.f32.mrf.mxu2  ;;  %v728_v49 = vpop.f32.mrf.mxu0 }
 0x135   : > { %v904_v46 = vadd.f32 %v903_v43, %v2876_v27  ;;  %v992_v47 = vpop.f32.mrf.mxu3  ;;  %v729_v51 = vadd.f32 %v728_v49, %v2871_v17  ;;  %v817_v52 = vpop.f32.mrf.mxu1 }
 0x137   : > { %v993_v54 = vadd.f32 %v992_v47, %v904_v46  ;;  %v818_v55 = vadd.f32 %v817_v52, %v729_v51  ;;  %767 = vmatmul.bf16.gmra.mxu0 %v2012_v44 }
 0x138   : > { %856 = vmatmul.bf16.gmra.mxu1 %v2016_v50 }
 0x139   : > { %v1068_v57 = vmax.f32 %v993_v54, 0.0  ;;  %945 = vmatmul.bf16.gmra.mxu2 %v2012_v44  ;;  %v1069_v7 = vmax.f32 %v818_v55, 0.0 }
 0x13a   : > { %1034 = vmatmul.bf16.gmra.mxu3 %v2016_v50 }
 0x13b   : > { %v2948_v58 = vpack.c.bf16 %v1068_v57, %v1066_v56 }
 0x13c   : > { %v906_v59 = vpop.f32.mrf.mxu2  ;;  %v730_v62 = vpop.f32.mrf.mxu0 }
 0x13d   : > { %v907_v60 = vadd.f32 %v906_v59, %v2876_v27  ;;  %v995_v61 = vpop.f32.mrf.mxu3  ;;  %v731_v0 = vadd.f32 %v730_v62, %v2871_v17  ;;  %v819_v1 = vpop.f32.mrf.mxu1 }
 0x13f   : > { %v996_v2 = vadd.f32 %v995_v61, %v907_v60  ;;  %v820_v4 = vadd.f32 %v819_v1, %v731_v0 }
 0x141   : > { %v1071_v8 = vmax.f32 %v820_v4, 0.0  ;;  %v1070_v28 = vmax.f32 %v996_v2, 0.0 }
 0x143   : > { %v2956_v15 = vpack.c.bf16 %v1071_v8, %v1069_v7 }
 0x144   : > { %v908_v13 = vpop.f32.mrf.mxu2  ;;  %v733_v19 = vpop.f32.mrf.mxu0 }
 0x145   : > { %v909_v16 = vadd.f32 %v908_v13, %v2876_v27  ;;  %v997_v18 = vpop.f32.mrf.mxu3  ;;  %v734_v22 = vadd.f32 %v733_v19, %v2871_v17  ;;  %v822_v23 = vpop.f32.mrf.mxu1 }
 0x147   : > { %v998_v24 = vadd.f32 %v997_v18, %v909_v16  ;;  %v823_v26 = vadd.f32 %v822_v23, %v734_v22  ;;  %772 = vmatmul.bf16.gmra.mxu0 %v2020_v14 }
 0x148   : > { %861 = vmatmul.bf16.gmra.mxu1 %v2024_v20 }
 0x149   : > { %v1072_v29 = vmax.f32 %v998_v24, 0.0  ;;  %950 = vmatmul.bf16.gmra.mxu2 %v2020_v14  ;;  %v1073_v41 = vmax.f32 %v823_v26, 0.0 }
 0x14a   : > { %1039 = vmatmul.bf16.gmra.mxu3 %v2024_v20 }
 0x14b   : > { %v2960_v30 = vpack.c.bf16 %v1072_v29, %v1070_v28 }
 0x14c   : > { %v911_v32 = vpop.f32.mrf.mxu2  ;;  %v735_v35 = vpop.f32.mrf.mxu0 }
 0x14d   : > { %v912_v33 = vadd.f32 %v911_v32, %v2876_v27  ;;  %v1000_v34 = vpop.f32.mrf.mxu3  ;;  %v736_v36 = vadd.f32 %v735_v35, %v2871_v17  ;;  %v824_v37 = vpop.f32.mrf.mxu1 }
 0x14f   : > { %v1001_v39 = vadd.f32 %v1000_v34, %v912_v33  ;;  %v825_v40 = vadd.f32 %v824_v37, %v736_v36 }
 0x151   : > { %v1075_v42 = vmax.f32 %v825_v40, 0.0  ;;  %v1074_v55 = vmax.f32 %v1001_v39, 0.0 }
 0x153   : > { %v2964_v44 = vpack.c.bf16 %v1075_v42, %v1073_v41 }
 0x154   : > { %v913_v43 = vpop.f32.mrf.mxu2  ;;  %v738_v49 = vpop.f32.mrf.mxu0 }
 0x155   : > { %v914_v46 = vadd.f32 %v913_v43, %v2876_v27  ;;  %v1002_v47 = vpop.f32.mrf.mxu3  ;;  %v739_v50 = vadd.f32 %v738_v49, %v2871_v17  ;;  %v827_v51 = vpop.f32.mrf.mxu1 }
 0x157   : > { %v1003_v52 = vadd.f32 %v1002_v47, %v914_v46  ;;  %v828_v54 = vadd.f32 %v827_v51, %v739_v50  ;;  %1350 = vmatmul.bf16.vlgmr.msrb.gmra.mxu0 %v2884_v53 }
 0x158   : > { %1439 = vmatmul.bf16.vlgmr.msrb.gmra.mxu1 %v2888_v3 }
 0x159   : > { %v1076_v56 = vmax.f32 %v1003_v52, 0.0  ;;  %1528 = vmatmul.bf16.vlgmr.msrb.gmra.mxu2 %v2884_v53  ;;  %v1077_v5 = vmax.f32 %v828_v54, 0.0 }
 0x15a   : > { %1617 = vmatmul.bf16.vlgmr.msrb.gmra.mxu3 %v2888_v3 }
 0x15b   : > { %v2972_v57 = vpack.c.bf16 %v1076_v56, %v1074_v55 }
 0x15c   : > { %v916_v59 = vpop.f32.mrf.mxu2  ;;  %v740_v62 = vpop.f32.mrf.mxu0 }
 0x15d   : > { %v917_v60 = vadd.f32 %v916_v59, %v2876_v27  ;;  %v1005_v61 = vpop.f32.mrf.mxu3  ;;  %v741_v0 = vadd.f32 %v740_v62, %v2871_v17  ;;  %v829_v1 = vpop.f32.mrf.mxu1 }
 0x15f   : > { %v1006_v2 = vadd.f32 %v1005_v61, %v917_v60  ;;  %v830_v4 = vadd.f32 %v829_v1, %v741_v0 }
 0x161   : > { %v1079_v6 = vmax.f32 %v830_v4, 0.0  ;;  %v1078_v18 = vmax.f32 %v1006_v2, 0.0 }
 0x163   : > { %v2976_v8 = vpack.c.bf16 %v1079_v6, %v1077_v5 }
 0x164   : > { %v918_v7 = vpop.f32.mrf.mxu2  ;;  %v743_v9 = vpop.f32.mrf.mxu0 }
 0x165   : > { %v919_v53 = vadd.f32 %v918_v7, %v2876_v27  ;;  %v1007_v3 = vpop.f32.mrf.mxu3  ;;  %v744_v10 = vadd.f32 %v743_v9, %v2871_v17  ;;  %v832_v13 = vpop.f32.mrf.mxu1 }
 0x167   : > { %v1008_v14 = vadd.f32 %v1007_v3, %v919_v53  ;;  %v833_v16 = vadd.f32 %v832_v13, %v744_v10  ;;  %1355 = vmatmul.bf16.gmra.mxu0 %v2896_v21 }
 0x168   : > { %1444 = vmatmul.bf16.gmra.mxu1 %v2900_v38 }
 0x169   : > { %v1080_v19 = vmax.f32 %v1008_v14, 0.0  ;;  %1533 = vmatmul.bf16.gmra.mxu2 %v2896_v21  ;;  %v1081_v34 = vmax.f32 %v833_v16, 0.0 }
 0x16a   : > { %1622 = vmatmul.bf16.gmra.mxu3 %v2900_v38 }
 0x16b   : > { %v2984_v20 = vpack.c.bf16 %v1080_v19, %v1078_v18 }
 0x16c   : > { %v921_v22 = vpop.f32.mrf.mxu2  ;;  %v745_v26 = vpop.f32.mrf.mxu0 }
 0x16d   : > { %v922_v23 = vadd.f32 %v921_v22, %v2876_v27  ;;  %v1010_v24 = vpop.f32.mrf.mxu3  ;;  %v746_v28 = vadd.f32 %v745_v26, %v2871_v17  ;;  %v834_v29 = vpop.f32.mrf.mxu1 }
 0x16f   : > { %v1011_v32 = vadd.f32 %v1010_v24, %v922_v23  ;;  %v835_v33 = vadd.f32 %v834_v29, %v746_v28 }
 0x171   : > { %v1083_v35 = vmax.f32 %v835_v33, 0.0  ;;  %v1082_v46 = vmax.f32 %v1011_v32, 0.0 }
 0x173   : > { %v2988_v37 = vpack.c.bf16 %v1083_v35, %v1081_v34 }
 0x174   : > { %v923_v36 = vpop.f32.mrf.mxu2  ;;  %v748_v39 = vpop.f32.mrf.mxu0 }
 0x175   : > { %v924_v21 = vadd.f32 %v923_v36, %v2876_v27  ;;  %v1012_v38 = vpop.f32.mrf.mxu3  ;;  %v749_v40 = vadd.f32 %v748_v39, %v2871_v17  ;;  %v837_v41 = vpop.f32.mrf.mxu1 }
 0x177   : > { %v1013_v42 = vadd.f32 %v1012_v38, %v924_v21  ;;  %v838_v43 = vadd.f32 %v837_v41, %v749_v40  ;;  %1360 = vmatmul.bf16.gmra.mxu0 %v2908_v63 }
 0x178   : > { %1449 = vmatmul.bf16.gmra.mxu1 %v2912_v11 }
 0x179   : > { %v1084_v47 = vmax.f32 %v1013_v42, 0.0  ;;  %1538 = vmatmul.bf16.gmra.mxu2 %v2908_v63  ;;  %v1085_v61 = vmax.f32 %v838_v43, 0.0 }
 0x17a   : > { %1627 = vmatmul.bf16.gmra.mxu3 %v2912_v11 }
 0x17b   : > { %v2996_v49 = vpack.c.bf16 %v1084_v47, %v1082_v46 }
 0x17c   : > { %v926_v50 = vpop.f32.mrf.mxu2  ;;  %v750_v54 = vpop.f32.mrf.mxu0 }
 0x17d   : > { %v927_v51 = vadd.f32 %v926_v50, %v2876_v27  ;;  %v1015_v52 = vpop.f32.mrf.mxu3  ;;  %v751_v55 = vadd.f32 %v750_v54, %v2871_v17  ;;  %v839_v56 = vpop.f32.mrf.mxu1 }
 0x17f   : > { %v1016_v59 = vadd.f32 %v1015_v52, %v927_v51  ;;  %v840_v60 = vadd.f32 %v839_v56, %v751_v55 }
 0x181   : > { %v1087_v62 = vmax.f32 %v840_v60, 0.0  ;;  %v1086_v53 = vmax.f32 %v1016_v59, 0.0 }
 0x183   : > { %v3000_v1 = vpack.c.bf16 %v1087_v62, %v1085_v61 }
 0x184   : > { %v928_v0 = vpop.f32.mrf.mxu2  ;;  %v753_v2 = vpop.f32.mrf.mxu0 }
 0x185   : > { %v929_v63 = vadd.f32 %v928_v0, %v2876_v27  ;;  %v1017_v11 = vpop.f32.mrf.mxu3  ;;  %v754_v4 = vadd.f32 %v753_v2, %v2871_v17  ;;  %v842_v5 = vpop.f32.mrf.mxu1 }
 0x187   : > { %v1018_v6 = vadd.f32 %v1017_v11, %v929_v63  ;;  %v843_v7 = vadd.f32 %v842_v5, %v754_v4  ;;  %1365 = vmatmul.bf16.gmra.mxu0 %v2920_v31 }
 0x188   : > { %1454 = vmatmul.bf16.gmra.mxu1 %v2924_v48 }
 0x189   : > { %v1088_v3 = vmax.f32 %v1018_v6, 0.0  ;;  %1543 = vmatmul.bf16.gmra.mxu2 %v2920_v31  ;;  %v1089_v24 = vmax.f32 %v843_v7, 0.0 }
 0x18a   : > { %1632 = vmatmul.bf16.gmra.mxu3 %v2924_v48 }
 0x18b   : > { %v3008_v9 = vpack.c.bf16 %v1088_v3, %v1086_v53 }
 0x18c   : > { %v931_v10 = vpop.f32.mrf.mxu2  ;;  %v755_v16 = vpop.f32.mrf.mxu0 }
 0x18d   : > { %v932_v13 = vadd.f32 %v931_v10, %v2876_v27  ;;  %v1020_v14 = vpop.f32.mrf.mxu3  ;;  %v756_v18 = vadd.f32 %v755_v16, %v2871_v17  ;;  %v844_v19 = vpop.f32.mrf.mxu1 }
 0x18f   : > { %v1021_v22 = vadd.f32 %v1020_v14, %v932_v13  ;;  %v845_v23 = vadd.f32 %v844_v19, %v756_v18 }
 0x191   : > { %v1091_v26 = vmax.f32 %v845_v23, 0.0  ;;  %v1090_v21 = vmax.f32 %v1021_v22, 0.0 }
 0x193   : > { %v3012_v29 = vpack.c.bf16 %v1091_v26, %v1089_v24 }
 0x194   : > { %v933_v28 = vpop.f32.mrf.mxu2  ;;  %v758_v32 = vpop.f32.mrf.mxu0 }
 0x195   : > { %v934_v31 = vadd.f32 %v933_v28, %v2876_v27  ;;  %v1022_v48 = vpop.f32.mrf.mxu3  ;;  %v759_v33 = vadd.f32 %v758_v32, %v2871_v17  ;;  %v847_v34 = vpop.f32.mrf.mxu1 }
 0x197   : > { %v1023_v35 = vadd.f32 %v1022_v48, %v934_v31  ;;  %v848_v36 = vadd.f32 %v847_v34, %v759_v33  ;;  %1370 = vmatmul.bf16.gmra.mxu0 %v2932_v12 }
 0x198   : > { %1459 = vmatmul.bf16.gmra.mxu1 %v2936_v25 }
 0x199   : > { %v1092_v38 = vmax.f32 %v1023_v35, 0.0  ;;  %1548 = vmatmul.bf16.gmra.mxu2 %v2932_v12  ;;  %v1093_v52 = vmax.f32 %v848_v36, 0.0 }
 0x19a   : > { %1637 = vmatmul.bf16.gmra.mxu3 %v2936_v25 }
 0x19b   : > { %v3020_v39 = vpack.c.bf16 %v1092_v38, %v1090_v21 }
 0x19c   : > { %v936_v40 = vpop.f32.mrf.mxu2  ;;  %v760_v43 = vpop.f32.mrf.mxu0 }
 0x19d   : > { %v937_v41 = vadd.f32 %v936_v40, %v2876_v27  ;;  %v1025_v42 = vpop.f32.mrf.mxu3  ;;  %v761_v46 = vadd.f32 %v760_v43, %v2871_v17  ;;  %v849_v47 = vpop.f32.mrf.mxu1 }
 0x19f   : > { %v1026_v50 = vadd.f32 %v1025_v42, %v937_v41  ;;  %v850_v51 = vadd.f32 %v849_v47, %v761_v46 }
 0x1a1   : > { %v1095_v54 = vmax.f32 %v850_v51, 0.0  ;;  %v1094_v63 = vmax.f32 %v1026_v50, 0.0 }
 0x1a3   : > { %v3024_v56 = vpack.c.bf16 %v1095_v54, %v1093_v52 }
 0x1a4   : > { %v938_v55 = vpop.f32.mrf.mxu2  ;;  %v763_v59 = vpop.f32.mrf.mxu0 }
 0x1a5   : > { %v939_v12 = vadd.f32 %v938_v55, %v2876_v27  ;;  %v1027_v25 = vpop.f32.mrf.mxu3  ;;  %v764_v60 = vadd.f32 %v763_v59, %v2871_v17  ;;  %v852_v61 = vpop.f32.mrf.mxu1  ;;  %v1173_v55 = vld [vmem:[%s3273_s4] sm:$0x3] }
 0x1a7   : > { %v1028_v62 = vadd.f32 %v1027_v25, %v939_v12  ;;  %v853_v0 = vadd.f32 %v852_v61, %v764_v60  ;;  %1375 = vmatmul.bf16.gmra.mxu0 %v2944_v45  ;;  %v1174_v60 = vunpack.c.l.bf16 %v1173_v55 }
 0x1a8   : > { %1464 = vmatmul.bf16.gmra.mxu1 %v2948_v58 }
 0x1a9   : > { %v1096_v11 = vmax.f32 %v1028_v62, 0.0  ;;  %1553 = vmatmul.bf16.gmra.mxu2 %v2944_v45  ;;  %v1097_v14 = vmax.f32 %v853_v0, 0.0 }
 0x1aa   : > { %1642 = vmatmul.bf16.gmra.mxu3 %v2948_v58 }
 0x1ab   : > { %v3032_v2 = vpack.c.bf16 %v1096_v11, %v1094_v63 }
 0x1ac   : > { %v941_v4 = vpop.f32.mrf.mxu2  ;;  %v765_v7 = vpop.f32.mrf.mxu0 }
 0x1ad   : > { %v942_v5 = vadd.f32 %v941_v4, %v2876_v27  ;;  %v1030_v6 = vpop.f32.mrf.mxu3  ;;  %v766_v53 = vadd.f32 %v765_v7, %v2871_v17  ;;  %v854_v3 = vpop.f32.mrf.mxu1 }
 0x1af   : > { %v1031_v10 = vadd.f32 %v1030_v6, %v942_v5  ;;  %v855_v13 = vadd.f32 %v854_v3, %v766_v53  ;;  %v1176_v6 = vperm.slane %v1174_v60, 0 }
 0x1b1   : > { %v1099_v16 = vmax.f32 %v855_v13, 0.0  ;;  %v1098_v31 = vmax.f32 %v1031_v10, 0.0 }
 0x1b3   : > { %v3036_v19 = vpack.c.bf16 %v1099_v16, %v1097_v14 }
 0x1b4   : > { %v943_v18 = vpop.f32.mrf.mxu2  ;;  %v768_v22 = vpop.f32.mrf.mxu0 }
 0x1b5   : > { %v944_v45 = vadd.f32 %v943_v18, %v2876_v27  ;;  %v1032_v58 = vpop.f32.mrf.mxu3  ;;  %v769_v23 = vadd.f32 %v768_v22, %v2871_v17  ;;  %v857_v24 = vpop.f32.mrf.mxu1 }
 0x1b7   : > { %v1033_v26 = vadd.f32 %v1032_v58, %v944_v45  ;;  %v858_v28 = vadd.f32 %v857_v24, %v769_v23  ;;  %1380 = vmatmul.bf16.gmra.mxu0 %v2956_v15  ;;  %v1177_v45 = vperm.slane %v1174_v60, 2 }
 0x1b8   : > { %1469 = vmatmul.bf16.gmra.mxu1 %v2960_v30 }
 0x1b9   : > { %v1100_v48 = vmax.f32 %v1033_v26, 0.0  ;;  %1558 = vmatmul.bf16.gmra.mxu2 %v2956_v15  ;;  %v1101_v42 = vmax.f32 %v858_v28, 0.0  ;;  %v3073_v28 = vperm.slane %v1177_v45, 0 }
 0x1ba   : > { %1647 = vmatmul.bf16.gmra.mxu3 %v2960_v30 }
 0x1bb   : > { %v3044_v32 = vpack.c.bf16 %v1100_v48, %v1098_v31 }
 0x1bc   : > { %v946_v33 = vpop.f32.mrf.mxu2  ;;  %v770_v36 = vpop.f32.mrf.mxu0 }
 0x1bd   : > { %v947_v34 = vadd.f32 %v946_v33, %v2876_v27  ;;  %v1035_v35 = vpop.f32.mrf.mxu3  ;;  %v771_v21 = vadd.f32 %v770_v36, %v2871_v17  ;;  %v859_v38 = vpop.f32.mrf.mxu1 }
 0x1bf   : > { %v1036_v40 = vadd.f32 %v1035_v35, %v947_v34  ;;  %v860_v41 = vadd.f32 %v859_v38, %v771_v21 }
 0x1c1   : > { %v1103_v43 = vmax.f32 %v860_v41, 0.0  ;;  %v1102_v25 = vmax.f32 %v1036_v40, 0.0 }
 0x1c3   : > { %v3048_v47 = vpack.c.bf16 %v1103_v43, %v1101_v42 }
 0x1c4   : > { %v948_v46 = vpop.f32.mrf.mxu2  ;;  %v773_v50 = vpop.f32.mrf.mxu0 }
 0x1c5   : > { %v949_v15 = vadd.f32 %v948_v46, %v2876_v27  ;;  %v1037_v30 = vpop.f32.mrf.mxu3  ;;  %v774_v51 = vadd.f32 %v773_v50, %v2871_v17  ;;  %v862_v52 = vpop.f32.mrf.mxu1 }
 0x1c7   : > { %v1038_v54 = vadd.f32 %v1037_v30, %v949_v15  ;;  %v863_v12 = vadd.f32 %v862_v52, %v774_v51  ;;  %1385 = vmatmul.bf16.gmra.mxu0 %v2964_v44 }
 0x1c8   : > { %1474 = vmatmul.bf16.gmra.mxu1 %v2972_v57 }
 0x1c9   : > { %v1104_v59 = vmax.f32 %v1038_v54, 0.0  ;;  %1563 = vmatmul.bf16.gmra.mxu2 %v2964_v44  ;;  %v1105_v3 = vmax.f32 %v863_v12, 0.0  ;;  %v3063_v44 = vperm.slane %v1176_v6, 0 }
 0x1ca   : > { %1652 = vmatmul.bf16.gmra.mxu3 %v2972_v57 }
 0x1cb   : > { %v3059_v61 = vpack.c.bf16 %v1104_v59, %v1102_v25 }
 0x1cc   : > { %v951_v62 = vpop.f32.mrf.mxu2  ;;  %v775_v11 = vpop.f32.mrf.mxu0 }
 0x1cd   : > { %v952_v0 = vadd.f32 %v951_v62, %v2876_v27  ;;  %v1040_v63 = vpop.f32.mrf.mxu3  ;;  %v776_v4 = vadd.f32 %v775_v11, %v2871_v17  ;;  %v864_v5 = vpop.f32.mrf.mxu1 }
 0x1cf   : > { %v1041_v7 = vadd.f32 %v1040_v63, %v952_v0  ;;  %v865_v53 = vadd.f32 %v864_v5, %v776_v4 }
 0x1d1   : > { %v1107_v10 = vmax.f32 %v865_v53, 0.0  ;;  %v1106_v24 = vmax.f32 %v1041_v7, 0.0 }
 0x1d3   : > { %v3066_v13 = vpack.c.bf16 %v1107_v10, %v1105_v3 }
 0x1d4   : > { %v953_v57 = vpop.f32.mrf.mxu2  ;;  %v1351_v18 = vpop.f32.mrf.mxu0 }
 0x1d5   : > { %v954_v14 = vadd.f32 %v953_v57, %v2876_v27  ;;  %v1042_v16 = vpop.f32.mrf.mxu3  ;;  %v1352_v58 = vadd.f32 %v1351_v18, %v3063_v44  ;;  %v1440_v17 = vpop.f32.mrf.mxu1 }
 0x1d7   : > { %v1043_v22 = vadd.f32 %v1042_v16, %v954_v14  ;;  %v1441_v23 = vadd.f32 %v1440_v17, %v1352_v58  ;;  %1390 = vmatmul.bf16.gmra.mxu0 %v2976_v8 }
 0x1d8   : > { %1479 = vmatmul.bf16.gmra.mxu1 %v2984_v20 }
 0x1d9   : > { %v1108_v26 = vmax.f32 %v1043_v22, 0.0  ;;  %1568 = vmatmul.bf16.gmra.mxu2 %v2976_v8  ;;  %1698 = vst [vmem:[%s3075_s16] sm:$0xff] %v1441_v23 }
 0x1da   : > { %1657 = vmatmul.bf16.gmra.mxu3 %v2984_v20 }
 0x1db   : > { %v3079_v27 = vpack.c.bf16 %v1108_v26, %v1106_v24 }
 0x1dc   : > { %v1529_v31 = vpop.f32.mrf.mxu2  ;;  %v1353_v34 = vpop.f32.mrf.mxu0 }
 0x1dd   : > { %v1530_v48 = vadd.f32 %v1529_v31, %v3073_v28  ;;  %v1618_v33 = vpop.f32.mrf.mxu3  ;;  %v1354_v8 = vadd.f32 %v1353_v34, %v3063_v44  ;;  %v1442_v35 = vpop.f32.mrf.mxu1 }
 0x1df   : > { %v1619_v36 = vadd.f32 %v1618_v33, %v1530_v48  ;;  %v1443_v21 = vadd.f32 %v1442_v35, %v1354_v8 }
 0x1e1   : > { %1699 = vst [vmem:[%s3075_s16 + $0x8] sm:$0xff] %v1619_v36 }
 0x1e2   : > { %1700 = vst [vmem:[%s3075_s16 + $0x10] sm:$0xff] %v1443_v21 }
 0x1e4   : > { %v1531_v38 = vpop.f32.mrf.mxu2  ;;  %v1356_v41 = vpop.f32.mrf.mxu0 }
 0x1e5   : > { %v1532_v40 = vadd.f32 %v1531_v38, %v3073_v28  ;;  %v1620_v20 = vpop.f32.mrf.mxu3  ;;  %v1357_v42 = vadd.f32 %v1356_v41, %v3063_v44  ;;  %v1445_v43 = vpop.f32.mrf.mxu1 }
 0x1e7   : > { %v1621_v46 = vadd.f32 %v1620_v20, %v1532_v40  ;;  %v1446_v15 = vadd.f32 %v1445_v43, %v1357_v42  ;;  %1395 = vmatmul.bf16.gmra.mxu0 %v2988_v37 }
 0x1e8   : > { %1484 = vmatmul.bf16.gmra.mxu1 %v2996_v49 }
 0x1e9   : > { %1701 = vst [vmem:[%s3075_s16 + $0x18] sm:$0xff] %v1621_v46  ;;  %1573 = vmatmul.bf16.gmra.mxu2 %v2988_v37 }
 0x1ea   : > { %1702 = vst [vmem:[%s3075_s16 + $0x20] sm:$0xff] %v1446_v15  ;;  %1662 = vmatmul.bf16.gmra.mxu3 %v2996_v49 }
 0x1ec   : > { %v1534_v30 = vpop.f32.mrf.mxu2  ;;  %v1358_v52 = vpop.f32.mrf.mxu0 }
 0x1ed   : > { %v1535_v50 = vadd.f32 %v1534_v30, %v3073_v28  ;;  %v1623_v51 = vpop.f32.mrf.mxu3  ;;  %v1359_v54 = vadd.f32 %v1358_v52, %v3063_v44  ;;  %v1447_v55 = vpop.f32.mrf.mxu1 }
 0x1ef   : > { %v1624_v12 = vadd.f32 %v1623_v51, %v1535_v50  ;;  %v1448_v25 = vadd.f32 %v1447_v55, %v1359_v54 }
 0x1f1   : > { %1703 = vst [vmem:[%s3075_s16 + $0x28] sm:$0xff] %v1624_v12 }
 0x1f2   : > { %1704 = vst [vmem:[%s3075_s16 + $0x30] sm:$0xff] %v1448_v25 }
 0x1f4   : > { %v1536_v59 = vpop.f32.mrf.mxu2  ;;  %v1361_v62 = vpop.f32.mrf.mxu0 }
 0x1f5   : > { %v1537_v37 = vadd.f32 %v1536_v59, %v3073_v28  ;;  %v1625_v60 = vpop.f32.mrf.mxu3  ;;  %v1362_v49 = vadd.f32 %v1361_v62, %v3063_v44  ;;  %v1450_v0 = vpop.f32.mrf.mxu1 }
 0x1f7   : > { %v1626_v63 = vadd.f32 %v1625_v60, %v1537_v37  ;;  %v1451_v11 = vadd.f32 %v1450_v0, %v1362_v49  ;;  %1400 = vmatmul.bf16.gmra.mxu0 %v3000_v1 }
 0x1f8   : > { %1489 = vmatmul.bf16.gmra.mxu1 %v3008_v9 }
 0x1f9   : > { %1705 = vst [vmem:[%s3075_s16 + $0x38] sm:$0xff] %v1626_v63  ;;  %1578 = vmatmul.bf16.gmra.mxu2 %v3000_v1 }
 0x1fa   : > { %1706 = vst [vmem:[%s3075_s16 + $0x40] sm:$0xff] %v1451_v11  ;;  %1667 = vmatmul.bf16.gmra.mxu3 %v3008_v9 }
 0x1fc   : > { %v1539_v4 = vpop.f32.mrf.mxu2  ;;  %v1363_v7 = vpop.f32.mrf.mxu0 }
 0x1fd   : > { %v1540_v5 = vadd.f32 %v1539_v4, %v3073_v28  ;;  %v1628_v6 = vpop.f32.mrf.mxu3  ;;  %v1364_v53 = vadd.f32 %v1363_v7, %v3063_v44  ;;  %v1452_v3 = vpop.f32.mrf.mxu1 }
 0x1ff   : > { %v1629_v10 = vadd.f32 %v1628_v6, %v1540_v5  ;;  %v1453_v57 = vadd.f32 %v1452_v3, %v1364_v53 }
 0x201   : > { %1707 = vst [vmem:[%s3075_s16 + $0x48] sm:$0xff] %v1629_v10 }
 0x202   : > { %1708 = vst [vmem:[%s3075_s16 + $0x50] sm:$0xff] %v1453_v57 }
 0x204   : > { %v1541_v14 = vpop.f32.mrf.mxu2  ;;  %v1366_v18 = vpop.f32.mrf.mxu0 }
 0x205   : > { %v1542_v1 = vadd.f32 %v1541_v14, %v3073_v28  ;;  %v1630_v16 = vpop.f32.mrf.mxu3  ;;  %v1367_v9 = vadd.f32 %v1366_v18, %v3063_v44  ;;  %v1455_v45 = vpop.f32.mrf.mxu1 }
 0x207   : > { %v1631_v58 = vadd.f32 %v1630_v16, %v1542_v1  ;;  %v1456_v17 = vadd.f32 %v1455_v45, %v1367_v9  ;;  %1405 = vmatmul.bf16.gmra.mxu0 %v3012_v29 }
 0x208   : > { %1494 = vmatmul.bf16.gmra.mxu1 %v3020_v39 }
 0x209   : > { %1709 = vst [vmem:[%s3075_s16 + $0x58] sm:$0xff] %v1631_v58  ;;  %1583 = vmatmul.bf16.gmra.mxu2 %v3012_v29 }
 0x20a   : > { %1710 = vst [vmem:[%s3075_s16 + $0x60] sm:$0xff] %v1456_v17  ;;  %1672 = vmatmul.bf16.gmra.mxu3 %v3020_v39 }
 0x20c   : > { %v1544_v22 = vpop.f32.mrf.mxu2  ;;  %v1368_v26 = vpop.f32.mrf.mxu0 }
 0x20d   : > { %v1545_v23 = vadd.f32 %v1544_v22, %v3073_v28  ;;  %v1633_v24 = vpop.f32.mrf.mxu3  ;;  %v1369_v31 = vadd.f32 %v1368_v26, %v3063_v44  ;;  %v1457_v48 = vpop.f32.mrf.mxu1 }
 0x20f   : > { %v1634_v33 = vadd.f32 %v1633_v24, %v1545_v23  ;;  %v1458_v34 = vadd.f32 %v1457_v48, %v1369_v31 }
 0x211   : > { %1711 = vst [vmem:[%s3075_s16 + $0x68] sm:$0xff] %v1634_v33 }
 0x212   : > { %1712 = vst [vmem:[%s3075_s16 + $0x70] sm:$0xff] %v1458_v34 }
 0x214   : > { %v1546_v8 = vpop.f32.mrf.mxu2  ;;  %v1371_v36 = vpop.f32.mrf.mxu0 }
 0x215   : > { %v1547_v29 = vadd.f32 %v1546_v8, %v3073_v28  ;;  %v1635_v35 = vpop.f32.mrf.mxu3  ;;  %v1372_v39 = vadd.f32 %v1371_v36, %v3063_v44  ;;  %v1460_v21 = vpop.f32.mrf.mxu1 }
 0x217   : > { %v1636_v38 = vadd.f32 %v1635_v35, %v1547_v29  ;;  %v1461_v40 = vadd.f32 %v1460_v21, %v1372_v39  ;;  %1410 = vmatmul.bf16.gmra.mxu0 %v3024_v56 }
 0x218   : > { %1499 = vmatmul.bf16.gmra.mxu1 %v3032_v2 }
 0x219   : > { %1713 = vst [vmem:[%s3075_s16 + $0x78] sm:$0xff] %v1636_v38  ;;  %1588 = vmatmul.bf16.gmra.mxu2 %v3024_v56 }
 0x21a   : > { %1714 = vst [vmem:[%s3075_s16 + $0x80] sm:$0xff] %v1461_v40  ;;  %1677 = vmatmul.bf16.gmra.mxu3 %v3032_v2 }
 0x21c   : > { %v1549_v20 = vpop.f32.mrf.mxu2  ;;  %v1373_v43 = vpop.f32.mrf.mxu0 }
 0x21d   : > { %v1550_v41 = vadd.f32 %v1549_v20, %v3073_v28  ;;  %v1638_v42 = vpop.f32.mrf.mxu3  ;;  %v1374_v46 = vadd.f32 %v1373_v43, %v3063_v44  ;;  %v1462_v15 = vpop.f32.mrf.mxu1 }
 0x21f   : > { %v1639_v30 = vadd.f32 %v1638_v42, %v1550_v41  ;;  %v1463_v50 = vadd.f32 %v1462_v15, %v1374_v46 }
 0x221   : > { %1715 = vst [vmem:[%s3075_s16 + $0x88] sm:$0xff] %v1639_v30 }
 0x222   : > { %1716 = vst [vmem:[%s3075_s16 + $0x90] sm:$0xff] %v1463_v50 }
 0x224   : > { %v1551_v51 = vpop.f32.mrf.mxu2  ;;  %v1376_v54 = vpop.f32.mrf.mxu0 }
 0x225   : > { %v1552_v56 = vadd.f32 %v1551_v51, %v3073_v28  ;;  %v1640_v52 = vpop.f32.mrf.mxu3  ;;  %v1377_v2 = vadd.f32 %v1376_v54, %v3063_v44  ;;  %v1465_v55 = vpop.f32.mrf.mxu1 }
 0x227   : > { %v1641_v12 = vadd.f32 %v1640_v52, %v1552_v56  ;;  %v1466_v25 = vadd.f32 %v1465_v55, %v1377_v2  ;;  %1415 = vmatmul.bf16.gmra.mxu0 %v3036_v19 }
 0x228   : > { %1504 = vmatmul.bf16.gmra.mxu1 %v3044_v32 }
 0x229   : > { %1717 = vst [vmem:[%s3075_s16 + $0x98] sm:$0xff] %v1641_v12  ;;  %1593 = vmatmul.bf16.gmra.mxu2 %v3036_v19 }
 0x22a   : > { %1718 = vst [vmem:[%s3075_s16 + $0xa0] sm:$0xff] %v1466_v25  ;;  %1682 = vmatmul.bf16.gmra.mxu3 %v3044_v32 }
 0x22c   : > { %v1554_v59 = vpop.f32.mrf.mxu2  ;;  %v1378_v62 = vpop.f32.mrf.mxu0 }
 0x22d   : > { %v1555_v37 = vadd.f32 %v1554_v59, %v3073_v28  ;;  %v1643_v60 = vpop.f32.mrf.mxu3  ;;  %v1379_v49 = vadd.f32 %v1378_v62, %v3063_v44  ;;  %v1467_v0 = vpop.f32.mrf.mxu1 }
 0x22f   : > { %v1644_v63 = vadd.f32 %v1643_v60, %v1555_v37  ;;  %v1468_v11 = vadd.f32 %v1467_v0, %v1379_v49 }
 0x231   : > { %1719 = vst [vmem:[%s3075_s16 + $0xa8] sm:$0xff] %v1644_v63 }
 0x232   : > { %1720 = vst [vmem:[%s3075_s16 + $0xb0] sm:$0xff] %v1468_v11 }
 0x234   : > { %v1556_v4 = vpop.f32.mrf.mxu2  ;;  %v1381_v6 = vpop.f32.mrf.mxu0 }
 0x235   : > { %v1557_v19 = vadd.f32 %v1556_v4, %v3073_v28  ;;  %v1645_v5 = vpop.f32.mrf.mxu3  ;;  %v1382_v32 = vadd.f32 %v1381_v6, %v3063_v44  ;;  %v1470_v7 = vpop.f32.mrf.mxu1 }
 0x237   : > { %v1646_v53 = vadd.f32 %v1645_v5, %v1557_v19  ;;  %v1471_v3 = vadd.f32 %v1470_v7, %v1382_v32  ;;  %1420 = vmatmul.bf16.gmra.mxu0 %v3048_v47 }
 0x238   : > { %1509 = vmatmul.bf16.gmra.mxu1 %v3059_v61 }
 0x239   : > { %1721 = vst [vmem:[%s3075_s16 + $0xb8] sm:$0xff] %v1646_v53  ;;  %1598 = vmatmul.bf16.gmra.mxu2 %v3048_v47 }
 0x23a   : > { %1722 = vst [vmem:[%s3075_s16 + $0xc0] sm:$0xff] %v1471_v3  ;;  %1687 = vmatmul.bf16.gmra.mxu3 %v3059_v61 }
 0x23c   : > { %v1559_v10 = vpop.f32.mrf.mxu2  ;;  %v1383_v1 = vpop.f32.mrf.mxu0 }
 0x23d   : > { %v1560_v57 = vadd.f32 %v1559_v10, %v3073_v28  ;;  %v1648_v14 = vpop.f32.mrf.mxu3  ;;  %v1384_v16 = vadd.f32 %v1383_v1, %v3063_v44  ;;  %v1472_v18 = vpop.f32.mrf.mxu1 }
 0x23f   : > { %v1649_v9 = vadd.f32 %v1648_v14, %v1560_v57  ;;  %v1473_v45 = vadd.f32 %v1472_v18, %v1384_v16 }
 0x241   : > { %1723 = vst [vmem:[%s3075_s16 + $0xc8] sm:$0xff] %v1649_v9 }
 0x242   : > { %1724 = vst [vmem:[%s3075_s16 + $0xd0] sm:$0xff] %v1473_v45 }
 0x244   : > { %v1561_v58 = vpop.f32.mrf.mxu2  ;;  %v1386_v22 = vpop.f32.mrf.mxu0 }
 0x245   : > { %v1562_v47 = vadd.f32 %v1561_v58, %v3073_v28  ;;  %v1650_v17 = vpop.f32.mrf.mxu3  ;;  %v1387_v61 = vadd.f32 %v1386_v22, %v3063_v44  ;;  %v1475_v23 = vpop.f32.mrf.mxu1 }
 0x247   : > { %v1651_v24 = vadd.f32 %v1650_v17, %v1562_v47  ;;  %v1476_v26 = vadd.f32 %v1475_v23, %v1387_v61  ;;  %1425 = vmatmul.bf16.gmra.mxu0 %v3066_v13 }
 0x248   : > { %1514 = vmatmul.bf16.gmra.mxu1 %v3079_v27 }
 0x249   : > { %1725 = vst [vmem:[%s3075_s16 + $0xd8] sm:$0xff] %v1651_v24  ;;  %1603 = vmatmul.bf16.gmra.mxu2 %v3066_v13 }
 0x24a   : > { %1726 = vst [vmem:[%s3075_s16 + $0xe0] sm:$0xff] %v1476_v26  ;;  %1692 = vmatmul.bf16.gmra.mxu3 %v3079_v27 }
 0x24c   : > { %v1564_v31 = vpop.f32.mrf.mxu2  ;;  %v1388_v34 = vpop.f32.mrf.mxu0 }
 0x24d   : > { %v1565_v48 = vadd.f32 %v1564_v31, %v3073_v28  ;;  %v1653_v33 = vpop.f32.mrf.mxu3  ;;  %v1389_v8 = vadd.f32 %v1388_v34, %v3063_v44  ;;  %v1477_v29 = vpop.f32.mrf.mxu1 }
 0x24f   : > { %v1654_v35 = vadd.f32 %v1653_v33, %v1565_v48  ;;  %v1478_v36 = vadd.f32 %v1477_v29, %v1389_v8 }
 0x251   : > { %1727 = vst [vmem:[%s3075_s16 + $0xe8] sm:$0xff] %v1654_v35 }
 0x252   : > { %1728 = vst [vmem:[%s3075_s16 + $0xf0] sm:$0xff] %v1478_v36 }
 0x254   : > { %v1566_v39 = vpop.f32.mrf.mxu2  ;;  %v1391_v27 = vpop.f32.mrf.mxu0 }
 0x255   : > { %v1567_v13 = vadd.f32 %v1566_v39, %v3073_v28  ;;  %v1655_v21 = vpop.f32.mrf.mxu3  ;;  %v1392_v38 = vadd.f32 %v1391_v27, %v3063_v44  ;;  %v1480_v40 = vpop.f32.mrf.mxu1 }
 0x257   : > { %v1656_v20 = vadd.f32 %v1655_v21, %v1567_v13  ;;  %v1481_v41 = vadd.f32 %v1480_v40, %v1392_v38 }
 0x259   : > { %1729 = vst [vmem:[%s3075_s16 + $0xf8] sm:$0xff] %v1656_v20 }
 0x25a   : > { %1730 = vst [vmem:[%s3075_s16 + $0x100] sm:$0xff] %v1481_v41 }
 0x25c   : > { %v1569_v42 = vpop.f32.mrf.mxu2  ;;  %v1393_v15 = vpop.f32.mrf.mxu0 }
 0x25d   : > { %v1570_v43 = vadd.f32 %v1569_v42, %v3073_v28  ;;  %v1658_v46 = vpop.f32.mrf.mxu3  ;;  %v1394_v30 = vadd.f32 %v1393_v15, %v3063_v44  ;;  %v1482_v50 = vpop.f32.mrf.mxu1 }
 0x25f   : > { %v1659_v51 = vadd.f32 %v1658_v46, %v1570_v43  ;;  %v1483_v56 = vadd.f32 %v1482_v50, %v1394_v30 }
 0x261   : > { %1731 = vst [vmem:[%s3075_s16 + $0x108] sm:$0xff] %v1659_v51 }
 0x262   : > { %1732 = vst [vmem:[%s3075_s16 + $0x110] sm:$0xff] %v1483_v56 }
 0x264   : > { %v1571_v52 = vpop.f32.mrf.mxu2  ;;  %v1396_v55 = vpop.f32.mrf.mxu0 }
 0x265   : > { %v1572_v54 = vadd.f32 %v1571_v52, %v3073_v28  ;;  %v1660_v2 = vpop.f32.mrf.mxu3  ;;  %v1397_v12 = vadd.f32 %v1396_v55, %v3063_v44  ;;  %v1485_v25 = vpop.f32.mrf.mxu1 }
 0x267   : > { %v1661_v59 = vadd.f32 %v1660_v2, %v1572_v54  ;;  %v1486_v37 = vadd.f32 %v1485_v25, %v1397_v12 }
 0x269   : > { %1733 = vst [vmem:[%s3075_s16 + $0x118] sm:$0xff] %v1661_v59 }
 0x26a   : > { %1734 = vst [vmem:[%s3075_s16 + $0x120] sm:$0xff] %v1486_v37 }
 0x26c   : > { %v1574_v60 = vpop.f32.mrf.mxu2  ;;  %v1398_v0 = vpop.f32.mrf.mxu0 }
 0x26d   : > { %v1575_v62 = vadd.f32 %v1574_v60, %v3073_v28  ;;  %v1663_v49 = vpop.f32.mrf.mxu3  ;;  %v1399_v63 = vadd.f32 %v1398_v0, %v3063_v44  ;;  %v1487_v11 = vpop.f32.mrf.mxu1 }
 0x26f   : > { %v1664_v4 = vadd.f32 %v1663_v49, %v1575_v62  ;;  %v1488_v19 = vadd.f32 %v1487_v11, %v1399_v63 }
 0x271   : > { %1735 = vst [vmem:[%s3075_s16 + $0x128] sm:$0xff] %v1664_v4 }
 0x272   : > { %1736 = vst [vmem:[%s3075_s16 + $0x130] sm:$0xff] %v1488_v19 }
 0x274   : > { %v1576_v5 = vpop.f32.mrf.mxu2  ;;  %v1401_v7 = vpop.f32.mrf.mxu0 }
 0x275   : > { %v1577_v6 = vadd.f32 %v1576_v5, %v3073_v28  ;;  %v1665_v32 = vpop.f32.mrf.mxu3  ;;  %v1402_v53 = vadd.f32 %v1401_v7, %v3063_v44  ;;  %v1490_v3 = vpop.f32.mrf.mxu1 }
 0x277   : > { %v1666_v10 = vadd.f32 %v1665_v32, %v1577_v6  ;;  %v1491_v57 = vadd.f32 %v1490_v3, %v1402_v53 }
 0x279   : > { %1737 = vst [vmem:[%s3075_s16 + $0x138] sm:$0xff] %v1666_v10 }
 0x27a   : > { %1738 = vst [vmem:[%s3075_s16 + $0x140] sm:$0xff] %v1491_v57 }
 0x27c   : > { %v1579_v14 = vpop.f32.mrf.mxu2  ;;  %v1403_v18 = vpop.f32.mrf.mxu0 }
 0x27d   : > { %v1580_v1 = vadd.f32 %v1579_v14, %v3073_v28  ;;  %v1668_v16 = vpop.f32.mrf.mxu3  ;;  %v1404_v9 = vadd.f32 %v1403_v18, %v3063_v44  ;;  %v1492_v45 = vpop.f32.mrf.mxu1 }
 0x27f   : > { %v1669_v58 = vadd.f32 %v1668_v16, %v1580_v1  ;;  %v1493_v47 = vadd.f32 %v1492_v45, %v1404_v9 }
 0x281   : > { %1739 = vst [vmem:[%s3075_s16 + $0x148] sm:$0xff] %v1669_v58 }
 0x282   : > { %1740 = vst [vmem:[%s3075_s16 + $0x150] sm:$0xff] %v1493_v47 }
 0x284   : > { %v1581_v17 = vpop.f32.mrf.mxu2  ;;  %v1406_v23 = vpop.f32.mrf.mxu0 }
 0x285   : > { %v1582_v22 = vadd.f32 %v1581_v17, %v3073_v28  ;;  %v1670_v61 = vpop.f32.mrf.mxu3  ;;  %v1407_v24 = vadd.f32 %v1406_v23, %v3063_v44  ;;  %v1495_v26 = vpop.f32.mrf.mxu1 }
 0x287   : > { %v1671_v31 = vadd.f32 %v1670_v61, %v1582_v22  ;;  %v1496_v48 = vadd.f32 %v1495_v26, %v1407_v24 }
 0x289   : > { %1741 = vst [vmem:[%s3075_s16 + $0x158] sm:$0xff] %v1671_v31 }
 0x28a   : > { %1742 = vst [vmem:[%s3075_s16 + $0x160] sm:$0xff] %v1496_v48 }
 0x28c   : > { %v1584_v33 = vpop.f32.mrf.mxu2  ;;  %v1408_v29 = vpop.f32.mrf.mxu0 }
 0x28d   : > { %v1585_v34 = vadd.f32 %v1584_v33, %v3073_v28  ;;  %v1673_v8 = vpop.f32.mrf.mxu3  ;;  %v1409_v35 = vadd.f32 %v1408_v29, %v3063_v44  ;;  %v1497_v36 = vpop.f32.mrf.mxu1 }
 0x28f   : > { %v1674_v39 = vadd.f32 %v1673_v8, %v1585_v34  ;;  %v1498_v13 = vadd.f32 %v1497_v36, %v1409_v35 }
 0x291   : > { %1743 = vst [vmem:[%s3075_s16 + $0x168] sm:$0xff] %v1674_v39 }
 0x292   : > { %1744 = vst [vmem:[%s3075_s16 + $0x170] sm:$0xff] %v1498_v13 }
 0x294   : > { %v1586_v21 = vpop.f32.mrf.mxu2  ;;  %v1411_v40 = vpop.f32.mrf.mxu0 }
 0x295   : > { %v1587_v27 = vadd.f32 %v1586_v21, %v3073_v28  ;;  %v1675_v38 = vpop.f32.mrf.mxu3  ;;  %v1412_v20 = vadd.f32 %v1411_v40, %v3063_v44  ;;  %v1500_v41 = vpop.f32.mrf.mxu1 }
 0x297   : > { %v1676_v42 = vadd.f32 %v1675_v38, %v1587_v27  ;;  %v1501_v43 = vadd.f32 %v1500_v41, %v1412_v20 }
 0x299   : > { %1745 = vst [vmem:[%s3075_s16 + $0x178] sm:$0xff] %v1676_v42 }
 0x29a   : > { %1746 = vst [vmem:[%s3075_s16 + $0x180] sm:$0xff] %v1501_v43 }
 0x29c   : > { %v1589_v46 = vpop.f32.mrf.mxu2  ;;  %v1413_v50 = vpop.f32.mrf.mxu0 }
 0x29d   : > { %v1590_v15 = vadd.f32 %v1589_v46, %v3073_v28  ;;  %v1678_v30 = vpop.f32.mrf.mxu3  ;;  %v1414_v51 = vadd.f32 %v1413_v50, %v3063_v44  ;;  %v1502_v56 = vpop.f32.mrf.mxu1 }
 0x29f   : > { %v1679_v52 = vadd.f32 %v1678_v30, %v1590_v15  ;;  %v1503_v54 = vadd.f32 %v1502_v56, %v1414_v51 }
 0x2a1   : > { %1747 = vst [vmem:[%s3075_s16 + $0x188] sm:$0xff] %v1679_v52 }
 0x2a2   : > { %1748 = vst [vmem:[%s3075_s16 + $0x190] sm:$0xff] %v1503_v54 }
 0x2a4   : > { %v1591_v2 = vpop.f32.mrf.mxu2  ;;  %v1416_v25 = vpop.f32.mrf.mxu0 }
 0x2a5   : > { %v1592_v55 = vadd.f32 %v1591_v2, %v3073_v28  ;;  %v1680_v12 = vpop.f32.mrf.mxu3  ;;  %v1417_v59 = vadd.f32 %v1416_v25, %v3063_v44  ;;  %v1505_v37 = vpop.f32.mrf.mxu1 }
 0x2a7   : > { %v1681_v60 = vadd.f32 %v1680_v12, %v1592_v55  ;;  %v1506_v62 = vadd.f32 %v1505_v37, %v1417_v59 }
 0x2a9   : > { %1749 = vst [vmem:[%s3075_s16 + $0x198] sm:$0xff] %v1681_v60 }
 0x2aa   : > { %1750 = vst [vmem:[%s3075_s16 + $0x1a0] sm:$0xff] %v1506_v62 }
 0x2ac   : > { %v1594_v49 = vpop.f32.mrf.mxu2  ;;  %v1418_v11 = vpop.f32.mrf.mxu0 }
 0x2ad   : > { %v1595_v0 = vadd.f32 %v1594_v49, %v3073_v28  ;;  %v1683_v63 = vpop.f32.mrf.mxu3  ;;  %v1419_v4 = vadd.f32 %v1418_v11, %v3063_v44  ;;  %v1507_v19 = vpop.f32.mrf.mxu1 }
 0x2af   : > { %v1684_v5 = vadd.f32 %v1683_v63, %v1595_v0  ;;  %v1508_v6 = vadd.f32 %v1507_v19, %v1419_v4 }
 0x2b1   : > { %1751 = vst [vmem:[%s3075_s16 + $0x1a8] sm:$0xff] %v1684_v5 }
 0x2b2   : > { %1752 = vst [vmem:[%s3075_s16 + $0x1b0] sm:$0xff] %v1508_v6 }
 0x2b4   : > { %v1596_v32 = vpop.f32.mrf.mxu2  ;;  %v1421_v3 = vpop.f32.mrf.mxu0 }
 0x2b5   : > { %v1597_v7 = vadd.f32 %v1596_v32, %v3073_v28  ;;  %v1685_v53 = vpop.f32.mrf.mxu3  ;;  %v1422_v10 = vadd.f32 %v1421_v3, %v3063_v44  ;;  %v1510_v57 = vpop.f32.mrf.mxu1 }
 0x2b7   : > { %v1686_v14 = vadd.f32 %v1685_v53, %v1597_v7  ;;  %v1511_v1 = vadd.f32 %v1510_v57, %v1422_v10 }
 0x2b9   : > { %1753 = vst [vmem:[%s3075_s16 + $0x1b8] sm:$0xff] %v1686_v14 }
 0x2ba   : > { %1754 = vst [vmem:[%s3075_s16 + $0x1c0] sm:$0xff] %v1511_v1 }
 0x2bc   : > { %v1599_v16 = vpop.f32.mrf.mxu2  ;;  %v1423_v45 = vpop.f32.mrf.mxu0 }
 0x2bd   : > { %v1600_v18 = vadd.f32 %v1599_v16, %v3073_v28  ;;  %v1688_v9 = vpop.f32.mrf.mxu3  ;;  %v1424_v58 = vadd.f32 %v1423_v45, %v3063_v44  ;;  %v1512_v47 = vpop.f32.mrf.mxu1 }
 0x2bf   : > { %v1689_v17 = vadd.f32 %v1688_v9, %v1600_v18  ;;  %v1513_v22 = vadd.f32 %v1512_v47, %v1424_v58 }
 0x2c1   : > { %1755 = vst [vmem:[%s3075_s16 + $0x1c8] sm:$0xff] %v1689_v17 }
 0x2c2   : > { %1756 = vst [vmem:[%s3075_s16 + $0x1d0] sm:$0xff] %v1513_v22 }
 0x2c4   : > { %v1601_v61 = vpop.f32.mrf.mxu2  ;;  %v1426_v26 = vpop.f32.mrf.mxu0 }
 0x2c5   : > { %v1602_v23 = vadd.f32 %v1601_v61, %v3073_v28  ;;  %v1690_v24 = vpop.f32.mrf.mxu3  ;;  %v1427_v31 = vadd.f32 %v1426_v26, %v3063_v44  ;;  %v1515_v48 = vpop.f32.mrf.mxu1 }
 0x2c7   : > { %v1691_v33 = vadd.f32 %v1690_v24, %v1602_v23  ;;  %v1516_v34 = vadd.f32 %v1515_v48, %v1427_v31 }
 0x2c9   : > { %1757 = vst [vmem:[%s3075_s16 + $0x1d8] sm:$0xff] %v1691_v33 }
 0x2ca   : > { %1758 = vst [vmem:[%s3075_s16 + $0x1e0] sm:$0xff] %v1516_v34 }
 0x2cc   : > { %v1604_v8 = vpop.f32.mrf.mxu2  ;;  %v1428_v36 = vpop.f32.mrf.mxu0 }
 0x2cd   : > { %v1605_v29 = vadd.f32 %v1604_v8, %v3073_v28  ;;  %v1693_v35 = vpop.f32.mrf.mxu3  ;;  %v1429_v39 = vadd.f32 %v1428_v36, %v3063_v44  ;;  %v1517_v21 = vpop.f32.mrf.mxu1 }
 0x2cf   : > { %v1694_v13 = vadd.f32 %v1693_v35, %v1605_v29  ;;  %v1518_v27 = vadd.f32 %v1517_v21, %v1429_v39 }
 0x2d1   : > { %1759 = vst [vmem:[%s3075_s16 + $0x1e8] sm:$0xff] %v1694_v13 }
 0x2d2   : > { %1760 = vst [vmem:[%s3075_s16 + $0x1f0] sm:$0xff] %v1518_v27 }
 0x2d4   : > { %v1606_v38 = vpop.f32.mrf.mxu2 }
 0x2d5   : > { %v1607_v40 = vadd.f32 %v1606_v38, %v3073_v28  ;;  %v1695_v20 = vpop.f32.mrf.mxu3 }
 0x2d7   : > { %v1696_v44 = vadd.f32 %v1695_v20, %v1607_v40 }
 0x2d9   : > { %1761 = vst [vmem:[%s3075_s16 + $0x1f8] sm:$0xff] %v1696_v44 }
 0x2da   : > { %2615 = shalt.err (!%p2612_p10)
}
 0x2db   : > { %s2669_s17 = smov 256   ;;  %s2670_s12 = smov 16  }
 0x2dc   : > { %2401 = dma.vmem_to_hbm [thread:$0]  (%p2789_p3), %s1777_s10, 8192, %s1779_s14, %s1763_s22, %s2669_s17, %s2669_s17, %s2670_s12  }
 0x2dd PF: > { %s1793_s16 = sand.u32 1, %s2650_s18   ;;  %p3283_p12 = scmp.ge.s32.totalorder %s2662_s21, 2 }
 0x2de   : > { %s1794_s23 = scalar_lea.sflag [#allocation4], %s1793_s16 }
 0x2df   : > { %p2418_p13 = pnand %p3283_p12, %p2736_p6 }
 0x2e1   : > { %p2419_p0 = pneg %p2418_p13 }
 0x2e3   : > { %2645 = dma.done.wait (%p2419_p0), %s1794_s23, 8192  }
 0x2e4   : > { %2647 = vsyncadd (%p2419_p0), %s1794_s23, 4294959104  ;;  %p20_p5 = scmp.ge.s32.totalorder %s2771_s27, 4   ;;  %s3284_s18 = smov %s2654_s19 }
 0x2e5   : > { %s3285_s19 = smov %s2658_s20  ;;  %s3286_s20 = smov %s2785_s6 }
 0x2e6   : > { %s3287_s21 = smov %s2771_s27  ;;  %22 = sbr.rel (!%p20_p5) target bundleno = 7 (0x7), region = 97 }
 0x2eb   :  { %1800 = vsyncpa [#allocation3], 1 }
 0x2ec   :  { %1802 = vsyncpa [#allocation3 + $0x1], 1 }
 0x2ed   :  { %1803 = vsyncpa [#allocation6], 1 }
 0x2ee   :  { %1804 = vsyncpa [#allocation9], 1 }
 0x2ef   :  { %1805 = vsyncpa [#allocation4], 1 }
 0x2f0   :  { %1807 = vsyncpa [#allocation4 + $0x1], 1 }

// kernel: tpu_custom_call.1
= control target key start
LH: loop header
LB: loop body
LE: loop exit
PB: predicated region body
PF: predicated region fallthrough
CT: control target
= control target key end

     0   :  { %10 = vsyncpa [#allocation3], 0  ;;  %s3269_s0 = inlined_call_operand.hbm [shape: bf16[512,256], index: 0, kind: input, shape index: {}]   ;;  %s3270_s1 = inlined_call_operand.hbm [shape: bf16[256,256], index: 1, kind: input, shape index: {}]   ;;  %s3271_s2 = inlined_call_operand.hbm [shape: bf16[1,256], index: 2, kind: input, shape index: {}]   ;;  %s3272_s3 = inlined_call_operand.hbm [shape: bf16[256,256], index: 3, kind: input, shape index: {}]   ;;  %s3273_s4 = inlined_call_operand.vmem [shape: bf16[1,256], index: 4, kind: input, shape index: {}]   ;;  %s3274_s5 = inlined_call_operand.hbm [shape: f32[512,256], index: 5, kind: output, shape index: {}]  }
   0x1   :  { %12 = vsyncpa [#allocation3 + $0x1], 0 }
   0x2   :  { %13 = vsyncpa [#allocation6], 0 }
   0x3   :  { %14 = vsyncpa [#allocation9], 0 }
   0x4   :  { %15 = vsyncpa [#allocation4], 0 }
   0x5   :  { %17 = vsyncpa [#allocation4 + $0x1], 0  ;;  %s2701_s18 = smov 0   ;;  %s2703_s19 = smov 0  }
   0x6   :  { %s2705_s20 = smov 0   ;;  %s2707_s21 = smov 0  }
   0x7 LB: > { %s2722_s22 = sadd.s32 4294967295, %s2662_s21   ;;  %s1881_s23 = sadd.s32 4294967294, %s2662_s21   ;;  %s2662_s21 = sphi %s2707_s21, %s3287_s21   ;;  %s2658_s20 = sphi %s2705_s20, %s3286_s20   ;;  %s2654_s19 = sphi %s2703_s19, %s3285_s19   ;;  %s2650_s18 = sphi %s2701_s18, %s3284_s18  }
   0x8   : > { %p43_p0 = scmp.ne.s32.totalorder %s2654_s19, %s2650_s18  ;;  %p44_p1 = scmp.eq.s32.totalorder %s2722_s22, 0 }
   0x9   : > { %p151_p2 = scmp.eq.s32.totalorder %s2722_s22, 1  ;;  %p157_p3 = scmp.eq.s32.totalorder %s1881_s23, 1 }
   0xa   : > { %p2731_p4 = por %p44_p1, %p43_p0  ;;  %p1882_p5 = scmp.ge.s32.totalorder %s2662_s21, 1 }
   0xb   : > { %p2736_p6 = por %p157_p3, %p43_p0  ;;  %p164_p7 = scmp.lt.s32.totalorder %s2662_s21, 3 }
   0xc   : > { %s175_s28 = sshll.u32 %s3270_s1, 4  ;;  %s2664_s30 = smov [#allocation5]   ;;  %s176_s28 = int_to_ptr.hbm [resolvable:$true] %s175_s28 }
   0xd   : > { %p2744_p8 = pnand %p1882_p5, %p164_p7  ;;  %s177_s6 = sshll.u32 %s2664_s30, 4  ;;  %s178_s6 = int_to_ptr.vmem [resolvable:$true] %s177_s6 }
   0xe   : > { %s190_s10 = sshll.u32 %s3271_s2, 4  ;;  %s3275_s11 = smov 128   ;;  %s191_s10 = int_to_ptr.hbm [resolvable:$true] %s190_s10 }
   0xf   : > { %p2403_p9 = pneg %p2744_p8  ;;  %s2666_s12 = smov 8  }
  0x10   : > { %s2667_s13 = smov [#allocation7]   ;;  %s201_s17 = sshll.u32 %s3272_s3, 4  ;;  %s202_s17 = int_to_ptr.hbm [resolvable:$true] %s201_s17 }
  0x11   : > { %p2752_p10 = pnand %p2403_p9, %p44_p1  ;;  %s192_s14 = sshll.u32 %s2667_s13, 4  ;;  %s193_s14 = int_to_ptr.vmem [resolvable:$true] %s192_s14 }
  0x12   : > { %s2668_s23 = smov [#allocation8]   ;;  %s2771_s27 = sadd.s32 1, %s2662_s21  }
  0x13   : > { %2406 = dma.hbm_to_vmem [thread:$0]  (!%p2752_p10), %s176_s28, 4096, %s178_s6, [#allocation6], %s3275_s11, %s3275_s11, %s2666_s12  }
  0x14   : > { %2409 = dma.hbm_to_vmem [thread:$0]  (!%p2752_p10), %s191_s10, 32, %s193_s14, [#allocation6]  }
  0x15   : > { %s203_s26 = sshll.u32 %s2668_s23, 4  ;;  %s27_s28 = ssub.s32 %s2662_s21, %s2771_s27  ;;  %s204_s26 = int_to_ptr.vmem [resolvable:$true] %s203_s26 }
  0x16   : > { %2412 = dma.hbm_to_vmem [thread:$0]  (!%p2752_p10), %s202_s17, 4096, %s204_s26, [#allocation9], %s3275_s11, %s3275_s11, %s2666_s12  }
  0x17   : > { %s30_s30 = sadd.s32 1, %s2658_s20  ;;  %p28_p12 = scmp.eq.s32.totalorder %s27_s28, 0 }
  0x18   : > { %p37_p13 = scmp.ne.s32.totalorder %s2658_s20, %s2654_s19  ;;  %p38_p0 = scmp.eq.s32.totalorder %s2662_s21, 0 }
  0x19   : > { %s2785_s6 = scalar_select %p28_p12, %s2658_s20, %s30_s30  }
  0x1a   : > { %p2789_p3 = por %p151_p2, %p37_p13  ;;  %p2424_p5 = scmp.lt.s32.totalorder %s2662_s21, 2 }
  0x1b   : > { %s220_s9 = sand.u32 1, %s2658_s20   ;;  %s2288_s7 = sshll.u32 %s2662_s21, 8 }
  0x1c   : > { %p39_p7 = por %p38_p0, %p37_p13  ;;  %s1887_s10 = sshll.u32 %s220_s9, 8 }
  0x1d   : > { %s230_s15 = scalar_lea.hbm %s3269_s0, %s2288_s7  ;;  %s224_s17 = scalar_lea.vmem [#allocation2], %s1887_s10 }
  0x1e   : > { %s231_s16 = sshll.u32 %s230_s15, 4  ;;  %s233_s23 = sshll.u32 %s224_s17, 4  ;;  %s232_s16 = int_to_ptr.hbm [resolvable:$true] %s231_s16  ;;  %s234_s23 = int_to_ptr.vmem [resolvable:$true] %s233_s23 }
  0x1f   : > { %p2799_p9 = pnand %p2424_p5, %p39_p7  ;;  %s221_s28 = scalar_lea.sflag [#allocation3], %s220_s9 }
  0x20   : > { %s2558_s30 = sshra.s32 %s232_s16, 4  ;;  %s2565_s10 = scalar_lea.hbm %s3269_s0, 512  ;;  %s2559_s30 = int_to_ptr.hbm [resolvable:$true] %s2558_s30 }
  0x21   : > { %s2560_s11 = scalar_lea.hbm %s2559_s30, 256  ;;  %p2562_p10 = pneg %p2799_p9 }
  0x22   : > { %p2561_p2 = scmp.ne.s32.totalorder %s2559_s30, %s2560_s11  ;;  %p2566_p0 = scmp.lt.s32.totalorder %s2559_s30, %s3269_s0 }
  0x23   : > { %p2567_p5 = scmp.lt.s32.totalorder %s2565_s10, %s2560_s11 }
  0x24   : > { %p2563_p12 = pnand %p2562_p10, %p2561_p2 }
  0x25   : > { %p2568_p7 = por %p2567_p5, %p2566_p0 }
  0x26   : > { %p2564_p13 = pneg %p2563_p12 }
  0x28   : > { %p2569_p11 = pnand %p2568_p7, %p2564_p13 }
  0x2a   : > { %2572 = shalt.err (!%p2569_p11)
}
  0x2b   : > { %s3282_s9 = smov 128   ;;  %245 = sbr.rel (%p2744_p8) target bundleno = 733 (0x2dd), region = 40 }
  0x2c   : > { %2416 = dma.hbm_to_vmem [thread:$0]  (!%p2799_p9), %s232_s16, 4096, %s234_s23, %s221_s28, %s3282_s9, %s3282_s9, %s2666_s12  }
  0x2d   : > { %s2819_s17 = sand.u32 (!%p2744_p8), 1, %s2654_s19  }
  0x2e   : > { %s1892_s30 = sshll.u32 (!%p2744_p8), %s2819_s17, 8  ;;  %s248_s11 = scalar_lea.sflag (!%p2744_p8), [#allocation3], %s2819_s17 }
  0x2f   : > { %s2823_s7 = scalar_lea.vmem (!%p2744_p8), [#allocation2], %s1892_s30 }
  0x30   : > { %2633 = dma.done.wait (%p2731_p4), %s248_s11, 4096  }
  0x31   : > { %2635 = vsyncadd (%p2731_p4), %s248_s11, 4294963200 }
  0x32   : > { %2637 = dma.done.wait (%p44_p1), [#allocation6], 4128  }
  0x33   : > { %2639 = vsyncadd (%p44_p1), [#allocation6], 4294963168 }
  0x34   : > { %2641 = dma.done.wait (%p44_p1), [#allocation9], 4096  }
  0x35   : > { %2643 = vsyncadd (%p44_p1), [#allocation9], 4294963200  ;;  %v2083_v0 = vld [vmem:[#allocation5 + $0x70] sm:$0xf]  ;;  %v2336_v1 = vld [vmem:[#allocation5 + $0x74] sm:$0xf0] }
  0x36   : > { %v2147_v2 = vld [vmem:[#allocation5 + $0xf0] sm:$0xf]  ;;  %v2084_v3 = vor.u32 %v2336_v1, %v2083_v0  ;;  %v2352_v4 = vld [vmem:[#allocation5 + $0xf4] sm:$0xf0]  ;;  %v2335_v5 = vld [vmem:[#allocation5 + $0x74] sm:$0xf] }
  0x37   : > { %v2085_v6 = vld [vmem:[#allocation5 + $0x78] sm:$0xf0]  ;;  %v2148_v7 = vor.u32 %v2352_v4, %v2147_v2  ;;  %v2351_v9 = vld [vmem:[#allocation5 + $0xf4] sm:$0xf]  ;;  %v2075_v11 = vld [vmem:[#allocation5 + $0x60] sm:$0xf] }
  0x38   : > { %v2088_v8 = vor.u32 %v2335_v5, %v2085_v6  ;;  %v2149_v10 = vld [vmem:[#allocation5 + $0xf8] sm:$0xf0]  ;;  %689 = vmatpush.bf16.msra.mxu0 %v2084_v3  ;;  %v2334_v13 = vld [vmem:[#allocation5 + $0x64] sm:$0xf0]  ;;  %v2139_v14 = vld [vmem:[#allocation5 + $0xe0] sm:$0xf] }
  0x39   : > { %v2152_v12 = vor.u32 %v2351_v9, %v2149_v10  ;;  %v2350_v15 = vld [vmem:[#allocation5 + $0xe4] sm:$0xf0]  ;;  %778 = vmatpush.bf16.msra.mxu1 %v2148_v7  ;;  %v2076_v16 = vor.u32 %v2334_v13, %v2075_v11  ;;  %v2333_v18 = vld [vmem:[#allocation5 + $0x64] sm:$0xf]  ;;  %v2077_v19 = vld [vmem:[#allocation5 + $0x68] sm:$0xf0] }
  0x3a   : > { %867 = vmatpush.bf16.msra.mxu2 %v2088_v8  ;;  %v2140_v17 = vor.u32 %v2350_v15, %v2139_v14  ;;  %v2349_v20 = vld [vmem:[#allocation5 + $0xe4] sm:$0xf]  ;;  %v2080_v21 = vor.u32 %v2333_v18, %v2077_v19  ;;  %v2141_v22 = vld [vmem:[#allocation5 + $0xe8] sm:$0xf0]  ;;  %v2067_v23 = vld [vmem:[#allocation5 + $0x50] sm:$0xf] }
  0x3b   : > { %956 = vmatpush.bf16.msra.mxu3 %v2152_v12  ;;  %v2332_v24 = vld [vmem:[#allocation5 + $0x54] sm:$0xf0]  ;;  %v2144_v25 = vor.u32 %v2349_v20, %v2141_v22  ;;  %v2131_v26 = vld [vmem:[#allocation5 + $0xd0] sm:$0xf]  ;;  %v2331_v28 = vld [vmem:[#allocation5 + $0x54] sm:$0xf] }
  0x3c   : > { %v2348_v27 = vld [vmem:[#allocation5 + $0xd4] sm:$0xf0]  ;;  %690 = vmatpush.bf16.msra.mxu0 %v2076_v16  ;;  %v2068_v29 = vor.u32 %v2332_v24, %v2067_v23  ;;  %v2069_v30 = vld [vmem:[#allocation5 + $0x58] sm:$0xf0]  ;;  %v2347_v31 = vld [vmem:[#allocation5 + $0xd4] sm:$0xf] }
  0x3d   : > { %v2133_v32 = vld [vmem:[#allocation5 + $0xd8] sm:$0xf0]  ;;  %779 = vmatpush.bf16.msra.mxu1 %v2140_v17  ;;  %v2132_v33 = vor.u32 %v2348_v27, %v2131_v26  ;;  %v2072_v34 = vor.u32 %v2331_v28, %v2069_v30  ;;  %v2059_v35 = vld [vmem:[#allocation5 + $0x40] sm:$0xf]  ;;  %v2330_v36 = vld [vmem:[#allocation5 + $0x44] sm:$0xf0] }
  0x3e   : > { %868 = vmatpush.bf16.msra.mxu2 %v2080_v21  ;;  %v2123_v37 = vld [vmem:[#allocation5 + $0xc0] sm:$0xf]  ;;  %v2136_v38 = vor.u32 %v2347_v31, %v2133_v32  ;;  %v2346_v39 = vld [vmem:[#allocation5 + $0xc4] sm:$0xf0]  ;;  %v2329_v40 = vld [vmem:[#allocation5 + $0x44] sm:$0xf]  ;;  %v2060_v44 = vor.u32 %v2330_v36, %v2059_v35 }
  0x3f   : > { %957 = vmatpush.bf16.msra.mxu3 %v2144_v25  ;;  %v2061_v41 = vld [vmem:[#allocation5 + $0x48] sm:$0xf0]  ;;  %v2345_v42 = vld [vmem:[#allocation5 + $0xc4] sm:$0xf]  ;;  %v2124_v45 = vor.u32 %v2346_v39, %v2123_v37  ;;  %v2051_v47 = vld [vmem:[#allocation5 + $0x30] sm:$0xf] }
  0x40   : > { %v2125_v43 = vld [vmem:[#allocation5 + $0xc8] sm:$0xf0]  ;;  %691 = vmatpush.bf16.msra.mxu0 %v2068_v29  ;;  %v2064_v46 = vor.u32 %v2329_v40, %v2061_v41  ;;  %v2328_v48 = vld [vmem:[#allocation5 + $0x34] sm:$0xf0]  ;;  %v2115_v49 = vld [vmem:[#allocation5 + $0xb0] sm:$0xf] }
  0x41   : > { %780 = vmatpush.bf16.msra.mxu1 %v2132_v33  ;;  %v2128_v50 = vor.u32 %v2345_v42, %v2125_v43  ;;  %v2344_v51 = vld [vmem:[#allocation5 + $0xb4] sm:$0xf0]  ;;  %v2327_v52 = vld [vmem:[#allocation5 + $0x34] sm:$0xf]  ;;  %v2053_v53 = vld [vmem:[#allocation5 + $0x38] sm:$0xf0]  ;;  %v2052_v56 = vor.u32 %v2328_v48, %v2051_v47 }
  0x42   : > { %869 = vmatpush.bf16.msra.mxu2 %v2072_v34  ;;  %v2343_v54 = vld [vmem:[#allocation5 + $0xb4] sm:$0xf]  ;;  %v2117_v55 = vld [vmem:[#allocation5 + $0xb8] sm:$0xf0]  ;;  %v2116_v57 = vor.u32 %v2344_v51, %v2115_v49  ;;  %v2056_v58 = vor.u32 %v2327_v52, %v2053_v53  ;;  %v2043_v59 = vld [vmem:[#allocation5 + $0x20] sm:$0xf] }
  0x43   : > { %958 = vmatpush.bf16.msra.mxu3 %v2136_v38  ;;  %v2326_v60 = vld [vmem:[#allocation5 + $0x24] sm:$0xf0]  ;;  %v2107_v61 = vld [vmem:[#allocation5 + $0xa0] sm:$0xf]  ;;  %v2120_v62 = vor.u32 %v2343_v54, %v2117_v55  ;;  %v2325_v0 = vld [vmem:[#allocation5 + $0x24] sm:$0xf] }
  0x44   : > { %692 = vmatpush.bf16.msra.mxu0 %v2060_v44  ;;  %v2342_v63 = vld [vmem:[#allocation5 + $0xa4] sm:$0xf0]  ;;  %v2045_v1 = vld [vmem:[#allocation5 + $0x28] sm:$0xf0]  ;;  %v2341_v2 = vld [vmem:[#allocation5 + $0xa4] sm:$0xf]  ;;  %v2044_v4 = vor.u32 %v2326_v60, %v2043_v59 }
  0x45   : > { %781 = vmatpush.bf16.msra.mxu1 %v2124_v45  ;;  %v2109_v3 = vld [vmem:[#allocation5 + $0xa8] sm:$0xf0]  ;;  %v2108_v5 = vor.u32 %v2342_v63, %v2107_v61  ;;  %v2048_v6 = vor.u32 %v2325_v0, %v2045_v1  ;;  %v2035_v7 = vld [vmem:[#allocation5 + $0x10] sm:$0xf]  ;;  %v2324_v8 = vld [vmem:[#allocation5 + $0x14] sm:$0xf0] }
  0x46   : > { %870 = vmatpush.bf16.msra.mxu2 %v2064_v46  ;;  %v2099_v9 = vld [vmem:[#allocation5 + $0x90] sm:$0xf]  ;;  %v2112_v10 = vor.u32 %v2341_v2, %v2109_v3  ;;  %v2340_v11 = vld [vmem:[#allocation5 + $0x94] sm:$0xf0]  ;;  %v2323_v12 = vld [vmem:[#allocation5 + $0x14] sm:$0xf]  ;;  %v2036_v16 = vor.u32 %v2324_v8, %v2035_v7 }
  0x47   : > { %959 = vmatpush.bf16.msra.mxu3 %v2128_v50  ;;  %v2037_v13 = vld [vmem:[#allocation5 + $0x18] sm:$0xf0]  ;;  %v2339_v14 = vld [vmem:[#allocation5 + $0x94] sm:$0xf]  ;;  %v2027_v17 = vld [vmem:[#allocation5] sm:$0xf]  ;;  %v2100_v19 = vor.u32 %v2340_v11, %v2099_v9 }
  0x48   : > { %693 = vmatpush.bf16.msra.mxu0 %v2052_v56  ;;  %v2101_v15 = vld [vmem:[#allocation5 + $0x98] sm:$0xf0]  ;;  %v2322_v18 = vld [vmem:[#allocation5 + $0x4] sm:$0xf0]  ;;  %v2040_v20 = vor.u32 %v2323_v12, %v2037_v13  ;;  %v2091_v21 = vld [vmem:[#allocation5 + $0x80] sm:$0xf] }
  0x49   : > { %782 = vmatpush.bf16.msra.mxu1 %v2116_v57  ;;  %v2338_v22 = vld [vmem:[#allocation5 + $0x84] sm:$0xf0]  ;;  %v2321_v23 = vld [vmem:[#allocation5 + $0x4] sm:$0xf]  ;;  %v2104_v24 = vor.u32 %v2339_v14, %v2101_v15  ;;  %v2029_v25 = vld [vmem:[#allocation5 + $0x8] sm:$0xf0]  ;;  %v2028_v31 = vor.u32 %v2322_v18, %v2027_v17 }
  0x4a   : > { %871 = vmatpush.bf16.msra.mxu2 %v2056_v58  ;;  %v2337_v26 = vld [vmem:[#allocation5 + $0x84] sm:$0xf]  ;;  %v2093_v27 = vld [vmem:[#allocation5 + $0x88] sm:$0xf0]  ;;  %v1899_v28 = vld [vmem:[%s2823_s7] sm:$0xf]  ;;  %v2092_v35 = vor.u32 %v2338_v22, %v2091_v21  ;;  %v2032_v36 = vor.u32 %v2321_v23, %v2029_v25 }
  0x4b   : > { %960 = vmatpush.bf16.msra.mxu3 %v2120_v62  ;;  %v2367_v29 = vld [vmem:[#allocation8 + $0x74] sm:$0xf]  ;;  %v2213_v30 = vld [vmem:[#allocation8 + $0x78] sm:$0xf0]  ;;  %v2290_v32 = vld [vmem:[%s2823_s7 + $0x4] sm:$0xf0]  ;;  %v2096_v39 = vor.u32 %v2337_v26, %v2093_v27 }
  0x4c   : > { %694 = vmatpush.bf16.msra.mxu0 %v2044_v4  ;;  %v2383_v33 = vld [vmem:[#allocation8 + $0xf4] sm:$0xf]  ;;  %v2277_v34 = vld [vmem:[#allocation8 + $0xf8] sm:$0xf0]  ;;  %v2289_v37 = vld [vmem:[%s2823_s7 + $0x4] sm:$0xf]  ;;  %v2216_v40 = vor.u32 %v2367_v29, %v2213_v30  ;;  %v1900_v43 = vor.u32 %v2290_v32, %v1899_v28 }
  0x4d   : > { %783 = vmatpush.bf16.msra.mxu1 %v2108_v5  ;;  %v1901_v38 = vld [vmem:[%s2823_s7 + $0x8] sm:$0xf0]  ;;  %v2211_v41 = vld [vmem:[#allocation8 + $0x70] sm:$0xf]  ;;  %v2368_v42 = vld [vmem:[#allocation8 + $0x74] sm:$0xf0]  ;;  %v2280_v44 = vor.u32 %v2383_v33, %v2277_v34 }
  0x4e   : > { %872 = vmatpush.bf16.msra.mxu2 %v2048_v6  ;;  %v2275_v45 = vld [vmem:[#allocation8 + $0xf0] sm:$0xf]  ;;  %v2384_v46 = vld [vmem:[#allocation8 + $0xf4] sm:$0xf0]  ;;  %v1904_v47 = vor.u32 %v2289_v37, %v1901_v38  ;;  %v2212_v48 = vor.u32 %v2368_v42, %v2211_v41  ;;  %v2365_v50 = vld [vmem:[#allocation8 + $0x64] sm:$0xf] }
  0x4f   : > { %961 = vmatpush.bf16.msra.mxu3 %v2112_v10  ;;  %v2276_v49 = vor.u32 %v2384_v46, %v2275_v45  ;;  %v2205_v51 = vld [vmem:[#allocation8 + $0x68] sm:$0xf0]  ;;  %v2381_v52 = vld [vmem:[#allocation8 + $0xe4] sm:$0xf]  ;;  %v2203_v55 = vld [vmem:[#allocation8 + $0x60] sm:$0xf] }
  0x50   : > { %695 = vmatpush.bf16.msra.mxu0 %v2036_v16  ;;  %v2208_v53 = vor.u32 %v2365_v50, %v2205_v51  ;;  %v2269_v54 = vld [vmem:[#allocation8 + $0xe8] sm:$0xf0]  ;;  %v2366_v56 = vld [vmem:[#allocation8 + $0x64] sm:$0xf0]  ;;  %v2267_v59 = vld [vmem:[#allocation8 + $0xe0] sm:$0xf] }
  0x51   : > { %784 = vmatpush.bf16.msra.mxu1 %v2100_v19  ;;  %v2272_v57 = vor.u32 %v2381_v52, %v2269_v54  ;;  %v2204_v58 = vor.u32 %v2366_v56, %v2203_v55  ;;  %v2382_v60 = vld [vmem:[#allocation8 + $0xe4] sm:$0xf0]  ;;  %v1907_v62 = vld [vmem:[%s2823_s7 + $0x10] sm:$0xf]  ;;  %v2292_v63 = vld [vmem:[%s2823_s7 + $0x14] sm:$0xf0] }
  0x52   : > { %873 = vmatpush.bf16.msra.mxu2 %v2040_v20  ;;  %v2268_v61 = vor.u32 %v2382_v60, %v2267_v59  ;;  %v2291_v0 = vld [vmem:[%s2823_s7 + $0x14] sm:$0xf]  ;;  %v1909_v1 = vld [vmem:[%s2823_s7 + $0x18] sm:$0xf0]  ;;  %v1908_v2 = vor.u32 %v2292_v63, %v1907_v62  ;;  %v1915_v4 = vld [vmem:[%s2823_s7 + $0x20] sm:$0xf] }
  0x53   : > { %962 = vmatpush.bf16.msra.mxu3 %v2104_v24  ;;  %v1912_v3 = vor.u32 %v2291_v0, %v1909_v1  ;;  %v2294_v5 = vld [vmem:[%s2823_s7 + $0x24] sm:$0xf0]  ;;  %v2293_v6 = vld [vmem:[%s2823_s7 + $0x24] sm:$0xf]  ;;  %v1917_v7 = vld [vmem:[%s2823_s7 + $0x28] sm:$0xf0] }
  0x54   : > { %696 = vmatpush.bf16.msra.mxu0 %v2028_v31  ;;  %v1916_v8 = vor.u32 %v2294_v5, %v1915_v4  ;;  %v1920_v9 = vor.u32 %v2293_v6, %v1917_v7  ;;  %v2363_v10 = vld [vmem:[#allocation8 + $0x54] sm:$0xf]  ;;  %v2197_v11 = vld [vmem:[#allocation8 + $0x58] sm:$0xf0]  ;;  %v2195_v15 = vld [vmem:[#allocation8 + $0x50] sm:$0xf] }
  0x55   : > { %785 = vmatpush.bf16.msra.mxu1 %v2092_v35  ;;  %v2379_v12 = vld [vmem:[#allocation8 + $0xd4] sm:$0xf]  ;;  %v2200_v13 = vor.u32 %v2363_v10, %v2197_v11  ;;  %v2261_v14 = vld [vmem:[#allocation8 + $0xd8] sm:$0xf0]  ;;  %v2364_v16 = vld [vmem:[#allocation8 + $0x54] sm:$0xf0] }
  0x56   : > { %874 = vmatpush.bf16.msra.mxu2 %v2032_v36  ;;  %v2264_v17 = vor.u32 %v2379_v12, %v2261_v14  ;;  %v2196_v18 = vor.u32 %v2364_v16, %v2195_v15  ;;  %v2259_v19 = vld [vmem:[#allocation8 + $0xd0] sm:$0xf]  ;;  %v2380_v20 = vld [vmem:[#allocation8 + $0xd4] sm:$0xf0]  ;;  %v1931_v28 = vld [vmem:[%s2823_s7 + $0x40] sm:$0xf] }
  0x57   : > { %963 = vmatpush.bf16.msra.mxu3 %v2096_v39  ;;  %697 = vmatmul.bf16.vlgmr.msra.gmra.mxu0 %v1900_v43  ;;  %v2260_v21 = vor.u32 %v2380_v20, %v2259_v19  ;;  %v1923_v22 = vld [vmem:[%s2823_s7 + $0x30] sm:$0xf]  ;;  %v2296_v23 = vld [vmem:[%s2823_s7 + $0x34] sm:$0xf0]  ;;  %v2295_v24 = vld [vmem:[%s2823_s7 + $0x34] sm:$0xf] }
  0x58   : > { %786 = vmatmul.bf16.vlgmr.msra.gmra.mxu1 %v1904_v47  ;;  %1342 = vmatpush.bf16.msrb.mxu0 %v2212_v48  ;;  %v1925_v25 = vld [vmem:[%s2823_s7 + $0x38] sm:$0xf0]  ;;  %v1924_v26 = vor.u32 %v2296_v23, %v1923_v22  ;;  %v2298_v29 = vld [vmem:[%s2823_s7 + $0x44] sm:$0xf0]  ;;  %v2297_v30 = vld [vmem:[%s2823_s7 + $0x44] sm:$0xf] }
  0x59   : > { %875 = vmatmul.bf16.vlgmr.msra.gmra.mxu2 %v1900_v43  ;;  %1431 = vmatpush.bf16.msrb.mxu1 %v2276_v49  ;;  %v1928_v27 = vor.u32 %v2295_v24, %v1925_v25  ;;  %v1933_v31 = vld [vmem:[%s2823_s7 + $0x48] sm:$0xf0]  ;;  %v1932_v32 = vor.u32 %v2298_v29, %v1931_v28  ;;  %v2361_v34 = vld [vmem:[#allocation8 + $0x44] sm:$0xf]  ;;  %v2187_v39 = vld [vmem:[#allocation8 + $0x40] sm:$0xf] }
  0x5a   : > { %1520 = vmatpush.bf16.msrb.mxu2 %v2216_v40  ;;  %964 = vmatmul.bf16.vlgmr.msra.gmra.mxu3 %v1904_v47  ;;  %v1936_v33 = vor.u32 %v2297_v30, %v1933_v31  ;;  %v2189_v35 = vld [vmem:[#allocation8 + $0x48] sm:$0xf0]  ;;  %v2377_v36 = vld [vmem:[#allocation8 + $0xc4] sm:$0xf]  ;;  %v2362_v40 = vld [vmem:[#allocation8 + $0x44] sm:$0xf0] }
  0x5b   : > { %1609 = vmatpush.bf16.msrb.mxu3 %v2280_v44  ;;  %v2192_v37 = vor.u32 %v2361_v34, %v2189_v35  ;;  %v2253_v38 = vld [vmem:[#allocation8 + $0xc8] sm:$0xf0]  ;;  %v2188_v42 = vor.u32 %v2362_v40, %v2187_v39  ;;  %v2251_v43 = vld [vmem:[#allocation8 + $0xc0] sm:$0xf]  ;;  %v2378_v44 = vld [vmem:[#allocation8 + $0xc4] sm:$0xf0] }
  0x5c   : > { %1343 = vmatpush.bf16.msrb.mxu0 %v2204_v58  ;;  %v2256_v41 = vor.u32 %v2377_v36, %v2253_v38  ;;  %v2252_v45 = vor.u32 %v2378_v44, %v2251_v43  ;;  %v1939_v46 = vld [vmem:[%s2823_s7 + $0x50] sm:$0xf]  ;;  %v2300_v47 = vld [vmem:[%s2823_s7 + $0x54] sm:$0xf0]  ;;  %v2299_v48 = vld [vmem:[%s2823_s7 + $0x54] sm:$0xf] }
  0x5d   : > { %1432 = vmatpush.bf16.msrb.mxu1 %v2268_v61  ;;  %v1941_v49 = vld [vmem:[%s2823_s7 + $0x58] sm:$0xf0]  ;;  %v1940_v50 = vor.u32 %v2300_v47, %v1939_v46  ;;  %v1947_v52 = vld [vmem:[%s2823_s7 + $0x60] sm:$0xf]  ;;  %v2301_v54 = vld [vmem:[%s2823_s7 + $0x64] sm:$0xf] }
  0x5e   : > { %1521 = vmatpush.bf16.msrb.mxu2 %v2208_v53  ;;  %v1944_v51 = vor.u32 %v2299_v48, %v1941_v49  ;;  %v2302_v53 = vld [vmem:[%s2823_s7 + $0x64] sm:$0xf0]  ;;  %v1949_v55 = vld [vmem:[%s2823_s7 + $0x68] sm:$0xf0]  ;;  %v2359_v58 = vld [vmem:[#allocation8 + $0x34] sm:$0xf] }
  0x5f   : > { %1610 = vmatpush.bf16.msrb.mxu3 %v2272_v57  ;;  %v1948_v56 = vor.u32 %v2302_v53, %v1947_v52  ;;  %v1952_v57 = vor.u32 %v2301_v54, %v1949_v55  ;;  %v2181_v59 = vld [vmem:[#allocation8 + $0x38] sm:$0xf0]  ;;  %v2375_v60 = vld [vmem:[#allocation8 + $0xb4] sm:$0xf]  ;;  %v1955_v0 = vld [vmem:[%s2823_s7 + $0x70] sm:$0xf] }
  0x60   : > { %1344 = vmatpush.bf16.msrb.mxu0 %v2196_v18  ;;  %v2184_v61 = vor.u32 %v2359_v58, %v2181_v59  ;;  %v2245_v62 = vld [vmem:[#allocation8 + $0xb8] sm:$0xf0]  ;;  %v2304_v1 = vld [vmem:[%s2823_s7 + $0x74] sm:$0xf0]  ;;  %v2179_v5 = vld [vmem:[#allocation8 + $0x30] sm:$0xf] }
  0x61   : > { %1433 = vmatpush.bf16.msrb.mxu1 %v2260_v21  ;;  %v2248_v63 = vor.u32 %v2375_v60, %v2245_v62  ;;  %v1956_v4 = vor.u32 %v2304_v1, %v1955_v0  ;;  %v2360_v6 = vld [vmem:[#allocation8 + $0x34] sm:$0xf0]  ;;  %v2243_v7 = vld [vmem:[#allocation8 + $0xb0] sm:$0xf]  ;;  %v360_v12 = vld [vmem:[#allocation7] sm:$0x3] }
  0x62   : > { %1522 = vmatpush.bf16.msrb.mxu2 %v2200_v13  ;;  %v2376_v10 = vld [vmem:[#allocation8 + $0xb4] sm:$0xf0]  ;;  %v361_v13 = vunpack.c.l.bf16 %v360_v12  ;;  %v1963_v15 = vld [vmem:[%s2823_s7 + $0x80] sm:$0xf]  ;;  %v2306_v16 = vld [vmem:[%s2823_s7 + $0x84] sm:$0xf0] }
  0x63   : > { %1611 = vmatpush.bf16.msrb.mxu3 %v2264_v17  ;;  %v2244_v11 = vor.u32 %v2376_v10, %v2243_v7  ;;  %v2305_v18 = vld [vmem:[%s2823_s7 + $0x84] sm:$0xf]  ;;  %v1965_v19 = vld [vmem:[%s2823_s7 + $0x88] sm:$0xf0]  ;;  %v1964_v20 = vor.u32 %v2306_v16, %v1963_v15  ;;  %v2308_v43 = vld [vmem:[%s2823_s7 + $0x94] sm:$0xf0] }
  0x64   : > { %1345 = vmatpush.bf16.msrb.mxu0 %v2188_v42  ;;  %v363_v14 = vperm.slane %v361_v13, 0  ;;  %v1968_v22 = vor.u32 %v2305_v18, %v1965_v19  ;;  %v364_v23 = vperm.slane %v361_v13, 2  ;;  %v2357_v28 = vld [vmem:[#allocation8 + $0x24] sm:$0xf]  ;;  %v2173_v29 = vld [vmem:[#allocation8 + $0x28] sm:$0xf0] }
  0x65   : > { %1434 = vmatpush.bf16.msrb.mxu1 %v2252_v45  ;;  %v2176_v30 = vor.u32 %v2357_v28, %v2173_v29  ;;  %v2373_v31 = vld [vmem:[#allocation8 + $0xa4] sm:$0xf]  ;;  %v1971_v42 = vld [vmem:[%s2823_s7 + $0x90] sm:$0xf]  ;;  %v2307_v44 = vld [vmem:[%s2823_s7 + $0x94] sm:$0xf] }
  0x66   : > { %1523 = vmatpush.bf16.msrb.mxu2 %v2192_v37  ;;  %v2871_v17 = vperm.slane %v363_v14, 0  ;;  %v1973_v45 = vld [vmem:[%s2823_s7 + $0x98] sm:$0xf0]  ;;  %v2171_v48 = vld [vmem:[#allocation8 + $0x20] sm:$0xf]  ;;  %v1972_v55 = vor.u32 %v2308_v43, %v1971_v42  ;;  %s1896_s12 = sshll.u32 %s2819_s17, 9 }
  0x67   : > { %702 = vmatmul.bf16.gmra.mxu0 %v1908_v2  ;;  %1612 = vmatpush.bf16.msrb.mxu3 %v2256_v41  ;;  %v2358_v49 = vld [vmem:[#allocation8 + $0x24] sm:$0xf0]  ;;  %v1976_v60 = vor.u32 %v2307_v44, %v1973_v45  ;;  %v1979_v12 = vld [vmem:[%s2823_s7 + $0xa0] sm:$0xf]  ;;  %v2309_v16 = vld [vmem:[%s2823_s7 + $0xa4] sm:$0xf] }
  0x68   : > { %791 = vmatmul.bf16.gmra.mxu1 %v1912_v3  ;;  %v2374_v52 = vld [vmem:[#allocation8 + $0xa4] sm:$0xf0]  ;;  %s3075_s16 = scalar_lea.vmem [#allocation10], %s1896_s12  ;;  %s2386_s23 = sshll.u32 %s2722_s22, 9 }
  0x69   : > { %880 = vmatmul.bf16.gmra.mxu2 %v1908_v2  ;;  %v2303_v2 = vld [vmem:[%s2823_s7 + $0x74] sm:$0xf]  ;;  %1435 = vmatpush.bf16.msrb.mxu1 %v2244_v11  ;;  %v2310_v13 = vld [vmem:[%s2823_s7 + $0xa4] sm:$0xf0]  ;;  %v1981_v18 = vld [vmem:[%s2823_s7 + $0xa8] sm:$0xf0]  ;;  %s1775_s13 = scalar_lea.hbm %s3274_s5, %s2386_s23 }
  0x6a   : > { %969 = vmatmul.bf16.gmra.mxu3 %v1912_v3  ;;  %1524 = vmatpush.bf16.msrb.mxu2 %v2184_v61  ;;  %v1957_v3 = vld [vmem:[%s2823_s7 + $0x78] sm:$0xf0]  ;;  %s1776_s10 = sshll.u32 %s3075_s16, 4  ;;  %s1778_s14 = sshll.u32 %s1775_s13, 4  ;;  %s1777_s10 = int_to_ptr.vmem [resolvable:$true] %s1776_s10  ;;  %s1779_s14 = int_to_ptr.hbm [resolvable:$true] %s1778_s14 }
  0x6b   : > { %1613 = vmatpush.bf16.msrb.mxu3 %v2248_v63  ;;  %s1763_s22 = scalar_lea.sflag [#allocation4], %s2819_s17  ;;  %s2602_s15 = sshra.s32 %s1779_s14, 4  ;;  %s2603_s15 = int_to_ptr.hbm [resolvable:$true] %s2602_s15 }
  0x6c   : > { %s2604_s9 = scalar_lea.hbm %s2603_s15, 512  ;;  %p2609_p11 = scmp.lt.s32.totalorder %s2603_s15, %s3274_s5 }
  0x6d   : > { %p2605_p1 = scmp.ne.s32.totalorder %s2603_s15, %s2604_s9 }
  0x6e   : > { %1525 = vmatpush.bf16.msrb.mxu2 %v2176_v30 }
  0x6f   : > { %p2606_p4 = pnand %p2605_p1, %p2789_p3 }
  0x71   : > { %p2607_p8 = pneg %p2606_p4 }
  0x77   : > { %707 = vmatmul.bf16.gmra.mxu0 %v1916_v8 }
  0x78   : > { %796 = vmatmul.bf16.gmra.mxu1 %v1920_v9 }
  0x79   : > { %885 = vmatmul.bf16.gmra.mxu2 %v1916_v8  ;;  %v1960_v8 = vor.u32 %v2303_v2, %v1957_v3 }
  0x7a   : > { %974 = vmatmul.bf16.gmra.mxu3 %v1920_v9  ;;  %v2180_v9 = vor.u32 %v2360_v6, %v2179_v5 }
  0x7c   : > { %1346 = vmatpush.bf16.msrb.mxu0 %v2180_v9 }
  0x87   : > { %712 = vmatmul.bf16.gmra.mxu0 %v1924_v26 }
  0x88   : > { %801 = vmatmul.bf16.gmra.mxu1 %v1928_v27 }
  0x89   : > { %890 = vmatmul.bf16.gmra.mxu2 %v1924_v26 }
  0x8a   : > { %979 = vmatmul.bf16.gmra.mxu3 %v1928_v27  ;;  %v2876_v27 = vperm.slane %v364_v23, 0 }
  0x97   : > { %717 = vmatmul.bf16.gmra.mxu0 %v1932_v32 }
  0x98   : > { %806 = vmatmul.bf16.gmra.mxu1 %v1936_v33 }
  0x99   : > { %895 = vmatmul.bf16.gmra.mxu2 %v1932_v32  ;;  %v2237_v32 = vld [vmem:[#allocation8 + $0xa8] sm:$0xf0] }
  0x9a   : > { %984 = vmatmul.bf16.gmra.mxu3 %v1936_v33  ;;  %v2240_v34 = vor.u32 %v2373_v31, %v2237_v32 }
  0x9c   : > { %1614 = vmatpush.bf16.msrb.mxu3 %v2240_v34  ;;  %v2165_v34 = vld [vmem:[#allocation8 + $0x18] sm:$0xf0] }
  0xa7   : > { %722 = vmatmul.bf16.gmra.mxu0 %v1940_v50 }
  0xa8   : > { %811 = vmatmul.bf16.gmra.mxu1 %v1944_v51 }
  0xa9   : > { %900 = vmatmul.bf16.gmra.mxu2 %v1940_v50  ;;  %v2172_v50 = vor.u32 %v2358_v49, %v2171_v48  ;;  %v1987_v48 = vld [vmem:[%s2823_s7 + $0xb0] sm:$0xf]  ;;  %v2312_v49 = vld [vmem:[%s2823_s7 + $0xb4] sm:$0xf0] }
  0xaa   : > { %989 = vmatmul.bf16.gmra.mxu3 %v1944_v51  ;;  %v2235_v51 = vld [vmem:[#allocation8 + $0xa0] sm:$0xf] }
  0xab   : > { %1347 = vmatpush.bf16.msrb.mxu0 %v2172_v50  ;;  %v2311_v50 = vld [vmem:[%s2823_s7 + $0xb4] sm:$0xf] }
  0xb7   : > { %727 = vmatmul.bf16.gmra.mxu0 %v1948_v56 }
  0xb8   : > { %816 = vmatmul.bf16.gmra.mxu1 %v1952_v57 }
  0xb9   : > { %905 = vmatmul.bf16.gmra.mxu2 %v1948_v56  ;;  %v2236_v56 = vor.u32 %v2374_v52, %v2235_v51  ;;  %v1989_v51 = vld [vmem:[%s2823_s7 + $0xb8] sm:$0xf0] }
  0xba   : > { %994 = vmatmul.bf16.gmra.mxu3 %v1952_v57 }
  0xbb   : > { %1436 = vmatpush.bf16.msrb.mxu1 %v2236_v56  ;;  %v2356_v56 = vld [vmem:[#allocation8 + $0x14] sm:$0xf0] }
  0xc7   : > { %732 = vmatmul.bf16.gmra.mxu0 %v1956_v4 }
  0xc8   : > { %821 = vmatmul.bf16.gmra.mxu1 %v1960_v8 }
  0xc9   : > { %910 = vmatmul.bf16.gmra.mxu2 %v1956_v4 }
  0xca   : > { %999 = vmatmul.bf16.gmra.mxu3 %v1960_v8 }
  0xd4   : > { %v698_v21 = vpop.f32.mrf.mxu0 }
  0xd5   : > { %v699_v24 = vadd.f32 %v698_v21, %v2871_v17  ;;  %v787_v25 = vpop.f32.mrf.mxu1 }
  0xd7   : > { %v788_v26 = vadd.f32 %v787_v25, %v699_v24  ;;  %737 = vmatmul.bf16.gmra.mxu0 %v1964_v20  ;;  %v1984_v25 = vor.u32 %v2309_v16, %v1981_v18 }
  0xd8   : > { %826 = vmatmul.bf16.gmra.mxu1 %v1968_v22 }
  0xd9   : > { %915 = vmatmul.bf16.gmra.mxu2 %v1964_v20  ;;  %v1045_v46 = vmax.f32 %v788_v26, 0.0  ;;  %v1980_v20 = vor.u32 %v2310_v13, %v1979_v12 }
  0xda   : > { %1004 = vmatmul.bf16.gmra.mxu3 %v1968_v22 }
  0xdc   : > { %v876_v33 = vpop.f32.mrf.mxu2  ;;  %v700_v37 = vpop.f32.mrf.mxu0 }
  0xdd   : > { %v877_v35 = vadd.f32 %v876_v33, %v2876_v27  ;;  %v965_v36 = vpop.f32.mrf.mxu3  ;;  %v701_v38 = vadd.f32 %v700_v37, %v2871_v17  ;;  %v789_v39 = vpop.f32.mrf.mxu1  ;;  %v2355_v33 = vld [vmem:[#allocation8 + $0x14] sm:$0xf]  ;;  %v2229_v37 = vld [vmem:[#allocation8 + $0x98] sm:$0xf0] }
  0xdf   : > { %v966_v40 = vadd.f32 %v965_v36, %v877_v35  ;;  %v790_v41 = vadd.f32 %v789_v39, %v701_v38  ;;  %v2168_v35 = vor.u32 %v2355_v33, %v2165_v34  ;;  %v2371_v36 = vld [vmem:[#allocation8 + $0x94] sm:$0xf] }
  0xe1   : > { %v1047_v47 = vmax.f32 %v790_v41, 0.0  ;;  %v1046_v1 = vmax.f32 %v966_v40, 0.0  ;;  %v2232_v40 = vor.u32 %v2371_v36, %v2229_v37  ;;  %1526 = vmatpush.bf16.msrb.mxu2 %v2168_v35 }
  0xe3   : > { %v2884_v53 = vpack.c.bf16 %v1047_v47, %v1045_v46  ;;  %1615 = vmatpush.bf16.msrb.mxu3 %v2232_v40 }
  0xe4   : > { %v878_v54 = vpop.f32.mrf.mxu2  ;;  %v703_v59 = vpop.f32.mrf.mxu0 }
  0xe5   : > { %v879_v57 = vadd.f32 %v878_v54, %v2876_v27  ;;  %v967_v58 = vpop.f32.mrf.mxu3  ;;  %v704_v61 = vadd.f32 %v703_v59, %v2871_v17  ;;  %v792_v62 = vpop.f32.mrf.mxu1  ;;  %v2372_v59 = vld [vmem:[#allocation8 + $0x94] sm:$0xf0] }
  0xe7   : > { %v968_v63 = vadd.f32 %v967_v58, %v879_v57  ;;  %v793_v0 = vadd.f32 %v792_v62, %v704_v61  ;;  %742 = vmatmul.bf16.gmra.mxu0 %v1972_v55  ;;  %v2227_v58 = vld [vmem:[#allocation8 + $0x90] sm:$0xf]  ;;  %v1988_v61 = vor.u32 %v2312_v49, %v1987_v48 }
  0xe8   : > { %831 = vmatmul.bf16.gmra.mxu1 %v1976_v60  ;;  %v2228_v62 = vor.u32 %v2372_v59, %v2227_v58  ;;  %v2003_v59 = vld [vmem:[%s2823_s7 + $0xd0] sm:$0xf] }
  0xe9   : > { %v1048_v2 = vmax.f32 %v968_v63, 0.0  ;;  %920 = vmatmul.bf16.gmra.mxu2 %v1972_v55  ;;  %v1049_v14 = vmax.f32 %v793_v0, 0.0  ;;  %v2163_v55 = vld [vmem:[#allocation8 + $0x10] sm:$0xf] }
  0xea   : > { %1009 = vmatmul.bf16.gmra.mxu3 %v1976_v60  ;;  %v2164_v57 = vor.u32 %v2356_v56, %v2163_v55  ;;  %1437 = vmatpush.bf16.msrb.mxu1 %v2228_v62  ;;  %v2005_v62 = vld [vmem:[%s2823_s7 + $0xd8] sm:$0xf0] }
  0xeb   : > { %v2888_v3 = vpack.c.bf16 %v1048_v2, %v1046_v1 }
  0xec   : > { %v881_v4 = vpop.f32.mrf.mxu2  ;;  %v705_v7 = vpop.f32.mrf.mxu0  ;;  %1348 = vmatpush.bf16.msrb.mxu0 %v2164_v57 }
  0xed   : > { %v882_v5 = vadd.f32 %v881_v4, %v2876_v27  ;;  %v970_v6 = vpop.f32.mrf.mxu3  ;;  %v706_v8 = vadd.f32 %v705_v7, %v2871_v17  ;;  %v794_v9 = vpop.f32.mrf.mxu1  ;;  %v1992_v4 = vor.u32 %v2311_v50, %v1989_v51 }
  0xef   : > { %v971_v10 = vadd.f32 %v970_v6, %v882_v5  ;;  %v795_v11 = vadd.f32 %v794_v9, %v706_v8 }
  0xf1   : > { %v1051_v15 = vmax.f32 %v795_v11, 0.0  ;;  %v1050_v31 = vmax.f32 %v971_v10, 0.0 }
  0xf3   : > { %v2896_v21 = vpack.c.bf16 %v1051_v15, %v1049_v14 }
  0xf4   : > { %v883_v19 = vpop.f32.mrf.mxu2  ;;  %v708_v24 = vpop.f32.mrf.mxu0 }
  0xf5   : > { %v884_v22 = vadd.f32 %v883_v19, %v2876_v27  ;;  %v972_v23 = vpop.f32.mrf.mxu3  ;;  %v709_v26 = vadd.f32 %v708_v24, %v2871_v17  ;;  %v797_v28 = vpop.f32.mrf.mxu1 }
  0xf7   : > { %v973_v29 = vadd.f32 %v972_v23, %v884_v22  ;;  %v798_v30 = vadd.f32 %v797_v28, %v709_v26  ;;  %747 = vmatmul.bf16.gmra.mxu0 %v1980_v20  ;;  %v1995_v22 = vld [vmem:[%s2823_s7 + $0xc0] sm:$0xf]  ;;  %v2314_v23 = vld [vmem:[%s2823_s7 + $0xc4] sm:$0xf0]  ;;  %v2313_v26 = vld [vmem:[%s2823_s7 + $0xc4] sm:$0xf] }
  0xf8   : > { %836 = vmatmul.bf16.gmra.mxu1 %v1984_v25  ;;  %v1997_v28 = vld [vmem:[%s2823_s7 + $0xc8] sm:$0xf0] }
  0xf9   : > { %v1052_v32 = vmax.f32 %v973_v29, 0.0  ;;  %925 = vmatmul.bf16.gmra.mxu2 %v1980_v20  ;;  %v1053_v52 = vmax.f32 %v798_v30, 0.0  ;;  %v1996_v30 = vor.u32 %v2314_v23, %v1995_v22  ;;  %v2000_v35 = vor.u32 %v2313_v26, %v1997_v28 }
  0xfa   : > { %1014 = vmatmul.bf16.gmra.mxu3 %v1984_v25 }
  0xfb   : > { %v2900_v38 = vpack.c.bf16 %v1052_v32, %v1050_v31 }
  0xfc   : > { %v886_v39 = vpop.f32.mrf.mxu2  ;;  %v710_v43 = vpop.f32.mrf.mxu0 }
  0xfd   : > { %v887_v41 = vadd.f32 %v886_v39, %v2876_v27  ;;  %v975_v42 = vpop.f32.mrf.mxu3  ;;  %v711_v44 = vadd.f32 %v710_v43, %v2871_v17  ;;  %v799_v45 = vpop.f32.mrf.mxu1  ;;  %v2353_v43 = vld [vmem:[#allocation8 + $0x4] sm:$0xf] }
  0xff   : > { %v976_v46 = vadd.f32 %v975_v42, %v887_v41  ;;  %v800_v47 = vadd.f32 %v799_v45, %v711_v44  ;;  %v2157_v44 = vld [vmem:[#allocation8 + $0x8] sm:$0xf0] }
 0x100   : > { %v2160_v45 = vor.u32 %v2353_v43, %v2157_v44 }
 0x101   : > { %v1055_v54 = vmax.f32 %v800_v47, 0.0  ;;  %v1054_v9 = vmax.f32 %v976_v46, 0.0  ;;  %v2369_v46 = vld [vmem:[#allocation8 + $0x84] sm:$0xf]  ;;  %v2221_v47 = vld [vmem:[#allocation8 + $0x88] sm:$0xf0] }
 0x102   : > { %v2224_v50 = vor.u32 %v2369_v46, %v2221_v47  ;;  %1527 = vmatpush.bf16.msrb.mxu2 %v2160_v45 }
 0x103   : > { %v2908_v63 = vpack.c.bf16 %v1055_v54, %v1053_v52 }
 0x104   : > { %v888_v60 = vpop.f32.mrf.mxu2  ;;  %v713_v2 = vpop.f32.mrf.mxu0  ;;  %1616 = vmatpush.bf16.msrb.mxu3 %v2224_v50 }
 0x105   : > { %v889_v0 = vadd.f32 %v888_v60, %v2876_v27  ;;  %v977_v1 = vpop.f32.mrf.mxu3  ;;  %v714_v5 = vadd.f32 %v713_v2, %v2871_v17  ;;  %v802_v6 = vpop.f32.mrf.mxu1  ;;  %v2316_v60 = vld [vmem:[%s2823_s7 + $0xd4] sm:$0xf0]  ;;  %v2155_v2 = vld [vmem:[#allocation8] sm:$0xf] }
 0x107   : > { %v978_v7 = vadd.f32 %v977_v1, %v889_v0  ;;  %v803_v8 = vadd.f32 %v802_v6, %v714_v5  ;;  %752 = vmatmul.bf16.gmra.mxu0 %v1988_v61  ;;  %v2219_v6 = vld [vmem:[#allocation8 + $0x80] sm:$0xf] }
 0x108   : > { %841 = vmatmul.bf16.gmra.mxu1 %v1992_v4 }
 0x109   : > { %v1056_v10 = vmax.f32 %v978_v7, 0.0  ;;  %930 = vmatmul.bf16.gmra.mxu2 %v1988_v61  ;;  %v1057_v24 = vmax.f32 %v803_v8, 0.0  ;;  %v2315_v61 = vld [vmem:[%s2823_s7 + $0xd4] sm:$0xf]  ;;  %v2370_v7 = vld [vmem:[#allocation8 + $0x84] sm:$0xf0] }
 0x10a   : > { %1019 = vmatmul.bf16.gmra.mxu3 %v1992_v4  ;;  %v2354_v4 = vld [vmem:[#allocation8 + $0x4] sm:$0xf0] }
 0x10b   : > { %v2912_v11 = vpack.c.bf16 %v1056_v10, %v1054_v9  ;;  %v2156_v5 = vor.u32 %v2354_v4, %v2155_v2  ;;  %v2004_v9 = vor.u32 %v2316_v60, %v2003_v59  ;;  %v2220_v10 = vor.u32 %v2370_v7, %v2219_v6  ;;  %v2320_v6 = vld [vmem:[%s2823_s7 + $0xf4] sm:$0xf0] }
 0x10c   : > { %v891_v12 = vpop.f32.mrf.mxu2  ;;  %v715_v15 = vpop.f32.mrf.mxu0 }
 0x10d   : > { %v892_v13 = vadd.f32 %v891_v12, %v2876_v27  ;;  %v980_v14 = vpop.f32.mrf.mxu3  ;;  %v716_v16 = vadd.f32 %v715_v15, %v2871_v17  ;;  %v804_v18 = vpop.f32.mrf.mxu1  ;;  %1349 = vmatpush.bf16.msrb.mxu0 %v2156_v5  ;;  %1438 = vmatpush.bf16.msrb.mxu1 %v2220_v10  ;;  %v2019_v5 = vld [vmem:[%s2823_s7 + $0xf0] sm:$0xf]  ;;  %v2021_v10 = vld [vmem:[%s2823_s7 + $0xf8] sm:$0xf0] }
 0x10f   : > { %v981_v19 = vadd.f32 %v980_v14, %v892_v13  ;;  %v805_v20 = vadd.f32 %v804_v18, %v716_v16  ;;  %v2008_v16 = vor.u32 %v2315_v61, %v2005_v62 }
 0x111   : > { %v1059_v25 = vmax.f32 %v805_v20, 0.0  ;;  %v1058_v41 = vmax.f32 %v981_v19, 0.0 }
 0x113   : > { %v2920_v31 = vpack.c.bf16 %v1059_v25, %v1057_v24 }
 0x114   : > { %v893_v29 = vpop.f32.mrf.mxu2  ;;  %v718_v34 = vpop.f32.mrf.mxu0 }
 0x115   : > { %v894_v32 = vadd.f32 %v893_v29, %v2876_v27  ;;  %v982_v33 = vpop.f32.mrf.mxu3  ;;  %v719_v36 = vadd.f32 %v718_v34, %v2871_v17  ;;  %v807_v37 = vpop.f32.mrf.mxu1 }
 0x117   : > { %v983_v39 = vadd.f32 %v982_v33, %v894_v32  ;;  %v808_v40 = vadd.f32 %v807_v37, %v719_v36  ;;  %757 = vmatmul.bf16.gmra.mxu0 %v1996_v30  ;;  %v2011_v36 = vld [vmem:[%s2823_s7 + $0xe0] sm:$0xf]  ;;  %v2318_v37 = vld [vmem:[%s2823_s7 + $0xe4] sm:$0xf0] }
 0x118   : > { %846 = vmatmul.bf16.gmra.mxu1 %v2000_v35  ;;  %v2012_v44 = vor.u32 %v2318_v37, %v2011_v36 }
 0x119   : > { %v1060_v42 = vmax.f32 %v983_v39, 0.0  ;;  %935 = vmatmul.bf16.gmra.mxu2 %v1996_v30  ;;  %v1061_v0 = vmax.f32 %v808_v40, 0.0 }
 0x11a   : > { %1024 = vmatmul.bf16.gmra.mxu3 %v2000_v35 }
 0x11b   : > { %v2924_v48 = vpack.c.bf16 %v1060_v42, %v1058_v41  ;;  %v2317_v41 = vld [vmem:[%s2823_s7 + $0xe4] sm:$0xf]  ;;  %v2013_v42 = vld [vmem:[%s2823_s7 + $0xe8] sm:$0xf0] }
 0x11c   : > { %v896_v49 = vpop.f32.mrf.mxu2  ;;  %v720_v54 = vpop.f32.mrf.mxu0  ;;  %v2016_v50 = vor.u32 %v2317_v41, %v2013_v42 }
 0x11d   : > { %v897_v51 = vadd.f32 %v896_v49, %v2876_v27  ;;  %v985_v52 = vpop.f32.mrf.mxu3  ;;  %v721_v55 = vadd.f32 %v720_v54, %v2871_v17  ;;  %v809_v56 = vpop.f32.mrf.mxu1 }
 0x11f   : > { %v986_v57 = vadd.f32 %v985_v52, %v897_v51  ;;  %v810_v58 = vadd.f32 %v809_v56, %v721_v55 }
 0x121   : > { %v1063_v1 = vmax.f32 %v810_v58, 0.0  ;;  %v1062_v23 = vmax.f32 %v986_v57, 0.0 }
 0x123   : > { %v2932_v12 = vpack.c.bf16 %v1063_v1, %v1061_v0 }
 0x124   : > { %v898_v8 = vpop.f32.mrf.mxu2  ;;  %v723_v15 = vpop.f32.mrf.mxu0 }
 0x125   : > { %v899_v13 = vadd.f32 %v898_v8, %v2876_v27  ;;  %v987_v14 = vpop.f32.mrf.mxu3  ;;  %v724_v18 = vadd.f32 %v723_v15, %v2871_v17  ;;  %v812_v19 = vpop.f32.mrf.mxu1 }
 0x127   : > { %v988_v20 = vadd.f32 %v987_v14, %v899_v13  ;;  %v813_v22 = vadd.f32 %v812_v19, %v724_v18  ;;  %762 = vmatmul.bf16.gmra.mxu0 %v2004_v9  ;;  %v2020_v14 = vor.u32 %v2320_v6, %v2019_v5 }
 0x128   : > { %851 = vmatmul.bf16.gmra.mxu1 %v2008_v16 }
 0x129   : > { %v1064_v24 = vmax.f32 %v988_v20, 0.0  ;;  %940 = vmatmul.bf16.gmra.mxu2 %v2004_v9  ;;  %v1065_v39 = vmax.f32 %v813_v22, 0.0  ;;  %v2319_v9 = vld [vmem:[%s2823_s7 + $0xf4] sm:$0xf]  ;;  %s2608_s7 = scalar_lea.hbm %s3274_s5, 1024 }
 0x12a   : > { %1029 = vmatmul.bf16.gmra.mxu3 %v2008_v16  ;;  %v2024_v20 = vor.u32 %v2319_v9, %v2021_v10  ;;  %p2610_p9 = scmp.lt.s32.totalorder %s2608_s7, %s2604_s9 }
 0x12b   : > { %v2936_v25 = vpack.c.bf16 %v1064_v24, %v1062_v23 }
 0x12c   : > { %v901_v26 = vpop.f32.mrf.mxu2  ;;  %v725_v30 = vpop.f32.mrf.mxu0  ;;  %p2611_p2 = por %p2610_p9, %p2609_p11 }
 0x12d   : > { %v902_v28 = vadd.f32 %v901_v26, %v2876_v27  ;;  %v990_v29 = vpop.f32.mrf.mxu3  ;;  %v726_v32 = vadd.f32 %v725_v30, %v2871_v17  ;;  %v814_v33 = vpop.f32.mrf.mxu1 }
 0x12e   : > { %p2612_p10 = pnand %p2611_p2, %p2607_p8 }
 0x12f   : > { %v991_v34 = vadd.f32 %v990_v29, %v902_v28  ;;  %v815_v35 = vadd.f32 %v814_v33, %v726_v32 }
 0x131   : > { %v1067_v40 = vmax.f32 %v815_v35, 0.0  ;;  %v1066_v56 = vmax.f32 %v991_v34, 0.0 }
 0x133   : > { %v2944_v45 = vpack.c.bf16 %v1067_v40, %v1065_v39 }
 0x134   : > { %v903_v43 = vpop.f32.mrf.mxu2  ;;  %v728_v49 = vpop.f32.mrf.mxu0 }
 0x135   : > { %v904_v46 = vadd.f32 %v903_v43, %v2876_v27  ;;  %v992_v47 = vpop.f32.mrf.mxu3  ;;  %v729_v51 = vadd.f32 %v728_v49, %v2871_v17  ;;  %v817_v52 = vpop.f32.mrf.mxu1 }
 0x137   : > { %v993_v54 = vadd.f32 %v992_v47, %v904_v46  ;;  %v818_v55 = vadd.f32 %v817_v52, %v729_v51  ;;  %767 = vmatmul.bf16.gmra.mxu0 %v2012_v44 }
 0x138   : > { %856 = vmatmul.bf16.gmra.mxu1 %v2016_v50 }
 0x139   : > { %v1068_v57 = vmax.f32 %v993_v54, 0.0  ;;  %945 = vmatmul.bf16.gmra.mxu2 %v2012_v44  ;;  %v1069_v7 = vmax.f32 %v818_v55, 0.0 }
 0x13a   : > { %1034 = vmatmul.bf16.gmra.mxu3 %v2016_v50 }
 0x13b   : > { %v2948_v58 = vpack.c.bf16 %v1068_v57, %v1066_v56 }
 0x13c   : > { %v906_v59 = vpop.f32.mrf.mxu2  ;;  %v730_v62 = vpop.f32.mrf.mxu0 }
 0x13d   : > { %v907_v60 = vadd.f32 %v906_v59, %v2876_v27  ;;  %v995_v61 = vpop.f32.mrf.mxu3  ;;  %v731_v0 = vadd.f32 %v730_v62, %v2871_v17  ;;  %v819_v1 = vpop.f32.mrf.mxu1 }
 0x13f   : > { %v996_v2 = vadd.f32 %v995_v61, %v907_v60  ;;  %v820_v4 = vadd.f32 %v819_v1, %v731_v0 }
 0x141   : > { %v1071_v8 = vmax.f32 %v820_v4, 0.0  ;;  %v1070_v28 = vmax.f32 %v996_v2, 0.0 }
 0x143   : > { %v2956_v15 = vpack.c.bf16 %v1071_v8, %v1069_v7 }
 0x144   : > { %v908_v13 = vpop.f32.mrf.mxu2  ;;  %v733_v19 = vpop.f32.mrf.mxu0 }
 0x145   : > { %v909_v16 = vadd.f32 %v908_v13, %v2876_v27  ;;  %v997_v18 = vpop.f32.mrf.mxu3  ;;  %v734_v22 = vadd.f32 %v733_v19, %v2871_v17  ;;  %v822_v23 = vpop.f32.mrf.mxu1 }
 0x147   : > { %v998_v24 = vadd.f32 %v997_v18, %v909_v16  ;;  %v823_v26 = vadd.f32 %v822_v23, %v734_v22  ;;  %772 = vmatmul.bf16.gmra.mxu0 %v2020_v14 }
 0x148   : > { %861 = vmatmul.bf16.gmra.mxu1 %v2024_v20 }
 0x149   : > { %v1072_v29 = vmax.f32 %v998_v24, 0.0  ;;  %950 = vmatmul.bf16.gmra.mxu2 %v2020_v14  ;;  %v1073_v41 = vmax.f32 %v823_v26, 0.0 }
 0x14a   : > { %1039 = vmatmul.bf16.gmra.mxu3 %v2024_v20 }
 0x14b   : > { %v2960_v30 = vpack.c.bf16 %v1072_v29, %v1070_v28 }
 0x14c   : > { %v911_v32 = vpop.f32.mrf.mxu2  ;;  %v735_v35 = vpop.f32.mrf.mxu0 }
 0x14d   : > { %v912_v33 = vadd.f32 %v911_v32, %v2876_v27  ;;  %v1000_v34 = vpop.f32.mrf.mxu3  ;;  %v736_v36 = vadd.f32 %v735_v35, %v2871_v17  ;;  %v824_v37 = vpop.f32.mrf.mxu1 }
 0x14f   : > { %v1001_v39 = vadd.f32 %v1000_v34, %v912_v33  ;;  %v825_v40 = vadd.f32 %v824_v37, %v736_v36 }
 0x151   : > { %v1075_v42 = vmax.f32 %v825_v40, 0.0  ;;  %v1074_v55 = vmax.f32 %v1001_v39, 0.0 }
 0x153   : > { %v2964_v44 = vpack.c.bf16 %v1075_v42, %v1073_v41 }
 0x154   : > { %v913_v43 = vpop.f32.mrf.mxu2  ;;  %v738_v49 = vpop.f32.mrf.mxu0 }
 0x155   : > { %v914_v46 = vadd.f32 %v913_v43, %v2876_v27  ;;  %v1002_v47 = vpop.f32.mrf.mxu3  ;;  %v739_v50 = vadd.f32 %v738_v49, %v2871_v17  ;;  %v827_v51 = vpop.f32.mrf.mxu1 }
 0x157   : > { %v1003_v52 = vadd.f32 %v1002_v47, %v914_v46  ;;  %v828_v54 = vadd.f32 %v827_v51, %v739_v50  ;;  %1350 = vmatmul.bf16.vlgmr.msrb.gmra.mxu0 %v2884_v53 }
 0x158   : > { %1439 = vmatmul.bf16.vlgmr.msrb.gmra.mxu1 %v2888_v3 }
 0x159   : > { %v1076_v56 = vmax.f32 %v1003_v52, 0.0  ;;  %1528 = vmatmul.bf16.vlgmr.msrb.gmra.mxu2 %v2884_v53  ;;  %v1077_v5 = vmax.f32 %v828_v54, 0.0 }
 0x15a   : > { %1617 = vmatmul.bf16.vlgmr.msrb.gmra.mxu3 %v2888_v3 }
 0x15b   : > { %v2972_v57 = vpack.c.bf16 %v1076_v56, %v1074_v55 }
 0x15c   : > { %v916_v59 = vpop.f32.mrf.mxu2  ;;  %v740_v62 = vpop.f32.mrf.mxu0 }
 0x15d   : > { %v917_v60 = vadd.f32 %v916_v59, %v2876_v27  ;;  %v1005_v61 = vpop.f32.mrf.mxu3  ;;  %v741_v0 = vadd.f32 %v740_v62, %v2871_v17  ;;  %v829_v1 = vpop.f32.mrf.mxu1 }
 0x15f   : > { %v1006_v2 = vadd.f32 %v1005_v61, %v917_v60  ;;  %v830_v4 = vadd.f32 %v829_v1, %v741_v0 }
 0x161   : > { %v1079_v6 = vmax.f32 %v830_v4, 0.0  ;;  %v1078_v18 = vmax.f32 %v1006_v2, 0.0 }
 0x163   : > { %v2976_v8 = vpack.c.bf16 %v1079_v6, %v1077_v5 }
 0x164   : > { %v918_v7 = vpop.f32.mrf.mxu2  ;;  %v743_v9 = vpop.f32.mrf.mxu0 }
 0x165   : > { %v919_v53 = vadd.f32 %v918_v7, %v2876_v27  ;;  %v1007_v3 = vpop.f32.mrf.mxu3  ;;  %v744_v10 = vadd.f32 %v743_v9, %v2871_v17  ;;  %v832_v13 = vpop.f32.mrf.mxu1 }
 0x167   : > { %v1008_v14 = vadd.f32 %v1007_v3, %v919_v53  ;;  %v833_v16 = vadd.f32 %v832_v13, %v744_v10  ;;  %1355 = vmatmul.bf16.gmra.mxu0 %v2896_v21 }
 0x168   : > { %1444 = vmatmul.bf16.gmra.mxu1 %v2900_v38 }
 0x169   : > { %v1080_v19 = vmax.f32 %v1008_v14, 0.0  ;;  %1533 = vmatmul.bf16.gmra.mxu2 %v2896_v21  ;;  %v1081_v34 = vmax.f32 %v833_v16, 0.0 }
 0x16a   : > { %1622 = vmatmul.bf16.gmra.mxu3 %v2900_v38 }
 0x16b   : > { %v2984_v20 = vpack.c.bf16 %v1080_v19, %v1078_v18 }
 0x16c   : > { %v921_v22 = vpop.f32.mrf.mxu2  ;;  %v745_v26 = vpop.f32.mrf.mxu0 }
 0x16d   : > { %v922_v23 = vadd.f32 %v921_v22, %v2876_v27  ;;  %v1010_v24 = vpop.f32.mrf.mxu3  ;;  %v746_v28 = vadd.f32 %v745_v26, %v2871_v17  ;;  %v834_v29 = vpop.f32.mrf.mxu1 }
 0x16f   : > { %v1011_v32 = vadd.f32 %v1010_v24, %v922_v23  ;;  %v835_v33 = vadd.f32 %v834_v29, %v746_v28 }
 0x171   : > { %v1083_v35 = vmax.f32 %v835_v33, 0.0  ;;  %v1082_v46 = vmax.f32 %v1011_v32, 0.0 }
 0x173   : > { %v2988_v37 = vpack.c.bf16 %v1083_v35, %v1081_v34 }
 0x174   : > { %v923_v36 = vpop.f32.mrf.mxu2  ;;  %v748_v39 = vpop.f32.mrf.mxu0 }
 0x175   : > { %v924_v21 = vadd.f32 %v923_v36, %v2876_v27  ;;  %v1012_v38 = vpop.f32.mrf.mxu3  ;;  %v749_v40 = vadd.f32 %v748_v39, %v2871_v17  ;;  %v837_v41 = vpop.f32.mrf.mxu1 }
 0x177   : > { %v1013_v42 = vadd.f32 %v1012_v38, %v924_v21  ;;  %v838_v43 = vadd.f32 %v837_v41, %v749_v40  ;;  %1360 = vmatmul.bf16.gmra.mxu0 %v2908_v63 }
 0x178   : > { %1449 = vmatmul.bf16.gmra.mxu1 %v2912_v11 }
 0x179   : > { %v1084_v47 = vmax.f32 %v1013_v42, 0.0  ;;  %1538 = vmatmul.bf16.gmra.mxu2 %v2908_v63  ;;  %v1085_v61 = vmax.f32 %v838_v43, 0.0 }
 0x17a   : > { %1627 = vmatmul.bf16.gmra.mxu3 %v2912_v11 }
 0x17b   : > { %v2996_v49 = vpack.c.bf16 %v1084_v47, %v1082_v46 }
 0x17c   : > { %v926_v50 = vpop.f32.mrf.mxu2  ;;  %v750_v54 = vpop.f32.mrf.mxu0 }
 0x17d   : > { %v927_v51 = vadd.f32 %v926_v50, %v2876_v27  ;;  %v1015_v52 = vpop.f32.mrf.mxu3  ;;  %v751_v55 = vadd.f32 %v750_v54, %v2871_v17  ;;  %v839_v56 = vpop.f32.mrf.mxu1 }
 0x17f   : > { %v1016_v59 = vadd.f32 %v1015_v52, %v927_v51  ;;  %v840_v60 = vadd.f32 %v839_v56, %v751_v55 }
 0x181   : > { %v1087_v62 = vmax.f32 %v840_v60, 0.0  ;;  %v1086_v53 = vmax.f32 %v1016_v59, 0.0 }
 0x183   : > { %v3000_v1 = vpack.c.bf16 %v1087_v62, %v1085_v61 }
 0x184   : > { %v928_v0 = vpop.f32.mrf.mxu2  ;;  %v753_v2 = vpop.f32.mrf.mxu0 }
 0x185   : > { %v929_v63 = vadd.f32 %v928_v0, %v2876_v27  ;;  %v1017_v11 = vpop.f32.mrf.mxu3  ;;  %v754_v4 = vadd.f32 %v753_v2, %v2871_v17  ;;  %v842_v5 = vpop.f32.mrf.mxu1 }
 0x187   : > { %v1018_v6 = vadd.f32 %v1017_v11, %v929_v63  ;;  %v843_v7 = vadd.f32 %v842_v5, %v754_v4  ;;  %1365 = vmatmul.bf16.gmra.mxu0 %v2920_v31 }
 0x188   : > { %1454 = vmatmul.bf16.gmra.mxu1 %v2924_v48 }
 0x189   : > { %v1088_v3 = vmax.f32 %v1018_v6, 0.0  ;;  %1543 = vmatmul.bf16.gmra.mxu2 %v2920_v31  ;;  %v1089_v24 = vmax.f32 %v843_v7, 0.0 }
 0x18a   : > { %1632 = vmatmul.bf16.gmra.mxu3 %v2924_v48 }
 0x18b   : > { %v3008_v9 = vpack.c.bf16 %v1088_v3, %v1086_v53 }
 0x18c   : > { %v931_v10 = vpop.f32.mrf.mxu2  ;;  %v755_v16 = vpop.f32.mrf.mxu0 }
 0x18d   : > { %v932_v13 = vadd.f32 %v931_v10, %v2876_v27  ;;  %v1020_v14 = vpop.f32.mrf.mxu3  ;;  %v756_v18 = vadd.f32 %v755_v16, %v2871_v17  ;;  %v844_v19 = vpop.f32.mrf.mxu1 }
 0x18f   : > { %v1021_v22 = vadd.f32 %v1020_v14, %v932_v13  ;;  %v845_v23 = vadd.f32 %v844_v19, %v756_v18 }
 0x191   : > { %v1091_v26 = vmax.f32 %v845_v23, 0.0  ;;  %v1090_v21 = vmax.f32 %v1021_v22, 0.0 }
 0x193   : > { %v3012_v29 = vpack.c.bf16 %v1091_v26, %v1089_v24 }
 0x194   : > { %v933_v28 = vpop.f32.mrf.mxu2  ;;  %v758_v32 = vpop.f32.mrf.mxu0 }
 0x195   : > { %v934_v31 = vadd.f32 %v933_v28, %v2876_v27  ;;  %v1022_v48 = vpop.f32.mrf.mxu3  ;;  %v759_v33 = vadd.f32 %v758_v32, %v2871_v17  ;;  %v847_v34 = vpop.f32.mrf.mxu1 }
 0x197   : > { %v1023_v35 = vadd.f32 %v1022_v48, %v934_v31  ;;  %v848_v36 = vadd.f32 %v847_v34, %v759_v33  ;;  %1370 = vmatmul.bf16.gmra.mxu0 %v2932_v12 }
 0x198   : > { %1459 = vmatmul.bf16.gmra.mxu1 %v2936_v25 }
 0x199   : > { %v1092_v38 = vmax.f32 %v1023_v35, 0.0  ;;  %1548 = vmatmul.bf16.gmra.mxu2 %v2932_v12  ;;  %v1093_v52 = vmax.f32 %v848_v36, 0.0 }
 0x19a   : > { %1637 = vmatmul.bf16.gmra.mxu3 %v2936_v25 }
 0x19b   : > { %v3020_v39 = vpack.c.bf16 %v1092_v38, %v1090_v21 }
 0x19c   : > { %v936_v40 = vpop.f32.mrf.mxu2  ;;  %v760_v43 = vpop.f32.mrf.mxu0 }
 0x19d   : > { %v937_v41 = vadd.f32 %v936_v40, %v2876_v27  ;;  %v1025_v42 = vpop.f32.mrf.mxu3  ;;  %v761_v46 = vadd.f32 %v760_v43, %v2871_v17  ;;  %v849_v47 = vpop.f32.mrf.mxu1 }
 0x19f   : > { %v1026_v50 = vadd.f32 %v1025_v42, %v937_v41  ;;  %v850_v51 = vadd.f32 %v849_v47, %v761_v46 }
 0x1a1   : > { %v1095_v54 = vmax.f32 %v850_v51, 0.0  ;;  %v1094_v63 = vmax.f32 %v1026_v50, 0.0 }
 0x1a3   : > { %v3024_v56 = vpack.c.bf16 %v1095_v54, %v1093_v52 }
 0x1a4   : > { %v938_v55 = vpop.f32.mrf.mxu2  ;;  %v763_v59 = vpop.f32.mrf.mxu0 }
 0x1a5   : > { %v939_v12 = vadd.f32 %v938_v55, %v2876_v27  ;;  %v1027_v25 = vpop.f32.mrf.mxu3  ;;  %v764_v60 = vadd.f32 %v763_v59, %v2871_v17  ;;  %v852_v61 = vpop.f32.mrf.mxu1  ;;  %v1173_v55 = vld [vmem:[%s3273_s4] sm:$0x3] }
 0x1a7   : > { %v1028_v62 = vadd.f32 %v1027_v25, %v939_v12  ;;  %v853_v0 = vadd.f32 %v852_v61, %v764_v60  ;;  %1375 = vmatmul.bf16.gmra.mxu0 %v2944_v45  ;;  %v1174_v60 = vunpack.c.l.bf16 %v1173_v55 }
 0x1a8   : > { %1464 = vmatmul.bf16.gmra.mxu1 %v2948_v58 }
 0x1a9   : > { %v1096_v11 = vmax.f32 %v1028_v62, 0.0  ;;  %1553 = vmatmul.bf16.gmra.mxu2 %v2944_v45  ;;  %v1097_v14 = vmax.f32 %v853_v0, 0.0 }
 0x1aa   : > { %1642 = vmatmul.bf16.gmra.mxu3 %v2948_v58 }
 0x1ab   : > { %v3032_v2 = vpack.c.bf16 %v1096_v11, %v1094_v63 }
 0x1ac   : > { %v941_v4 = vpop.f32.mrf.mxu2  ;;  %v765_v7 = vpop.f32.mrf.mxu0 }
 0x1ad   : > { %v942_v5 = vadd.f32 %v941_v4, %v2876_v27  ;;  %v1030_v6 = vpop.f32.mrf.mxu3  ;;  %v766_v53 = vadd.f32 %v765_v7, %v2871_v17  ;;  %v854_v3 = vpop.f32.mrf.mxu1 }
 0x1af   : > { %v1031_v10 = vadd.f32 %v1030_v6, %v942_v5  ;;  %v855_v13 = vadd.f32 %v854_v3, %v766_v53  ;;  %v1176_v6 = vperm.slane %v1174_v60, 0 }
 0x1b1   : > { %v1099_v16 = vmax.f32 %v855_v13, 0.0  ;;  %v1098_v31 = vmax.f32 %v1031_v10, 0.0 }
 0x1b3   : > { %v3036_v19 = vpack.c.bf16 %v1099_v16, %v1097_v14 }
 0x1b4   : > { %v943_v18 = vpop.f32.mrf.mxu2  ;;  %v768_v22 = vpop.f32.mrf.mxu0 }
 0x1b5   : > { %v944_v45 = vadd.f32 %v943_v18, %v2876_v27  ;;  %v1032_v58 = vpop.f32.mrf.mxu3  ;;  %v769_v23 = vadd.f32 %v768_v22, %v2871_v17  ;;  %v857_v24 = vpop.f32.mrf.mxu1 }
 0x1b7   : > { %v1033_v26 = vadd.f32 %v1032_v58, %v944_v45  ;;  %v858_v28 = vadd.f32 %v857_v24, %v769_v23  ;;  %1380 = vmatmul.bf16.gmra.mxu0 %v2956_v15  ;;  %v1177_v45 = vperm.slane %v1174_v60, 2 }
 0x1b8   : > { %1469 = vmatmul.bf16.gmra.mxu1 %v2960_v30 }
 0x1b9   : > { %v1100_v48 = vmax.f32 %v1033_v26, 0.0  ;;  %1558 = vmatmul.bf16.gmra.mxu2 %v2956_v15  ;;  %v1101_v42 = vmax.f32 %v858_v28, 0.0  ;;  %v3073_v28 = vperm.slane %v1177_v45, 0 }
 0x1ba   : > { %1647 = vmatmul.bf16.gmra.mxu3 %v2960_v30 }
 0x1bb   : > { %v3044_v32 = vpack.c.bf16 %v1100_v48, %v1098_v31 }
 0x1bc   : > { %v946_v33 = vpop.f32.mrf.mxu2  ;;  %v770_v36 = vpop.f32.mrf.mxu0 }
 0x1bd   : > { %v947_v34 = vadd.f32 %v946_v33, %v2876_v27  ;;  %v1035_v35 = vpop.f32.mrf.mxu3  ;;  %v771_v21 = vadd.f32 %v770_v36, %v2871_v17  ;;  %v859_v38 = vpop.f32.mrf.mxu1 }
 0x1bf   : > { %v1036_v40 = vadd.f32 %v1035_v35, %v947_v34  ;;  %v860_v41 = vadd.f32 %v859_v38, %v771_v21 }
 0x1c1   : > { %v1103_v43 = vmax.f32 %v860_v41, 0.0  ;;  %v1102_v25 = vmax.f32 %v1036_v40, 0.0 }
 0x1c3   : > { %v3048_v47 = vpack.c.bf16 %v1103_v43, %v1101_v42 }
 0x1c4   : > { %v948_v46 = vpop.f32.mrf.mxu2  ;;  %v773_v50 = vpop.f32.mrf.mxu0 }
 0x1c5   : > { %v949_v15 = vadd.f32 %v948_v46, %v2876_v27  ;;  %v1037_v30 = vpop.f32.mrf.mxu3  ;;  %v774_v51 = vadd.f32 %v773_v50, %v2871_v17  ;;  %v862_v52 = vpop.f32.mrf.mxu1 }
 0x1c7   : > { %v1038_v54 = vadd.f32 %v1037_v30, %v949_v15  ;;  %v863_v12 = vadd.f32 %v862_v52, %v774_v51  ;;  %1385 = vmatmul.bf16.gmra.mxu0 %v2964_v44 }
 0x1c8   : > { %1474 = vmatmul.bf16.gmra.mxu1 %v2972_v57 }
 0x1c9   : > { %v1104_v59 = vmax.f32 %v1038_v54, 0.0  ;;  %1563 = vmatmul.bf16.gmra.mxu2 %v2964_v44  ;;  %v1105_v3 = vmax.f32 %v863_v12, 0.0  ;;  %v3063_v44 = vperm.slane %v1176_v6, 0 }
 0x1ca   : > { %1652 = vmatmul.bf16.gmra.mxu3 %v2972_v57 }
 0x1cb   : > { %v3059_v61 = vpack.c.bf16 %v1104_v59, %v1102_v25 }
 0x1cc   : > { %v951_v62 = vpop.f32.mrf.mxu2  ;;  %v775_v11 = vpop.f32.mrf.mxu0 }
 0x1cd   : > { %v952_v0 = vadd.f32 %v951_v62, %v2876_v27  ;;  %v1040_v63 = vpop.f32.mrf.mxu3  ;;  %v776_v4 = vadd.f32 %v775_v11, %v2871_v17  ;;  %v864_v5 = vpop.f32.mrf.mxu1 }
 0x1cf   : > { %v1041_v7 = vadd.f32 %v1040_v63, %v952_v0  ;;  %v865_v53 = vadd.f32 %v864_v5, %v776_v4 }
 0x1d1   : > { %v1107_v10 = vmax.f32 %v865_v53, 0.0  ;;  %v1106_v24 = vmax.f32 %v1041_v7, 0.0 }
 0x1d3   : > { %v3066_v13 = vpack.c.bf16 %v1107_v10, %v1105_v3 }
 0x1d4   : > { %v953_v57 = vpop.f32.mrf.mxu2  ;;  %v1351_v18 = vpop.f32.mrf.mxu0 }
 0x1d5   : > { %v954_v14 = vadd.f32 %v953_v57, %v2876_v27  ;;  %v1042_v16 = vpop.f32.mrf.mxu3  ;;  %v1352_v58 = vadd.f32 %v1351_v18, %v3063_v44  ;;  %v1440_v17 = vpop.f32.mrf.mxu1 }
 0x1d7   : > { %v1043_v22 = vadd.f32 %v1042_v16, %v954_v14  ;;  %v1441_v23 = vadd.f32 %v1440_v17, %v1352_v58  ;;  %1390 = vmatmul.bf16.gmra.mxu0 %v2976_v8 }
 0x1d8   : > { %1479 = vmatmul.bf16.gmra.mxu1 %v2984_v20 }
 0x1d9   : > { %v1108_v26 = vmax.f32 %v1043_v22, 0.0  ;;  %1568 = vmatmul.bf16.gmra.mxu2 %v2976_v8  ;;  %1698 = vst [vmem:[%s3075_s16] sm:$0xff] %v1441_v23 }
 0x1da   : > { %1657 = vmatmul.bf16.gmra.mxu3 %v2984_v20 }
 0x1db   : > { %v3079_v27 = vpack.c.bf16 %v1108_v26, %v1106_v24 }
 0x1dc   : > { %v1529_v31 = vpop.f32.mrf.mxu2  ;;  %v1353_v34 = vpop.f32.mrf.mxu0 }
 0x1dd   : > { %v1530_v48 = vadd.f32 %v1529_v31, %v3073_v28  ;;  %v1618_v33 = vpop.f32.mrf.mxu3  ;;  %v1354_v8 = vadd.f32 %v1353_v34, %v3063_v44  ;;  %v1442_v35 = vpop.f32.mrf.mxu1 }
 0x1df   : > { %v1619_v36 = vadd.f32 %v1618_v33, %v1530_v48  ;;  %v1443_v21 = vadd.f32 %v1442_v35, %v1354_v8 }
 0x1e1   : > { %1699 = vst [vmem:[%s3075_s16 + $0x8] sm:$0xff] %v1619_v36 }
 0x1e2   : > { %1700 = vst [vmem:[%s3075_s16 + $0x10] sm:$0xff] %v1443_v21 }
 0x1e4   : > { %v1531_v38 = vpop.f32.mrf.mxu2  ;;  %v1356_v41 = vpop.f32.mrf.mxu0 }
 0x1e5   : > { %v1532_v40 = vadd.f32 %v1531_v38, %v3073_v28  ;;  %v1620_v20 = vpop.f32.mrf.mxu3  ;;  %v1357_v42 = vadd.f32 %v1356_v41, %v3063_v44  ;;  %v1445_v43 = vpop.f32.mrf.mxu1 }
 0x1e7   : > { %v1621_v46 = vadd.f32 %v1620_v20, %v1532_v40  ;;  %v1446_v15 = vadd.f32 %v1445_v43, %v1357_v42  ;;  %1395 = vmatmul.bf16.gmra.mxu0 %v2988_v37 }
 0x1e8   : > { %1484 = vmatmul.bf16.gmra.mxu1 %v2996_v49 }
 0x1e9   : > { %1701 = vst [vmem:[%s3075_s16 + $0x18] sm:$0xff] %v1621_v46  ;;  %1573 = vmatmul.bf16.gmra.mxu2 %v2988_v37 }
 0x1ea   : > { %1702 = vst [vmem:[%s3075_s16 + $0x20] sm:$0xff] %v1446_v15  ;;  %1662 = vmatmul.bf16.gmra.mxu3 %v2996_v49 }
 0x1ec   : > { %v1534_v30 = vpop.f32.mrf.mxu2  ;;  %v1358_v52 = vpop.f32.mrf.mxu0 }
 0x1ed   : > { %v1535_v50 = vadd.f32 %v1534_v30, %v3073_v28  ;;  %v1623_v51 = vpop.f32.mrf.mxu3  ;;  %v1359_v54 = vadd.f32 %v1358_v52, %v3063_v44  ;;  %v1447_v55 = vpop.f32.mrf.mxu1 }
 0x1ef   : > { %v1624_v12 = vadd.f32 %v1623_v51, %v1535_v50  ;;  %v1448_v25 = vadd.f32 %v1447_v55, %v1359_v54 }
 0x1f1   : > { %1703 = vst [vmem:[%s3075_s16 + $0x28] sm:$0xff] %v1624_v12 }
 0x1f2   : > { %1704 = vst [vmem:[%s3075_s16 + $0x30] sm:$0xff] %v1448_v25 }
 0x1f4   : > { %v1536_v59 = vpop.f32.mrf.mxu2  ;;  %v1361_v62 = vpop.f32.mrf.mxu0 }
 0x1f5   : > { %v1537_v37 = vadd.f32 %v1536_v59, %v3073_v28  ;;  %v1625_v60 = vpop.f32.mrf.mxu3  ;;  %v1362_v49 = vadd.f32 %v1361_v62, %v3063_v44  ;;  %v1450_v0 = vpop.f32.mrf.mxu1 }
 0x1f7   : > { %v1626_v63 = vadd.f32 %v1625_v60, %v1537_v37  ;;  %v1451_v11 = vadd.f32 %v1450_v0, %v1362_v49  ;;  %1400 = vmatmul.bf16.gmra.mxu0 %v3000_v1 }
 0x1f8   : > { %1489 = vmatmul.bf16.gmra.mxu1 %v3008_v9 }
 0x1f9   : > { %1705 = vst [vmem:[%s3075_s16 + $0x38] sm:$0xff] %v1626_v63  ;;  %1578 = vmatmul.bf16.gmra.mxu2 %v3000_v1 }
 0x1fa   : > { %1706 = vst [vmem:[%s3075_s16 + $0x40] sm:$0xff] %v1451_v11  ;;  %1667 = vmatmul.bf16.gmra.mxu3 %v3008_v9 }
 0x1fc   : > { %v1539_v4 = vpop.f32.mrf.mxu2  ;;  %v1363_v7 = vpop.f32.mrf.mxu0 }
 0x1fd   : > { %v1540_v5 = vadd.f32 %v1539_v4, %v3073_v28  ;;  %v1628_v6 = vpop.f32.mrf.mxu3  ;;  %v1364_v53 = vadd.f32 %v1363_v7, %v3063_v44  ;;  %v1452_v3 = vpop.f32.mrf.mxu1 }
 0x1ff   : > { %v1629_v10 = vadd.f32 %v1628_v6, %v1540_v5  ;;  %v1453_v57 = vadd.f32 %v1452_v3, %v1364_v53 }
 0x201   : > { %1707 = vst [vmem:[%s3075_s16 + $0x48] sm:$0xff] %v1629_v10 }
 0x202   : > { %1708 = vst [vmem:[%s3075_s16 + $0x50] sm:$0xff] %v1453_v57 }
 0x204   : > { %v1541_v14 = vpop.f32.mrf.mxu2  ;;  %v1366_v18 = vpop.f32.mrf.mxu0 }
 0x205   : > { %v1542_v1 = vadd.f32 %v1541_v14, %v3073_v28  ;;  %v1630_v16 = vpop.f32.mrf.mxu3  ;;  %v1367_v9 = vadd.f32 %v1366_v18, %v3063_v44  ;;  %v1455_v45 = vpop.f32.mrf.mxu1 }
 0x207   : > { %v1631_v58 = vadd.f32 %v1630_v16, %v1542_v1  ;;  %v1456_v17 = vadd.f32 %v1455_v45, %v1367_v9  ;;  %1405 = vmatmul.bf16.gmra.mxu0 %v3012_v29 }
 0x208   : > { %1494 = vmatmul.bf16.gmra.mxu1 %v3020_v39 }
 0x209   : > { %1709 = vst [vmem:[%s3075_s16 + $0x58] sm:$0xff] %v1631_v58  ;;  %1583 = vmatmul.bf16.gmra.mxu2 %v3012_v29 }
 0x20a   : > { %1710 = vst [vmem:[%s3075_s16 + $0x60] sm:$0xff] %v1456_v17  ;;  %1672 = vmatmul.bf16.gmra.mxu3 %v3020_v39 }
 0x20c   : > { %v1544_v22 = vpop.f32.mrf.mxu2  ;;  %v1368_v26 = vpop.f32.mrf.mxu0 }
 0x20d   : > { %v1545_v23 = vadd.f32 %v1544_v22, %v3073_v28  ;;  %v1633_v24 = vpop.f32.mrf.mxu3  ;;  %v1369_v31 = vadd.f32 %v1368_v26, %v3063_v44  ;;  %v1457_v48 = vpop.f32.mrf.mxu1 }
 0x20f   : > { %v1634_v33 = vadd.f32 %v1633_v24, %v1545_v23  ;;  %v1458_v34 = vadd.f32 %v1457_v48, %v1369_v31 }
 0x211   : > { %1711 = vst [vmem:[%s3075_s16 + $0x68] sm:$0xff] %v1634_v33 }
 0x212   : > { %1712 = vst [vmem:[%s3075_s16 + $0x70] sm:$0xff] %v1458_v34 }
 0x214   : > { %v1546_v8 = vpop.f32.mrf.mxu2  ;;  %v1371_v36 = vpop.f32.mrf.mxu0 }
 0x215   : > { %v1547_v29 = vadd.f32 %v1546_v8, %v3073_v28  ;;  %v1635_v35 = vpop.f32.mrf.mxu3  ;;  %v1372_v39 = vadd.f32 %v1371_v36, %v3063_v44  ;;  %v1460_v21 = vpop.f32.mrf.mxu1 }
 0x217   : > { %v1636_v38 = vadd.f32 %v1635_v35, %v1547_v29  ;;  %v1461_v40 = vadd.f32 %v1460_v21, %v1372_v39  ;;  %1410 = vmatmul.bf16.gmra.mxu0 %v3024_v56 }
 0x218   : > { %1499 = vmatmul.bf16.gmra.mxu1 %v3032_v2 }
 0x219   : > { %1713 = vst [vmem:[%s3075_s16 + $0x78] sm:$0xff] %v1636_v38  ;;  %1588 = vmatmul.bf16.gmra.mxu2 %v3024_v56 }
 0x21a   : > { %1714 = vst [vmem:[%s3075_s16 + $0x80] sm:$0xff] %v1461_v40  ;;  %1677 = vmatmul.bf16.gmra.mxu3 %v3032_v2 }
 0x21c   : > { %v1549_v20 = vpop.f32.mrf.mxu2  ;;  %v1373_v43 = vpop.f32.mrf.mxu0 }
 0x21d   : > { %v1550_v41 = vadd.f32 %v1549_v20, %v3073_v28  ;;  %v1638_v42 = vpop.f32.mrf.mxu3  ;;  %v1374_v46 = vadd.f32 %v1373_v43, %v3063_v44  ;;  %v1462_v15 = vpop.f32.mrf.mxu1 }
 0x21f   : > { %v1639_v30 = vadd.f32 %v1638_v42, %v1550_v41  ;;  %v1463_v50 = vadd.f32 %v1462_v15, %v1374_v46 }
 0x221   : > { %1715 = vst [vmem:[%s3075_s16 + $0x88] sm:$0xff] %v1639_v30 }
 0x222   : > { %1716 = vst [vmem:[%s3075_s16 + $0x90] sm:$0xff] %v1463_v50 }
 0x224   : > { %v1551_v51 = vpop.f32.mrf.mxu2  ;;  %v1376_v54 = vpop.f32.mrf.mxu0 }
 0x225   : > { %v1552_v56 = vadd.f32 %v1551_v51, %v3073_v28  ;;  %v1640_v52 = vpop.f32.mrf.mxu3  ;;  %v1377_v2 = vadd.f32 %v1376_v54, %v3063_v44  ;;  %v1465_v55 = vpop.f32.mrf.mxu1 }
 0x227   : > { %v1641_v12 = vadd.f32 %v1640_v52, %v1552_v56  ;;  %v1466_v25 = vadd.f32 %v1465_v55, %v1377_v2  ;;  %1415 = vmatmul.bf16.gmra.mxu0 %v3036_v19 }
 0x228   : > { %1504 = vmatmul.bf16.gmra.mxu1 %v3044_v32 }
 0x229   : > { %1717 = vst [vmem:[%s3075_s16 + $0x98] sm:$0xff] %v1641_v12  ;;  %1593 = vmatmul.bf16.gmra.mxu2 %v3036_v19 }
 0x22a   : > { %1718 = vst [vmem:[%s3075_s16 + $0xa0] sm:$0xff] %v1466_v25  ;;  %1682 = vmatmul.bf16.gmra.mxu3 %v3044_v32 }
 0x22c   : > { %v1554_v59 = vpop.f32.mrf.mxu2  ;;  %v1378_v62 = vpop.f32.mrf.mxu0 }
 0x22d   : > { %v1555_v37 = vadd.f32 %v1554_v59, %v3073_v28  ;;  %v1643_v60 = vpop.f32.mrf.mxu3  ;;  %v1379_v49 = vadd.f32 %v1378_v62, %v3063_v44  ;;  %v1467_v0 = vpop.f32.mrf.mxu1 }
 0x22f   : > { %v1644_v63 = vadd.f32 %v1643_v60, %v1555_v37  ;;  %v1468_v11 = vadd.f32 %v1467_v0, %v1379_v49 }
 0x231   : > { %1719 = vst [vmem:[%s3075_s16 + $0xa8] sm:$0xff] %v1644_v63 }
 0x232   : > { %1720 = vst [vmem:[%s3075_s16 + $0xb0] sm:$0xff] %v1468_v11 }
 0x234   : > { %v1556_v4 = vpop.f32.mrf.mxu2  ;;  %v1381_v6 = vpop.f32.mrf.mxu0 }
 0x235   : > { %v1557_v19 = vadd.f32 %v1556_v4, %v3073_v28  ;;  %v1645_v5 = vpop.f32.mrf.mxu3  ;;  %v1382_v32 = vadd.f32 %v1381_v6, %v3063_v44  ;;  %v1470_v7 = vpop.f32.mrf.mxu1 }
 0x237   : > { %v1646_v53 = vadd.f32 %v1645_v5, %v1557_v19  ;;  %v1471_v3 = vadd.f32 %v1470_v7, %v1382_v32  ;;  %1420 = vmatmul.bf16.gmra.mxu0 %v3048_v47 }
 0x238   : > { %1509 = vmatmul.bf16.gmra.mxu1 %v3059_v61 }
 0x239   : > { %1721 = vst [vmem:[%s3075_s16 + $0xb8] sm:$0xff] %v1646_v53  ;;  %1598 = vmatmul.bf16.gmra.mxu2 %v3048_v47 }
 0x23a   : > { %1722 = vst [vmem:[%s3075_s16 + $0xc0] sm:$0xff] %v1471_v3  ;;  %1687 = vmatmul.bf16.gmra.mxu3 %v3059_v61 }
 0x23c   : > { %v1559_v10 = vpop.f32.mrf.mxu2  ;;  %v1383_v1 = vpop.f32.mrf.mxu0 }
 0x23d   : > { %v1560_v57 = vadd.f32 %v1559_v10, %v3073_v28  ;;  %v1648_v14 = vpop.f32.mrf.mxu3  ;;  %v1384_v16 = vadd.f32 %v1383_v1, %v3063_v44  ;;  %v1472_v18 = vpop.f32.mrf.mxu1 }
 0x23f   : > { %v1649_v9 = vadd.f32 %v1648_v14, %v1560_v57  ;;  %v1473_v45 = vadd.f32 %v1472_v18, %v1384_v16 }
 0x241   : > { %1723 = vst [vmem:[%s3075_s16 + $0xc8] sm:$0xff] %v1649_v9 }
 0x242   : > { %1724 = vst [vmem:[%s3075_s16 + $0xd0] sm:$0xff] %v1473_v45 }
 0x244   : > { %v1561_v58 = vpop.f32.mrf.mxu2  ;;  %v1386_v22 = vpop.f32.mrf.mxu0 }
 0x245   : > { %v1562_v47 = vadd.f32 %v1561_v58, %v3073_v28  ;;  %v1650_v17 = vpop.f32.mrf.mxu3  ;;  %v1387_v61 = vadd.f32 %v1386_v22, %v3063_v44  ;;  %v1475_v23 = vpop.f32.mrf.mxu1 }
 0x247   : > { %v1651_v24 = vadd.f32 %v1650_v17, %v1562_v47  ;;  %v1476_v26 = vadd.f32 %v1475_v23, %v1387_v61  ;;  %1425 = vmatmul.bf16.gmra.mxu0 %v3066_v13 }
 0x248   : > { %1514 = vmatmul.bf16.gmra.mxu1 %v3079_v27 }
 0x249   : > { %1725 = vst [vmem:[%s3075_s16 + $0xd8] sm:$0xff] %v1651_v24  ;;  %1603 = vmatmul.bf16.gmra.mxu2 %v3066_v13 }
 0x24a   : > { %1726 = vst [vmem:[%s3075_s16 + $0xe0] sm:$0xff] %v1476_v26  ;;  %1692 = vmatmul.bf16.gmra.mxu3 %v3079_v27 }
 0x24c   : > { %v1564_v31 = vpop.f32.mrf.mxu2  ;;  %v1388_v34 = vpop.f32.mrf.mxu0 }
 0x24d   : > { %v1565_v48 = vadd.f32 %v1564_v31, %v3073_v28  ;;  %v1653_v33 = vpop.f32.mrf.mxu3  ;;  %v1389_v8 = vadd.f32 %v1388_v34, %v3063_v44  ;;  %v1477_v29 = vpop.f32.mrf.mxu1 }
 0x24f   : > { %v1654_v35 = vadd.f32 %v1653_v33, %v1565_v48  ;;  %v1478_v36 = vadd.f32 %v1477_v29, %v1389_v8 }
 0x251   : > { %1727 = vst [vmem:[%s3075_s16 + $0xe8] sm:$0xff] %v1654_v35 }
 0x252   : > { %1728 = vst [vmem:[%s3075_s16 + $0xf0] sm:$0xff] %v1478_v36 }
 0x254   : > { %v1566_v39 = vpop.f32.mrf.mxu2  ;;  %v1391_v27 = vpop.f32.mrf.mxu0 }
 0x255   : > { %v1567_v13 = vadd.f32 %v1566_v39, %v3073_v28  ;;  %v1655_v21 = vpop.f32.mrf.mxu3  ;;  %v1392_v38 = vadd.f32 %v1391_v27, %v3063_v44  ;;  %v1480_v40 = vpop.f32.mrf.mxu1 }
 0x257   : > { %v1656_v20 = vadd.f32 %v1655_v21, %v1567_v13  ;;  %v1481_v41 = vadd.f32 %v1480_v40, %v1392_v38 }
 0x259   : > { %1729 = vst [vmem:[%s3075_s16 + $0xf8] sm:$0xff] %v1656_v20 }
 0x25a   : > { %1730 = vst [vmem:[%s3075_s16 + $0x100] sm:$0xff] %v1481_v41 }
 0x25c   : > { %v1569_v42 = vpop.f32.mrf.mxu2  ;;  %v1393_v15 = vpop.f32.mrf.mxu0 }
 0x25d   : > { %v1570_v43 = vadd.f32 %v1569_v42, %v3073_v28  ;;  %v1658_v46 = vpop.f32.mrf.mxu3  ;;  %v1394_v30 = vadd.f32 %v1393_v15, %v3063_v44  ;;  %v1482_v50 = vpop.f32.mrf.mxu1 }
 0x25f   : > { %v1659_v51 = vadd.f32 %v1658_v46, %v1570_v43  ;;  %v1483_v56 = vadd.f32 %v1482_v50, %v1394_v30 }
 0x261   : > { %1731 = vst [vmem:[%s3075_s16 + $0x108] sm:$0xff] %v1659_v51 }
 0x262   : > { %1732 = vst [vmem:[%s3075_s16 + $0x110] sm:$0xff] %v1483_v56 }
 0x264   : > { %v1571_v52 = vpop.f32.mrf.mxu2  ;;  %v1396_v55 = vpop.f32.mrf.mxu0 }
 0x265   : > { %v1572_v54 = vadd.f32 %v1571_v52, %v3073_v28  ;;  %v1660_v2 = vpop.f32.mrf.mxu3  ;;  %v1397_v12 = vadd.f32 %v1396_v55, %v3063_v44  ;;  %v1485_v25 = vpop.f32.mrf.mxu1 }
 0x267   : > { %v1661_v59 = vadd.f32 %v1660_v2, %v1572_v54  ;;  %v1486_v37 = vadd.f32 %v1485_v25, %v1397_v12 }
 0x269   : > { %1733 = vst [vmem:[%s3075_s16 + $0x118] sm:$0xff] %v1661_v59 }
 0x26a   : > { %1734 = vst [vmem:[%s3075_s16 + $0x120] sm:$0xff] %v1486_v37 }
 0x26c   : > { %v1574_v60 = vpop.f32.mrf.mxu2  ;;  %v1398_v0 = vpop.f32.mrf.mxu0 }
 0x26d   : > { %v1575_v62 = vadd.f32 %v1574_v60, %v3073_v28  ;;  %v1663_v49 = vpop.f32.mrf.mxu3  ;;  %v1399_v63 = vadd.f32 %v1398_v0, %v3063_v44  ;;  %v1487_v11 = vpop.f32.mrf.mxu1 }
 0x26f   : > { %v1664_v4 = vadd.f32 %v1663_v49, %v1575_v62  ;;  %v1488_v19 = vadd.f32 %v1487_v11, %v1399_v63 }
 0x271   : > { %1735 = vst [vmem:[%s3075_s16 + $0x128] sm:$0xff] %v1664_v4 }
 0x272   : > { %1736 = vst [vmem:[%s3075_s16 + $0x130] sm:$0xff] %v1488_v19 }
 0x274   : > { %v1576_v5 = vpop.f32.mrf.mxu2  ;;  %v1401_v7 = vpop.f32.mrf.mxu0 }
 0x275   : > { %v1577_v6 = vadd.f32 %v1576_v5, %v3073_v28  ;;  %v1665_v32 = vpop.f32.mrf.mxu3  ;;  %v1402_v53 = vadd.f32 %v1401_v7, %v3063_v44  ;;  %v1490_v3 = vpop.f32.mrf.mxu1 }
 0x277   : > { %v1666_v10 = vadd.f32 %v1665_v32, %v1577_v6  ;;  %v1491_v57 = vadd.f32 %v1490_v3, %v1402_v53 }
 0x279   : > { %1737 = vst [vmem:[%s3075_s16 + $0x138] sm:$0xff] %v1666_v10 }
 0x27a   : > { %1738 = vst [vmem:[%s3075_s16 + $0x140] sm:$0xff] %v1491_v57 }
 0x27c   : > { %v1579_v14 = vpop.f32.mrf.mxu2  ;;  %v1403_v18 = vpop.f32.mrf.mxu0 }
 0x27d   : > { %v1580_v1 = vadd.f32 %v1579_v14, %v3073_v28  ;;  %v1668_v16 = vpop.f32.mrf.mxu3  ;;  %v1404_v9 = vadd.f32 %v1403_v18, %v3063_v44  ;;  %v1492_v45 = vpop.f32.mrf.mxu1 }
 0x27f   : > { %v1669_v58 = vadd.f32 %v1668_v16, %v1580_v1  ;;  %v1493_v47 = vadd.f32 %v1492_v45, %v1404_v9 }
 0x281   : > { %1739 = vst [vmem:[%s3075_s16 + $0x148] sm:$0xff] %v1669_v58 }
 0x282   : > { %1740 = vst [vmem:[%s3075_s16 + $0x150] sm:$0xff] %v1493_v47 }
 0x284   : > { %v1581_v17 = vpop.f32.mrf.mxu2  ;;  %v1406_v23 = vpop.f32.mrf.mxu0 }
 0x285   : > { %v1582_v22 = vadd.f32 %v1581_v17, %v3073_v28  ;;  %v1670_v61 = vpop.f32.mrf.mxu3  ;;  %v1407_v24 = vadd.f32 %v1406_v23, %v3063_v44  ;;  %v1495_v26 = vpop.f32.mrf.mxu1 }
 0x287   : > { %v1671_v31 = vadd.f32 %v1670_v61, %v1582_v22  ;;  %v1496_v48 = vadd.f32 %v1495_v26, %v1407_v24 }
 0x289   : > { %1741 = vst [vmem:[%s3075_s16 + $0x158] sm:$0xff] %v1671_v31 }
 0x28a   : > { %1742 = vst [vmem:[%s3075_s16 + $0x160] sm:$0xff] %v1496_v48 }
 0x28c   : > { %v1584_v33 = vpop.f32.mrf.mxu2  ;;  %v1408_v29 = vpop.f32.mrf.mxu0 }
 0x28d   : > { %v1585_v34 = vadd.f32 %v1584_v33, %v3073_v28  ;;  %v1673_v8 = vpop.f32.mrf.mxu3  ;;  %v1409_v35 = vadd.f32 %v1408_v29, %v3063_v44  ;;  %v1497_v36 = vpop.f32.mrf.mxu1 }
 0x28f   : > { %v1674_v39 = vadd.f32 %v1673_v8, %v1585_v34  ;;  %v1498_v13 = vadd.f32 %v1497_v36, %v1409_v35 }
 0x291   : > { %1743 = vst [vmem:[%s3075_s16 + $0x168] sm:$0xff] %v1674_v39 }
 0x292   : > { %1744 = vst [vmem:[%s3075_s16 + $0x170] sm:$0xff] %v1498_v13 }
 0x294   : > { %v1586_v21 = vpop.f32.mrf.mxu2  ;;  %v1411_v40 = vpop.f32.mrf.mxu0 }
 0x295   : > { %v1587_v27 = vadd.f32 %v1586_v21, %v3073_v28  ;;  %v1675_v38 = vpop.f32.mrf.mxu3  ;;  %v1412_v20 = vadd.f32 %v1411_v40, %v3063_v44  ;;  %v1500_v41 = vpop.f32.mrf.mxu1 }
 0x297   : > { %v1676_v42 = vadd.f32 %v1675_v38, %v1587_v27  ;;  %v1501_v43 = vadd.f32 %v1500_v41, %v1412_v20 }
 0x299   : > { %1745 = vst [vmem:[%s3075_s16 + $0x178] sm:$0xff] %v1676_v42 }
 0x29a   : > { %1746 = vst [vmem:[%s3075_s16 + $0x180] sm:$0xff] %v1501_v43 }
 0x29c   : > { %v1589_v46 = vpop.f32.mrf.mxu2  ;;  %v1413_v50 = vpop.f32.mrf.mxu0 }
 0x29d   : > { %v1590_v15 = vadd.f32 %v1589_v46, %v3073_v28  ;;  %v1678_v30 = vpop.f32.mrf.mxu3  ;;  %v1414_v51 = vadd.f32 %v1413_v50, %v3063_v44  ;;  %v1502_v56 = vpop.f32.mrf.mxu1 }
 0x29f   : > { %v1679_v52 = vadd.f32 %v1678_v30, %v1590_v15  ;;  %v1503_v54 = vadd.f32 %v1502_v56, %v1414_v51 }
 0x2a1   : > { %1747 = vst [vmem:[%s3075_s16 + $0x188] sm:$0xff] %v1679_v52 }
 0x2a2   : > { %1748 = vst [vmem:[%s3075_s16 + $0x190] sm:$0xff] %v1503_v54 }
 0x2a4   : > { %v1591_v2 = vpop.f32.mrf.mxu2  ;;  %v1416_v25 = vpop.f32.mrf.mxu0 }
 0x2a5   : > { %v1592_v55 = vadd.f32 %v1591_v2, %v3073_v28  ;;  %v1680_v12 = vpop.f32.mrf.mxu3  ;;  %v1417_v59 = vadd.f32 %v1416_v25, %v3063_v44  ;;  %v1505_v37 = vpop.f32.mrf.mxu1 }
 0x2a7   : > { %v1681_v60 = vadd.f32 %v1680_v12, %v1592_v55  ;;  %v1506_v62 = vadd.f32 %v1505_v37, %v1417_v59 }
 0x2a9   : > { %1749 = vst [vmem:[%s3075_s16 + $0x198] sm:$0xff] %v1681_v60 }
 0x2aa   : > { %1750 = vst [vmem:[%s3075_s16 + $0x1a0] sm:$0xff] %v1506_v62 }
 0x2ac   : > { %v1594_v49 = vpop.f32.mrf.mxu2  ;;  %v1418_v11 = vpop.f32.mrf.mxu0 }
 0x2ad   : > { %v1595_v0 = vadd.f32 %v1594_v49, %v3073_v28  ;;  %v1683_v63 = vpop.f32.mrf.mxu3  ;;  %v1419_v4 = vadd.f32 %v1418_v11, %v3063_v44  ;;  %v1507_v19 = vpop.f32.mrf.mxu1 }
 0x2af   : > { %v1684_v5 = vadd.f32 %v1683_v63, %v1595_v0  ;;  %v1508_v6 = vadd.f32 %v1507_v19, %v1419_v4 }
 0x2b1   : > { %1751 = vst [vmem:[%s3075_s16 + $0x1a8] sm:$0xff] %v1684_v5 }
 0x2b2   : > { %1752 = vst [vmem:[%s3075_s16 + $0x1b0] sm:$0xff] %v1508_v6 }
 0x2b4   : > { %v1596_v32 = vpop.f32.mrf.mxu2  ;;  %v1421_v3 = vpop.f32.mrf.mxu0 }
 0x2b5   : > { %v1597_v7 = vadd.f32 %v1596_v32, %v3073_v28  ;;  %v1685_v53 = vpop.f32.mrf.mxu3  ;;  %v1422_v10 = vadd.f32 %v1421_v3, %v3063_v44  ;;  %v1510_v57 = vpop.f32.mrf.mxu1 }
 0x2b7   : > { %v1686_v14 = vadd.f32 %v1685_v53, %v1597_v7  ;;  %v1511_v1 = vadd.f32 %v1510_v57, %v1422_v10 }
 0x2b9   : > { %1753 = vst [vmem:[%s3075_s16 + $0x1b8] sm:$0xff] %v1686_v14 }
 0x2ba   : > { %1754 = vst [vmem:[%s3075_s16 + $0x1c0] sm:$0xff] %v1511_v1 }
 0x2bc   : > { %v1599_v16 = vpop.f32.mrf.mxu2  ;;  %v1423_v45 = vpop.f32.mrf.mxu0 }
 0x2bd   : > { %v1600_v18 = vadd.f32 %v1599_v16, %v3073_v28  ;;  %v1688_v9 = vpop.f32.mrf.mxu3  ;;  %v1424_v58 = vadd.f32 %v1423_v45, %v3063_v44  ;;  %v1512_v47 = vpop.f32.mrf.mxu1 }
 0x2bf   : > { %v1689_v17 = vadd.f32 %v1688_v9, %v1600_v18  ;;  %v1513_v22 = vadd.f32 %v1512_v47, %v1424_v58 }
 0x2c1   : > { %1755 = vst [vmem:[%s3075_s16 + $0x1c8] sm:$0xff] %v1689_v17 }
 0x2c2   : > { %1756 = vst [vmem:[%s3075_s16 + $0x1d0] sm:$0xff] %v1513_v22 }
 0x2c4   : > { %v1601_v61 = vpop.f32.mrf.mxu2  ;;  %v1426_v26 = vpop.f32.mrf.mxu0 }
 0x2c5   : > { %v1602_v23 = vadd.f32 %v1601_v61, %v3073_v28  ;;  %v1690_v24 = vpop.f32.mrf.mxu3  ;;  %v1427_v31 = vadd.f32 %v1426_v26, %v3063_v44  ;;  %v1515_v48 = vpop.f32.mrf.mxu1 }
 0x2c7   : > { %v1691_v33 = vadd.f32 %v1690_v24, %v1602_v23  ;;  %v1516_v34 = vadd.f32 %v1515_v48, %v1427_v31 }
 0x2c9   : > { %1757 = vst [vmem:[%s3075_s16 + $0x1d8] sm:$0xff] %v1691_v33 }
 0x2ca   : > { %1758 = vst [vmem:[%s3075_s16 + $0x1e0] sm:$0xff] %v1516_v34 }
 0x2cc   : > { %v1604_v8 = vpop.f32.mrf.mxu2  ;;  %v1428_v36 = vpop.f32.mrf.mxu0 }
 0x2cd   : > { %v1605_v29 = vadd.f32 %v1604_v8, %v3073_v28  ;;  %v1693_v35 = vpop.f32.mrf.mxu3  ;;  %v1429_v39 = vadd.f32 %v1428_v36, %v3063_v44  ;;  %v1517_v21 = vpop.f32.mrf.mxu1 }
 0x2cf   : > { %v1694_v13 = vadd.f32 %v1693_v35, %v1605_v29  ;;  %v1518_v27 = vadd.f32 %v1517_v21, %v1429_v39 }
 0x2d1   : > { %1759 = vst [vmem:[%s3075_s16 + $0x1e8] sm:$0xff] %v1694_v13 }
 0x2d2   : > { %1760 = vst [vmem:[%s3075_s16 + $0x1f0] sm:$0xff] %v1518_v27 }
 0x2d4   : > { %v1606_v38 = vpop.f32.mrf.mxu2 }
 0x2d5   : > { %v1607_v40 = vadd.f32 %v1606_v38, %v3073_v28  ;;  %v1695_v20 = vpop.f32.mrf.mxu3 }
 0x2d7   : > { %v1696_v44 = vadd.f32 %v1695_v20, %v1607_v40 }
 0x2d9   : > { %1761 = vst [vmem:[%s3075_s16 + $0x1f8] sm:$0xff] %v1696_v44 }
 0x2da   : > { %2615 = shalt.err (!%p2612_p10)
}
 0x2db   : > { %s2669_s17 = smov 256   ;;  %s2670_s12 = smov 16  }
 0x2dc   : > { %2401 = dma.vmem_to_hbm [thread:$0]  (%p2789_p3), %s1777_s10, 8192, %s1779_s14, %s1763_s22, %s2669_s17, %s2669_s17, %s2670_s12  }
 0x2dd PF: > { %s1793_s16 = sand.u32 1, %s2650_s18   ;;  %p3283_p12 = scmp.ge.s32.totalorder %s2662_s21, 2 }
 0x2de   : > { %s1794_s23 = scalar_lea.sflag [#allocation4], %s1793_s16 }
 0x2df   : > { %p2418_p13 = pnand %p3283_p12, %p2736_p6 }
 0x2e1   : > { %p2419_p0 = pneg %p2418_p13 }
 0x2e3   : > { %2645 = dma.done.wait (%p2419_p0), %s1794_s23, 8192  }
 0x2e4   : > { %2647 = vsyncadd (%p2419_p0), %s1794_s23, 4294959104  ;;  %p20_p5 = scmp.ge.s32.totalorder %s2771_s27, 4   ;;  %s3284_s18 = smov %s2654_s19 }
 0x2e5   : > { %s3285_s19 = smov %s2658_s20  ;;  %s3286_s20 = smov %s2785_s6 }
 0x2e6   : > { %s3287_s21 = smov %s2771_s27  ;;  %22 = sbr.rel (!%p20_p5) target bundleno = 7 (0x7), region = 97 }
 0x2eb   :  { %1800 = vsyncpa [#allocation3], 1 }
 0x2ec   :  { %1802 = vsyncpa [#allocation3 + $0x1], 1 }
 0x2ed   :  { %1803 = vsyncpa [#allocation6], 1 }
 0x2ee   :  { %1804 = vsyncpa [#allocation9], 1 }
 0x2ef   :  { %1805 = vsyncpa [#allocation4], 1 }
 0x2f0   :  { %1807 = vsyncpa [#allocation4 + $0x1], 1 }

</bundles_post_ra>
